<compile_context>
chip_gen: v5e
topology: v5e:2x2
jax: 0.10.0
libtpu: 0.0.40
codegen_flags: <defaults>
</compile_context>

<pallas_src>
import functools

import jax
import jax.numpy as jnp
from jax.experimental import pallas as pl
from jax.experimental.pallas import tpu as pltpu


# (kernel_size K, dilation) per gated conv, in network order.
LAYER_CFG = ((3, 1), (6, 1), (3, 1), (6, 1), (3, 1), (6, 1),
             (3, 3), (3, 2), (3, 2), (3, 2), (3, 2))
LAYER_NAMES = ("b1_up", "b1_down", "b2_up", "b2_down", "b3_up", "b3_down",
               "c4", "c5", "c6", "c7", "c8")
_MAX_SHIFT = 6   # max (K-1)*dilation over all layers


# ------------------------------- fused kernel ------------------------------- #

def _swishnet_kernel(x_ref, shift_ref, pool_ref, w_out_ref, b_out_ref, *rest,
                     layer_cfg):
    """Entire SwishNet forward in one kernel.

    x_ref    : (B*T, C_in)             activations, batch folded onto sublanes
    shift_ref: (MAX_SHIFT, B*T, B*T)   causal shift-by-s matrices, s = 1..MAX_SHIFT
    pool_ref : (B, B*T)                per-batch mean-over-time matrix
    w_out_ref: (40, n_out), b_out_ref: (1, n_out)
    rest     : w0,b0, w1,b1, ... packed gated-conv params, then the output ref
               wi : (K_i*C_i, 2*O_i) = [w1 | w2], tap-major rows
               bi : (1, 2*O_i)       = [b1 | b2]
    output   : (B, n_out) softmax probabilities
    """
    o_ref = rest[-1]
    wb = rest[:-1]

    def gated(x, idx):
        K, dil = layer_cfg[idx]
        w = wb[2 * idx][...]                       # (K*C, 2*O)
        b = wb[2 * idx + 1][...]                   # (1, 2*O)
        out_ch = w.shape[-1] // 2
        cols = []
        for j in range(K):                         # tap j reads x[t - (K-1-j)*dil]
            s = (K - 1 - j) * dil
            if s == 0:
                cols.append(x)
            else:                                  # causal shift as a tiny MXU matmul
                cols.append(jnp.dot(shift_ref[s - 1], x,
                                    preferred_element_type=jnp.float32))
        xi = jnp.concatenate(cols, axis=-1)        # (B*T, K*C) im2col
        z = jnp.dot(xi, w, preferred_element_type=jnp.float32) + b
        return jax.nn.sigmoid(z[:, :out_ch]) * jnp.tanh(z[:, out_ch:])

    x = x_ref[...]

    # causal blocks 1-3 (block3 is residual)
    x = jnp.concatenate([gated(x, 0), gated(x, 1)], axis=-1)     # -> 16 ch
    x = jnp.concatenate([gated(x, 2), gated(x, 3)], axis=-1)     # -> 8 ch
    x = x + jnp.concatenate([gated(x, 4), gated(x, 5)], axis=-1)
    # dilated gated convs 4-8
    x = x + gated(x, 6)
    b5 = gated(x, 7); x = x + b5
    b6 = gated(x, 8); x = x + b6
    b7 = gated(x, 9)
    b8 = gated(x, 10)

    # head: conv_out over concat(b5..b8) == sum of per-branch matmuls with the
    # matching weight slices, then global average pool (pool matmul) + softmax.
    w_out = w_out_ref[...]                                       # (40, n_out)
    c = jnp.zeros((b5.shape[0], w_out.shape[-1]), jnp.float32)   # (B*T, n_out)
    off = 0
    for branch in (b5, b6, b7, b8):
        width = branch.shape[-1]
        c = c + jnp.dot(branch, w_out[off:off + width, :],
                        preferred_element_type=jnp.float32)
        off += width
    logits = jnp.dot(pool_ref[...], c,
                     preferred_element_type=jnp.float32) + b_out_ref[...]   # (B, n_out)
    m = jnp.max(logits, axis=-1, keepdims=True)
    e = jnp.exp(logits - m)
    o_ref[...] = (e / jnp.sum(e, axis=-1, keepdims=True)).astype(o_ref.dtype)


# --------------------------- host-side preparation -------------------------- #

def _pack_gated(p):
    """Pack (w1, b1, w2, b2) of one gated conv into im2col-friendly matrices."""
    K, C, O = p["w1"].shape
    w = jnp.concatenate([p["w1"].reshape(K * C, O),
                         p["w2"].reshape(K * C, O)], axis=1)     # (K*C, 2*O)
    b = jnp.concatenate([p["b1"], p["b2"]], axis=1)              # (1, 2*O)
    return w, b


def pack_swishnet_params(params):
    flat = []
    for name in LAYER_NAMES:
        w, b = _pack_gated(params[name])
        flat.extend((w, b))
    return {"layers": tuple(flat), "out_w": params["out_w"], "out_b": params["out_b"]}


def _causal_shift_matrices(batch, time, max_shift):
    """S_s @ x  ==  x shifted down by s timesteps, zero-filled, per batch."""
    bt = batch * time
    r = jnp.arange(bt)[:, None]
    q = jnp.arange(bt)[None, :]
    mats = [((r - q == s) & (r % time >= s)).astype(jnp.float32)
            for s in range(1, max_shift + 1)]
    return jnp.stack(mats)                                        # (max_shift, BT, BT)


def _mean_pool_matrix(batch, time):
    r = jnp.arange(batch * time)[None, :]
    b = jnp.arange(batch)[:, None]
    return jnp.where(r // time == b, 1.0 / time, 0.0).astype(jnp.float32)   # (B, BT)


# ------------------------------ SwishNet forward ---------------------------- #

def swishnet_forward(x_nct, packed):
    """x_nct: (B, C_in, T) PyTorch Conv1d layout; returns (B, n_out, 1)."""
    B, C_in, T = x_nct.shape
    n_out = packed["out_w"].shape[-1]
    # Single boundary layout op (compile-time constants below fold into the graph).
    x_btc = jnp.transpose(x_nct, (0, 2, 1)).reshape(B * T, C_in)
    shift = _causal_shift_matrices(B, T, _MAX_SHIFT)
    pool = _mean_pool_matrix(B, T)

    inputs = (x_btc, shift, pool, packed["out_w"], packed["out_b"]) + tuple(packed["layers"])
    kernel = functools.partial(_swishnet_kernel, layer_cfg=LAYER_CFG)
    probs = pl.pallas_call(
        kernel,
        out_shape=jax.ShapeDtypeStruct((B, n_out), x_nct.dtype),
        in_specs=[pl.BlockSpec(memory_space=pltpu.MemorySpace.VMEM) for _ in inputs],
        out_specs=pl.BlockSpec(memory_space=pltpu.MemorySpace.VMEM),
    )(*inputs)
    return probs[:, :, None]                                      # (B, n_out, 1)


# --------------------------- deterministic params --------------------------- #

def _init_gated_conv(key, c_in, filters, length):
    out_ch = filters // 2
    ks = jax.random.split(key, 4)
    bound = 1.0 / (c_in * length) ** 0.5
    u = lambda k, shape: jax.random.uniform(k, shape, jnp.float32, -bound, bound)
    return {"w1": u(ks[0], (length, c_in, out_ch)), "b1": u(ks[1], (1, out_ch)),
            "w2": u(ks[2], (length, c_in, out_ch)), "b2": u(ks[3], (1, out_ch))}


def init_swishnet_params(key, in_channels=20, out_channels=2, width_multiply=1):
    w8, w16, w32 = 8 * width_multiply, 16 * width_multiply, 32 * width_multiply
    ks = jax.random.split(key, 13)
    p = {
        "b1_up":   _init_gated_conv(ks[0], in_channels, w16, 3),
        "b1_down": _init_gated_conv(ks[1], in_channels, w16, 6),
        "b2_up":   _init_gated_conv(ks[2], w16, w8, 3),
        "b2_down": _init_gated_conv(ks[3], w16, w8, 6),
        "b3_up":   _init_gated_conv(ks[4], w8, w8, 3),
        "b3_down": _init_gated_conv(ks[5], w8, w8, 6),
        "c4": _init_gated_conv(ks[6], w8, w16, 3),
        "c5": _init_gated_conv(ks[7], w8, w16, 3),
        "c6": _init_gated_conv(ks[8], w8, w16, 3),
        "c7": _init_gated_conv(ks[9], w8, w16, 3),
        "c8": _init_gated_conv(ks[10], w8, w32, 3),
    }
    w40 = 5 * w8
    bound = 1.0 / w40 ** 0.5
    p["out_w"] = jax.random.uniform(ks[11], (w40, out_channels), jnp.float32, -bound, bound)
    p["out_b"] = jax.random.uniform(ks[12], (1, out_channels), jnp.float32, -bound, bound)
    return p


# ----------------------------- pure-JAX reference --------------------------- #

def _ref_gated_conv(x_btc, p, length, dilation):
    x = jnp.transpose(x_btc, (0, 2, 1))                                   # (B, C, T)
    pad = (length - 1) * dilation

    def conv(w_kco, bias):
        w = jnp.transpose(w_kco, (2, 1, 0))                               # (O, C, K)
        y = jax.lax.conv_general_dilated(
            x, w, window_strides=(1,), padding=[(pad, 0)],
            rhs_dilation=(dilation,), dimension_numbers=("NCH", "OIH", "NCH"))
        return y + bias[:, :, None]

    y = jax.nn.sigmoid(conv(p["w1"], p["b1"])) * jnp.tanh(conv(p["w2"], p["b2"]))
    return jnp.transpose(y, (0, 2, 1))


def _ref_block(x, p_up, p_down):
    return jnp.concatenate([_ref_gated_conv(x, p_up, 3, 1),
                            _ref_gated_conv(x, p_down, 6, 1)], axis=-1)


def swishnet_reference(x_nct, params):
    x = jnp.transpose(x_nct, (0, 2, 1))
    x = _ref_block(x, params["b1_up"], params["b1_down"])
    x = _ref_block(x, params["b2_up"], params["b2_down"])
    x = x + _ref_block(x, params["b3_up"], params["b3_down"])
    x = x + _ref_gated_conv(x, params["c4"], 3, 3)
    b5 = _ref_gated_conv(x, params["c5"], 3, 2); x = x + b5
    b6 = _ref_gated_conv(x, params["c6"], 3, 2); x = x + b6
    b7 = _ref_gated_conv(x, params["c7"], 3, 2)
    b8 = _ref_gated_conv(x, params["c8"], 3, 2)
    xcat = jnp.concatenate([b5, b6, b7, b8], axis=-1)
    logits = jnp.mean(jnp.einsum("btc,co->bto", xcat, params["out_w"]), axis=1) + params["out_b"]
    probs = jax.nn.softmax(logits, axis=-1)
    return probs[:, :, None]                                              # (B, 2, 1)


# ----------------------------------- main ----------------------------------- #

if __name__ == "__main__":
    B, C_IN, T = 2, 20, 16
    params = init_swishnet_params(jax.random.PRNGKey(1), in_channels=C_IN, out_channels=2)
    x = jax.random.normal(jax.random.PRNGKey(0), (B, C_IN, T), jnp.float32)

    packed = pack_swishnet_params(params)
    fwd = jax.jit(swishnet_forward)
    out = jax.block_until_ready(fwd(x, packed))

    assert out.shape == (B, 2, 1), out.shape
    # softmax rows sum to 1
    assert jnp.allclose(jnp.sum(out, axis=1), 1.0, atol=1e-5)
    # match the pure-JAX reference (MXU default precision -> loose tolerance)
    ref = jax.block_until_ready(swishnet_reference(x, params))
    assert jnp.allclose(out, ref, atol=2e-3, rtol=2e-3)

    print("KERNEL_OK")
</pallas_src>

<mosaic_0001>
module attributes {stable_mosaic.version = 11 : i64} {
  func.func @_swishnet_kernel(%arg0: memref<32x20xf32, #tpu.memory_space<vmem>>, %arg1: memref<6x32x32xf32, #tpu.memory_space<vmem>>, %arg2: memref<2x32xf32, #tpu.memory_space<vmem>>, %arg3: memref<40x2xf32, #tpu.memory_space<vmem>>, %arg4: memref<1x2xf32, #tpu.memory_space<vmem>>, %arg5: memref<60x16xf32, #tpu.memory_space<vmem>>, %arg6: memref<1x16xf32, #tpu.memory_space<vmem>>, %arg7: memref<120x16xf32, #tpu.memory_space<vmem>>, %arg8: memref<1x16xf32, #tpu.memory_space<vmem>>, %arg9: memref<48x8xf32, #tpu.memory_space<vmem>>, %arg10: memref<1x8xf32, #tpu.memory_space<vmem>>, %arg11: memref<96x8xf32, #tpu.memory_space<vmem>>, %arg12: memref<1x8xf32, #tpu.memory_space<vmem>>, %arg13: memref<24x8xf32, #tpu.memory_space<vmem>>, %arg14: memref<1x8xf32, #tpu.memory_space<vmem>>, %arg15: memref<48x8xf32, #tpu.memory_space<vmem>>, %arg16: memref<1x8xf32, #tpu.memory_space<vmem>>, %arg17: memref<24x16xf32, #tpu.memory_space<vmem>>, %arg18: memref<1x16xf32, #tpu.memory_space<vmem>>, %arg19: memref<24x16xf32, #tpu.memory_space<vmem>>, %arg20: memref<1x16xf32, #tpu.memory_space<vmem>>, %arg21: memref<24x16xf32, #tpu.memory_space<vmem>>, %arg22: memref<1x16xf32, #tpu.memory_space<vmem>>, %arg23: memref<24x16xf32, #tpu.memory_space<vmem>>, %arg24: memref<1x16xf32, #tpu.memory_space<vmem>>, %arg25: memref<24x32xf32, #tpu.memory_space<vmem>>, %arg26: memref<1x32xf32, #tpu.memory_space<vmem>>, %arg27: memref<2x2xf32, #tpu.memory_space<vmem>>) attributes {dimension_semantics = [], scalar_prefetch = 0 : i64, scratch_operands = 0 : i64, tpu.core_type = #tpu.core_type<tc>} {
    %c0 = arith.constant 0 : index
    %c0_0 = arith.constant 0 : index
    %0 = vector.load %arg0[%c0, %c0_0] : memref<32x20xf32, #tpu.memory_space<vmem>>, vector<32x20xf32>
    %c0_1 = arith.constant 0 : index
    %c0_2 = arith.constant 0 : index
    %1 = vector.load %arg5[%c0_1, %c0_2] : memref<60x16xf32, #tpu.memory_space<vmem>>, vector<60x16xf32>
    %c0_3 = arith.constant 0 : index
    %c0_4 = arith.constant 0 : index
    %2 = vector.load %arg6[%c0_3, %c0_4] : memref<1x16xf32, #tpu.memory_space<vmem>>, vector<1x16xf32>
    %c1 = arith.constant 1 : index
    %c0_5 = arith.constant 0 : index
    %c0_6 = arith.constant 0 : index
    %3 = vector.load %arg1[%c1, %c0_5, %c0_6] : memref<6x32x32xf32, #tpu.memory_space<vmem>>, vector<1x32x32xf32>
    %4 = vector.shape_cast %3 : vector<1x32x32xf32> to vector<32x32xf32>
    %cst = arith.constant dense<0.000000e+00> : vector<32x20xf32>
    %5 = tpu.matmul %4, %0, %cst {dimension_numbers = #tpu.dot_dimension_numbers<[1], [0], [0], [1], [0, 0, 1, 1], [], []>} : vector<32x32xf32>, vector<32x20xf32>, vector<32x20xf32> -> vector<32x20xf32>
    %c0_7 = arith.constant 0 : index
    %c0_8 = arith.constant 0 : index
    %c0_9 = arith.constant 0 : index
    %6 = vector.load %arg1[%c0_7, %c0_8, %c0_9] : memref<6x32x32xf32, #tpu.memory_space<vmem>>, vector<1x32x32xf32>
    %7 = vector.shape_cast %6 : vector<1x32x32xf32> to vector<32x32xf32>
    %cst_10 = arith.constant dense<0.000000e+00> : vector<32x20xf32>
    %8 = tpu.matmul %7, %0, %cst_10 {dimension_numbers = #tpu.dot_dimension_numbers<[1], [0], [0], [1], [0, 0, 1, 1], [], []>} : vector<32x32xf32>, vector<32x20xf32>, vector<32x20xf32> -> vector<32x20xf32>
    %9 = tpu.concatenate %5, %8, %0 in 1 : vector<32x20xf32>, vector<32x20xf32>, vector<32x20xf32> -> vector<32x60xf32>
    %cst_11 = arith.constant dense<0.000000e+00> : vector<32x16xf32>
    %10 = tpu.matmul %9, %1, %cst_11 {dimension_numbers = #tpu.dot_dimension_numbers<[1], [0], [0], [1], [0, 0, 1, 1], [], []>} : vector<32x60xf32>, vector<60x16xf32>, vector<32x16xf32> -> vector<32x16xf32>
    %11 = vector.broadcast %2 : vector<1x16xf32> to vector<32x16xf32>
    %12 = arith.addf %10, %11 : vector<32x16xf32>
    %13 = vector.extract_strided_slice %12 {offsets = [0, 0], sizes = [32, 8], strides = [1, 1]} : vector<32x16xf32> to vector<32x8xf32>
    %14 = arith.negf %13 : vector<32x8xf32>
    %15 = math.exp %14 : vector<32x8xf32>
    %cst_12 = arith.constant 1.000000e+00 : f32
    %16 = vector.broadcast %cst_12 : f32 to vector<32x8xf32>
    %17 = arith.addf %16, %15 : vector<32x8xf32>
    %18 = arith.divf %16, %17 : vector<32x8xf32>
    %19 = vector.extract_strided_slice %12 {offsets = [0, 8], sizes = [32, 8], strides = [1, 1]} : vector<32x16xf32> to vector<32x8xf32>
    %20 = math.tanh %19 : vector<32x8xf32>
    %21 = arith.mulf %18, %20 : vector<32x8xf32>
    %c0_13 = arith.constant 0 : index
    %c0_14 = arith.constant 0 : index
    %22 = vector.load %arg7[%c0_13, %c0_14] : memref<120x16xf32, #tpu.memory_space<vmem>>, vector<120x16xf32>
    %c0_15 = arith.constant 0 : index
    %c0_16 = arith.constant 0 : index
    %23 = vector.load %arg8[%c0_15, %c0_16] : memref<1x16xf32, #tpu.memory_space<vmem>>, vector<1x16xf32>
    %c4 = arith.constant 4 : index
    %c0_17 = arith.constant 0 : index
    %c0_18 = arith.constant 0 : index
    %24 = vector.load %arg1[%c4, %c0_17, %c0_18] : memref<6x32x32xf32, #tpu.memory_space<vmem>>, vector<1x32x32xf32>
    %25 = vector.shape_cast %24 : vector<1x32x32xf32> to vector<32x32xf32>
    %cst_19 = arith.constant dense<0.000000e+00> : vector<32x20xf32>
    %26 = tpu.matmul %25, %0, %cst_19 {dimension_numbers = #tpu.dot_dimension_numbers<[1], [0], [0], [1], [0, 0, 1, 1], [], []>} : vector<32x32xf32>, vector<32x20xf32>, vector<32x20xf32> -> vector<32x20xf32>
    %c3 = arith.constant 3 : index
    %c0_20 = arith.constant 0 : index
    %c0_21 = arith.constant 0 : index
    %27 = vector.load %arg1[%c3, %c0_20, %c0_21] : memref<6x32x32xf32, #tpu.memory_space<vmem>>, vector<1x32x32xf32>
    %28 = vector.shape_cast %27 : vector<1x32x32xf32> to vector<32x32xf32>
    %cst_22 = arith.constant dense<0.000000e+00> : vector<32x20xf32>
    %29 = tpu.matmul %28, %0, %cst_22 {dimension_numbers = #tpu.dot_dimension_numbers<[1], [0], [0], [1], [0, 0, 1, 1], [], []>} : vector<32x32xf32>, vector<32x20xf32>, vector<32x20xf32> -> vector<32x20xf32>
    %c2 = arith.constant 2 : index
    %c0_23 = arith.constant 0 : index
    %c0_24 = arith.constant 0 : index
    %30 = vector.load %arg1[%c2, %c0_23, %c0_24] : memref<6x32x32xf32, #tpu.memory_space<vmem>>, vector<1x32x32xf32>
    %31 = vector.shape_cast %30 : vector<1x32x32xf32> to vector<32x32xf32>
    %cst_25 = arith.constant dense<0.000000e+00> : vector<32x20xf32>
    %32 = tpu.matmul %31, %0, %cst_25 {dimension_numbers = #tpu.dot_dimension_numbers<[1], [0], [0], [1], [0, 0, 1, 1], [], []>} : vector<32x32xf32>, vector<32x20xf32>, vector<32x20xf32> -> vector<32x20xf32>
    %c1_26 = arith.constant 1 : index
    %c0_27 = arith.constant 0 : index
    %c0_28 = arith.constant 0 : index
    %33 = vector.load %arg1[%c1_26, %c0_27, %c0_28] : memref<6x32x32xf32, #tpu.memory_space<vmem>>, vector<1x32x32xf32>
    %34 = vector.shape_cast %33 : vector<1x32x32xf32> to vector<32x32xf32>
    %cst_29 = arith.constant dense<0.000000e+00> : vector<32x20xf32>
    %35 = tpu.matmul %34, %0, %cst_29 {dimension_numbers = #tpu.dot_dimension_numbers<[1], [0], [0], [1], [0, 0, 1, 1], [], []>} : vector<32x32xf32>, vector<32x20xf32>, vector<32x20xf32> -> vector<32x20xf32>
    %c0_30 = arith.constant 0 : index
    %c0_31 = arith.constant 0 : index
    %c0_32 = arith.constant 0 : index
    %36 = vector.load %arg1[%c0_30, %c0_31, %c0_32] : memref<6x32x32xf32, #tpu.memory_space<vmem>>, vector<1x32x32xf32>
    %37 = vector.shape_cast %36 : vector<1x32x32xf32> to vector<32x32xf32>
    %cst_33 = arith.constant dense<0.000000e+00> : vector<32x20xf32>
    %38 = tpu.matmul %37, %0, %cst_33 {dimension_numbers = #tpu.dot_dimension_numbers<[1], [0], [0], [1], [0, 0, 1, 1], [], []>} : vector<32x32xf32>, vector<32x20xf32>, vector<32x20xf32> -> vector<32x20xf32>
    %39 = tpu.concatenate %26, %29, %32, %35, %38, %0 in 1 : vector<32x20xf32>, vector<32x20xf32>, vector<32x20xf32>, vector<32x20xf32>, vector<32x20xf32>, vector<32x20xf32> -> vector<32x120xf32>
    %cst_34 = arith.constant dense<0.000000e+00> : vector<32x16xf32>
    %40 = tpu.matmul %39, %22, %cst_34 {dimension_numbers = #tpu.dot_dimension_numbers<[1], [0], [0], [1], [0, 0, 1, 1], [], []>} : vector<32x120xf32>, vector<120x16xf32>, vector<32x16xf32> -> vector<32x16xf32>
    %41 = vector.broadcast %23 : vector<1x16xf32> to vector<32x16xf32>
    %42 = arith.addf %40, %41 : vector<32x16xf32>
    %43 = vector.extract_strided_slice %42 {offsets = [0, 0], sizes = [32, 8], strides = [1, 1]} : vector<32x16xf32> to vector<32x8xf32>
    %44 = arith.negf %43 : vector<32x8xf32>
    %45 = math.exp %44 : vector<32x8xf32>
    %cst_35 = arith.constant 1.000000e+00 : f32
    %46 = vector.broadcast %cst_35 : f32 to vector<32x8xf32>
    %47 = arith.addf %46, %45 : vector<32x8xf32>
    %48 = arith.divf %46, %47 : vector<32x8xf32>
    %49 = vector.extract_strided_slice %42 {offsets = [0, 8], sizes = [32, 8], strides = [1, 1]} : vector<32x16xf32> to vector<32x8xf32>
    %50 = math.tanh %49 : vector<32x8xf32>
    %51 = arith.mulf %48, %50 : vector<32x8xf32>
    %52 = tpu.concatenate %21, %51 in 1 : vector<32x8xf32>, vector<32x8xf32> -> vector<32x16xf32>
    %c0_36 = arith.constant 0 : index
    %c0_37 = arith.constant 0 : index
    %53 = vector.load %arg9[%c0_36, %c0_37] : memref<48x8xf32, #tpu.memory_space<vmem>>, vector<48x8xf32>
    %c0_38 = arith.constant 0 : index
    %c0_39 = arith.constant 0 : index
    %54 = vector.load %arg10[%c0_38, %c0_39] : memref<1x8xf32, #tpu.memory_space<vmem>>, vector<1x8xf32>
    %c1_40 = arith.constant 1 : index
    %c0_41 = arith.constant 0 : index
    %c0_42 = arith.constant 0 : index
    %55 = vector.load %arg1[%c1_40, %c0_41, %c0_42] : memref<6x32x32xf32, #tpu.memory_space<vmem>>, vector<1x32x32xf32>
    %56 = vector.shape_cast %55 : vector<1x32x32xf32> to vector<32x32xf32>
    %cst_43 = arith.constant dense<0.000000e+00> : vector<32x16xf32>
    %57 = tpu.matmul %56, %52, %cst_43 {dimension_numbers = #tpu.dot_dimension_numbers<[1], [0], [0], [1], [0, 0, 1, 1], [], []>} : vector<32x32xf32>, vector<32x16xf32>, vector<32x16xf32> -> vector<32x16xf32>
    %c0_44 = arith.constant 0 : index
    %c0_45 = arith.constant 0 : index
    %c0_46 = arith.constant 0 : index
    %58 = vector.load %arg1[%c0_44, %c0_45, %c0_46] : memref<6x32x32xf32, #tpu.memory_space<vmem>>, vector<1x32x32xf32>
    %59 = vector.shape_cast %58 : vector<1x32x32xf32> to vector<32x32xf32>
    %cst_47 = arith.constant dense<0.000000e+00> : vector<32x16xf32>
    %60 = tpu.matmul %59, %52, %cst_47 {dimension_numbers = #tpu.dot_dimension_numbers<[1], [0], [0], [1], [0, 0, 1, 1], [], []>} : vector<32x32xf32>, vector<32x16xf32>, vector<32x16xf32> -> vector<32x16xf32>
    %61 = tpu.concatenate %57, %60, %52 in 1 : vector<32x16xf32>, vector<32x16xf32>, vector<32x16xf32> -> vector<32x48xf32>
    %cst_48 = arith.constant dense<0.000000e+00> : vector<32x8xf32>
    %62 = tpu.matmul %61, %53, %cst_48 {dimension_numbers = #tpu.dot_dimension_numbers<[1], [0], [0], [1], [0, 0, 1, 1], [], []>} : vector<32x48xf32>, vector<48x8xf32>, vector<32x8xf32> -> vector<32x8xf32>
    %63 = vector.broadcast %54 : vector<1x8xf32> to vector<32x8xf32>
    %64 = arith.addf %62, %63 : vector<32x8xf32>
    %65 = vector.extract_strided_slice %64 {offsets = [0, 0], sizes = [32, 4], strides = [1, 1]} : vector<32x8xf32> to vector<32x4xf32>
    %66 = arith.negf %65 : vector<32x4xf32>
    %67 = math.exp %66 : vector<32x4xf32>
    %cst_49 = arith.constant 1.000000e+00 : f32
    %68 = vector.broadcast %cst_49 : f32 to vector<32x4xf32>
    %69 = arith.addf %68, %67 : vector<32x4xf32>
    %70 = arith.divf %68, %69 : vector<32x4xf32>
    %71 = vector.extract_strided_slice %64 {offsets = [0, 4], sizes = [32, 4], strides = [1, 1]} : vector<32x8xf32> to vector<32x4xf32>
    %72 = math.tanh %71 : vector<32x4xf32>
    %73 = arith.mulf %70, %72 : vector<32x4xf32>
    %c0_50 = arith.constant 0 : index
    %c0_51 = arith.constant 0 : index
    %74 = vector.load %arg11[%c0_50, %c0_51] : memref<96x8xf32, #tpu.memory_space<vmem>>, vector<96x8xf32>
    %c0_52 = arith.constant 0 : index
    %c0_53 = arith.constant 0 : index
    %75 = vector.load %arg12[%c0_52, %c0_53] : memref<1x8xf32, #tpu.memory_space<vmem>>, vector<1x8xf32>
    %c4_54 = arith.constant 4 : index
    %c0_55 = arith.constant 0 : index
    %c0_56 = arith.constant 0 : index
    %76 = vector.load %arg1[%c4_54, %c0_55, %c0_56] : memref<6x32x32xf32, #tpu.memory_space<vmem>>, vector<1x32x32xf32>
    %77 = vector.shape_cast %76 : vector<1x32x32xf32> to vector<32x32xf32>
    %cst_57 = arith.constant dense<0.000000e+00> : vector<32x16xf32>
    %78 = tpu.matmul %77, %52, %cst_57 {dimension_numbers = #tpu.dot_dimension_numbers<[1], [0], [0], [1], [0, 0, 1, 1], [], []>} : vector<32x32xf32>, vector<32x16xf32>, vector<32x16xf32> -> vector<32x16xf32>
    %c3_58 = arith.constant 3 : index
    %c0_59 = arith.constant 0 : index
    %c0_60 = arith.constant 0 : index
    %79 = vector.load %arg1[%c3_58, %c0_59, %c0_60] : memref<6x32x32xf32, #tpu.memory_space<vmem>>, vector<1x32x32xf32>
    %80 = vector.shape_cast %79 : vector<1x32x32xf32> to vector<32x32xf32>
    %cst_61 = arith.constant dense<0.000000e+00> : vector<32x16xf32>
    %81 = tpu.matmul %80, %52, %cst_61 {dimension_numbers = #tpu.dot_dimension_numbers<[1], [0], [0], [1], [0, 0, 1, 1], [], []>} : vector<32x32xf32>, vector<32x16xf32>, vector<32x16xf32> -> vector<32x16xf32>
    %c2_62 = arith.constant 2 : index
    %c0_63 = arith.constant 0 : index
    %c0_64 = arith.constant 0 : index
    %82 = vector.load %arg1[%c2_62, %c0_63, %c0_64] : memref<6x32x32xf32, #tpu.memory_space<vmem>>, vector<1x32x32xf32>
    %83 = vector.shape_cast %82 : vector<1x32x32xf32> to vector<32x32xf32>
    %cst_65 = arith.constant dense<0.000000e+00> : vector<32x16xf32>
    %84 = tpu.matmul %83, %52, %cst_65 {dimension_numbers = #tpu.dot_dimension_numbers<[1], [0], [0], [1], [0, 0, 1, 1], [], []>} : vector<32x32xf32>, vector<32x16xf32>, vector<32x16xf32> -> vector<32x16xf32>
    %c1_66 = arith.constant 1 : index
    %c0_67 = arith.constant 0 : index
    %c0_68 = arith.constant 0 : index
    %85 = vector.load %arg1[%c1_66, %c0_67, %c0_68] : memref<6x32x32xf32, #tpu.memory_space<vmem>>, vector<1x32x32xf32>
    %86 = vector.shape_cast %85 : vector<1x32x32xf32> to vector<32x32xf32>
    %cst_69 = arith.constant dense<0.000000e+00> : vector<32x16xf32>
    %87 = tpu.matmul %86, %52, %cst_69 {dimension_numbers = #tpu.dot_dimension_numbers<[1], [0], [0], [1], [0, 0, 1, 1], [], []>} : vector<32x32xf32>, vector<32x16xf32>, vector<32x16xf32> -> vector<32x16xf32>
    %c0_70 = arith.constant 0 : index
    %c0_71 = arith.constant 0 : index
    %c0_72 = arith.constant 0 : index
    %88 = vector.load %arg1[%c0_70, %c0_71, %c0_72] : memref<6x32x32xf32, #tpu.memory_space<vmem>>, vector<1x32x32xf32>
    %89 = vector.shape_cast %88 : vector<1x32x32xf32> to vector<32x32xf32>
    %cst_73 = arith.constant dense<0.000000e+00> : vector<32x16xf32>
    %90 = tpu.matmul %89, %52, %cst_73 {dimension_numbers = #tpu.dot_dimension_numbers<[1], [0], [0], [1], [0, 0, 1, 1], [], []>} : vector<32x32xf32>, vector<32x16xf32>, vector<32x16xf32> -> vector<32x16xf32>
    %91 = tpu.concatenate %78, %81, %84, %87, %90, %52 in 1 : vector<32x16xf32>, vector<32x16xf32>, vector<32x16xf32>, vector<32x16xf32>, vector<32x16xf32>, vector<32x16xf32> -> vector<32x96xf32>
    %cst_74 = arith.constant dense<0.000000e+00> : vector<32x8xf32>
    %92 = tpu.matmul %91, %74, %cst_74 {dimension_numbers = #tpu.dot_dimension_numbers<[1], [0], [0], [1], [0, 0, 1, 1], [], []>} : vector<32x96xf32>, vector<96x8xf32>, vector<32x8xf32> -> vector<32x8xf32>
    %93 = vector.broadcast %75 : vector<1x8xf32> to vector<32x8xf32>
    %94 = arith.addf %92, %93 : vector<32x8xf32>
    %95 = vector.extract_strided_slice %94 {offsets = [0, 0], sizes = [32, 4], strides = [1, 1]} : vector<32x8xf32> to vector<32x4xf32>
    %96 = arith.negf %95 : vector<32x4xf32>
    %97 = math.exp %96 : vector<32x4xf32>
    %cst_75 = arith.constant 1.000000e+00 : f32
    %98 = vector.broadcast %cst_75 : f32 to vector<32x4xf32>
    %99 = arith.addf %98, %97 : vector<32x4xf32>
    %100 = arith.divf %98, %99 : vector<32x4xf32>
    %101 = vector.extract_strided_slice %94 {offsets = [0, 4], sizes = [32, 4], strides = [1, 1]} : vector<32x8xf32> to vector<32x4xf32>
    %102 = math.tanh %101 : vector<32x4xf32>
    %103 = arith.mulf %100, %102 : vector<32x4xf32>
    %104 = tpu.concatenate %73, %103 in 1 : vector<32x4xf32>, vector<32x4xf32> -> vector<32x8xf32>
    %c0_76 = arith.constant 0 : index
    %c0_77 = arith.constant 0 : index
    %105 = vector.load %arg13[%c0_76, %c0_77] : memref<24x8xf32, #tpu.memory_space<vmem>>, vector<24x8xf32>
    %c0_78 = arith.constant 0 : index
    %c0_79 = arith.constant 0 : index
    %106 = vector.load %arg14[%c0_78, %c0_79] : memref<1x8xf32, #tpu.memory_space<vmem>>, vector<1x8xf32>
    %c1_80 = arith.constant 1 : index
    %c0_81 = arith.constant 0 : index
    %c0_82 = arith.constant 0 : index
    %107 = vector.load %arg1[%c1_80, %c0_81, %c0_82] : memref<6x32x32xf32, #tpu.memory_space<vmem>>, vector<1x32x32xf32>
    %108 = vector.shape_cast %107 : vector<1x32x32xf32> to vector<32x32xf32>
    %cst_83 = arith.constant dense<0.000000e+00> : vector<32x8xf32>
    %109 = tpu.matmul %108, %104, %cst_83 {dimension_numbers = #tpu.dot_dimension_numbers<[1], [0], [0], [1], [0, 0, 1, 1], [], []>} : vector<32x32xf32>, vector<32x8xf32>, vector<32x8xf32> -> vector<32x8xf32>
    %c0_84 = arith.constant 0 : index
    %c0_85 = arith.constant 0 : index
    %c0_86 = arith.constant 0 : index
    %110 = vector.load %arg1[%c0_84, %c0_85, %c0_86] : memref<6x32x32xf32, #tpu.memory_space<vmem>>, vector<1x32x32xf32>
    %111 = vector.shape_cast %110 : vector<1x32x32xf32> to vector<32x32xf32>
    %cst_87 = arith.constant dense<0.000000e+00> : vector<32x8xf32>
    %112 = tpu.matmul %111, %104, %cst_87 {dimension_numbers = #tpu.dot_dimension_numbers<[1], [0], [0], [1], [0, 0, 1, 1], [], []>} : vector<32x32xf32>, vector<32x8xf32>, vector<32x8xf32> -> vector<32x8xf32>
    %113 = tpu.concatenate %109, %112, %104 in 1 : vector<32x8xf32>, vector<32x8xf32>, vector<32x8xf32> -> vector<32x24xf32>
    %cst_88 = arith.constant dense<0.000000e+00> : vector<32x8xf32>
    %114 = tpu.matmul %113, %105, %cst_88 {dimension_numbers = #tpu.dot_dimension_numbers<[1], [0], [0], [1], [0, 0, 1, 1], [], []>} : vector<32x24xf32>, vector<24x8xf32>, vector<32x8xf32> -> vector<32x8xf32>
    %115 = vector.broadcast %106 : vector<1x8xf32> to vector<32x8xf32>
    %116 = arith.addf %114, %115 : vector<32x8xf32>
    %117 = vector.extract_strided_slice %116 {offsets = [0, 0], sizes = [32, 4], strides = [1, 1]} : vector<32x8xf32> to vector<32x4xf32>
    %118 = arith.negf %117 : vector<32x4xf32>
    %119 = math.exp %118 : vector<32x4xf32>
    %cst_89 = arith.constant 1.000000e+00 : f32
    %120 = vector.broadcast %cst_89 : f32 to vector<32x4xf32>
    %121 = arith.addf %120, %119 : vector<32x4xf32>
    %122 = arith.divf %120, %121 : vector<32x4xf32>
    %123 = vector.extract_strided_slice %116 {offsets = [0, 4], sizes = [32, 4], strides = [1, 1]} : vector<32x8xf32> to vector<32x4xf32>
    %124 = math.tanh %123 : vector<32x4xf32>
    %125 = arith.mulf %122, %124 : vector<32x4xf32>
    %c0_90 = arith.constant 0 : index
    %c0_91 = arith.constant 0 : index
    %126 = vector.load %arg15[%c0_90, %c0_91] : memref<48x8xf32, #tpu.memory_space<vmem>>, vector<48x8xf32>
    %c0_92 = arith.constant 0 : index
    %c0_93 = arith.constant 0 : index
    %127 = vector.load %arg16[%c0_92, %c0_93] : memref<1x8xf32, #tpu.memory_space<vmem>>, vector<1x8xf32>
    %c4_94 = arith.constant 4 : index
    %c0_95 = arith.constant 0 : index
    %c0_96 = arith.constant 0 : index
    %128 = vector.load %arg1[%c4_94, %c0_95, %c0_96] : memref<6x32x32xf32, #tpu.memory_space<vmem>>, vector<1x32x32xf32>
    %129 = vector.shape_cast %128 : vector<1x32x32xf32> to vector<32x32xf32>
    %cst_97 = arith.constant dense<0.000000e+00> : vector<32x8xf32>
    %130 = tpu.matmul %129, %104, %cst_97 {dimension_numbers = #tpu.dot_dimension_numbers<[1], [0], [0], [1], [0, 0, 1, 1], [], []>} : vector<32x32xf32>, vector<32x8xf32>, vector<32x8xf32> -> vector<32x8xf32>
    %c3_98 = arith.constant 3 : index
    %c0_99 = arith.constant 0 : index
    %c0_100 = arith.constant 0 : index
    %131 = vector.load %arg1[%c3_98, %c0_99, %c0_100] : memref<6x32x32xf32, #tpu.memory_space<vmem>>, vector<1x32x32xf32>
    %132 = vector.shape_cast %131 : vector<1x32x32xf32> to vector<32x32xf32>
    %cst_101 = arith.constant dense<0.000000e+00> : vector<32x8xf32>
    %133 = tpu.matmul %132, %104, %cst_101 {dimension_numbers = #tpu.dot_dimension_numbers<[1], [0], [0], [1], [0, 0, 1, 1], [], []>} : vector<32x32xf32>, vector<32x8xf32>, vector<32x8xf32> -> vector<32x8xf32>
    %c2_102 = arith.constant 2 : index
    %c0_103 = arith.constant 0 : index
    %c0_104 = arith.constant 0 : index
    %134 = vector.load %arg1[%c2_102, %c0_103, %c0_104] : memref<6x32x32xf32, #tpu.memory_space<vmem>>, vector<1x32x32xf32>
    %135 = vector.shape_cast %134 : vector<1x32x32xf32> to vector<32x32xf32>
    %cst_105 = arith.constant dense<0.000000e+00> : vector<32x8xf32>
    %136 = tpu.matmul %135, %104, %cst_105 {dimension_numbers = #tpu.dot_dimension_numbers<[1], [0], [0], [1], [0, 0, 1, 1], [], []>} : vector<32x32xf32>, vector<32x8xf32>, vector<32x8xf32> -> vector<32x8xf32>
    %c1_106 = arith.constant 1 : index
    %c0_107 = arith.constant 0 : index
    %c0_108 = arith.constant 0 : index
    %137 = vector.load %arg1[%c1_106, %c0_107, %c0_108] : memref<6x32x32xf32, #tpu.memory_space<vmem>>, vector<1x32x32xf32>
    %138 = vector.shape_cast %137 : vector<1x32x32xf32> to vector<32x32xf32>
    %cst_109 = arith.constant dense<0.000000e+00> : vector<32x8xf32>
    %139 = tpu.matmul %138, %104, %cst_109 {dimension_numbers = #tpu.dot_dimension_numbers<[1], [0], [0], [1], [0, 0, 1, 1], [], []>} : vector<32x32xf32>, vector<32x8xf32>, vector<32x8xf32> -> vector<32x8xf32>
    %c0_110 = arith.constant 0 : index
    %c0_111 = arith.constant 0 : index
    %c0_112 = arith.constant 0 : index
    %140 = vector.load %arg1[%c0_110, %c0_111, %c0_112] : memref<6x32x32xf32, #tpu.memory_space<vmem>>, vector<1x32x32xf32>
    %141 = vector.shape_cast %140 : vector<1x32x32xf32> to vector<32x32xf32>
    %cst_113 = arith.constant dense<0.000000e+00> : vector<32x8xf32>
    %142 = tpu.matmul %141, %104, %cst_113 {dimension_numbers = #tpu.dot_dimension_numbers<[1], [0], [0], [1], [0, 0, 1, 1], [], []>} : vector<32x32xf32>, vector<32x8xf32>, vector<32x8xf32> -> vector<32x8xf32>
    %143 = tpu.concatenate %130, %133, %136, %139, %142, %104 in 1 : vector<32x8xf32>, vector<32x8xf32>, vector<32x8xf32>, vector<32x8xf32>, vector<32x8xf32>, vector<32x8xf32> -> vector<32x48xf32>
    %cst_114 = arith.constant dense<0.000000e+00> : vector<32x8xf32>
    %144 = tpu.matmul %143, %126, %cst_114 {dimension_numbers = #tpu.dot_dimension_numbers<[1], [0], [0], [1], [0, 0, 1, 1], [], []>} : vector<32x48xf32>, vector<48x8xf32>, vector<32x8xf32> -> vector<32x8xf32>
    %145 = vector.broadcast %127 : vector<1x8xf32> to vector<32x8xf32>
    %146 = arith.addf %144, %145 : vector<32x8xf32>
    %147 = vector.extract_strided_slice %146 {offsets = [0, 0], sizes = [32, 4], strides = [1, 1]} : vector<32x8xf32> to vector<32x4xf32>
    %148 = arith.negf %147 : vector<32x4xf32>
    %149 = math.exp %148 : vector<32x4xf32>
    %cst_115 = arith.constant 1.000000e+00 : f32
    %150 = vector.broadcast %cst_115 : f32 to vector<32x4xf32>
    %151 = arith.addf %150, %149 : vector<32x4xf32>
    %152 = arith.divf %150, %151 : vector<32x4xf32>
    %153 = vector.extract_strided_slice %146 {offsets = [0, 4], sizes = [32, 4], strides = [1, 1]} : vector<32x8xf32> to vector<32x4xf32>
    %154 = math.tanh %153 : vector<32x4xf32>
    %155 = arith.mulf %152, %154 : vector<32x4xf32>
    %156 = tpu.concatenate %125, %155 in 1 : vector<32x4xf32>, vector<32x4xf32> -> vector<32x8xf32>
    %157 = arith.addf %104, %156 : vector<32x8xf32>
    %c0_116 = arith.constant 0 : index
    %c0_117 = arith.constant 0 : index
    %158 = vector.load %arg17[%c0_116, %c0_117] : memref<24x16xf32, #tpu.memory_space<vmem>>, vector<24x16xf32>
    %c0_118 = arith.constant 0 : index
    %c0_119 = arith.constant 0 : index
    %159 = vector.load %arg18[%c0_118, %c0_119] : memref<1x16xf32, #tpu.memory_space<vmem>>, vector<1x16xf32>
    %c5 = arith.constant 5 : index
    %c0_120 = arith.constant 0 : index
    %c0_121 = arith.constant 0 : index
    %160 = vector.load %arg1[%c5, %c0_120, %c0_121] : memref<6x32x32xf32, #tpu.memory_space<vmem>>, vector<1x32x32xf32>
    %161 = vector.shape_cast %160 : vector<1x32x32xf32> to vector<32x32xf32>
    %cst_122 = arith.constant dense<0.000000e+00> : vector<32x8xf32>
    %162 = tpu.matmul %161, %157, %cst_122 {dimension_numbers = #tpu.dot_dimension_numbers<[1], [0], [0], [1], [0, 0, 1, 1], [], []>} : vector<32x32xf32>, vector<32x8xf32>, vector<32x8xf32> -> vector<32x8xf32>
    %c2_123 = arith.constant 2 : index
    %c0_124 = arith.constant 0 : index
    %c0_125 = arith.constant 0 : index
    %163 = vector.load %arg1[%c2_123, %c0_124, %c0_125] : memref<6x32x32xf32, #tpu.memory_space<vmem>>, vector<1x32x32xf32>
    %164 = vector.shape_cast %163 : vector<1x32x32xf32> to vector<32x32xf32>
    %cst_126 = arith.constant dense<0.000000e+00> : vector<32x8xf32>
    %165 = tpu.matmul %164, %157, %cst_126 {dimension_numbers = #tpu.dot_dimension_numbers<[1], [0], [0], [1], [0, 0, 1, 1], [], []>} : vector<32x32xf32>, vector<32x8xf32>, vector<32x8xf32> -> vector<32x8xf32>
    %166 = tpu.concatenate %162, %165, %157 in 1 : vector<32x8xf32>, vector<32x8xf32>, vector<32x8xf32> -> vector<32x24xf32>
    %cst_127 = arith.constant dense<0.000000e+00> : vector<32x16xf32>
    %167 = tpu.matmul %166, %158, %cst_127 {dimension_numbers = #tpu.dot_dimension_numbers<[1], [0], [0], [1], [0, 0, 1, 1], [], []>} : vector<32x24xf32>, vector<24x16xf32>, vector<32x16xf32> -> vector<32x16xf32>
    %168 = vector.broadcast %159 : vector<1x16xf32> to vector<32x16xf32>
    %169 = arith.addf %167, %168 : vector<32x16xf32>
    %170 = vector.extract_strided_slice %169 {offsets = [0, 0], sizes = [32, 8], strides = [1, 1]} : vector<32x16xf32> to vector<32x8xf32>
    %171 = arith.negf %170 : vector<32x8xf32>
    %172 = math.exp %171 : vector<32x8xf32>
    %cst_128 = arith.constant 1.000000e+00 : f32
    %173 = vector.broadcast %cst_128 : f32 to vector<32x8xf32>
    %174 = arith.addf %173, %172 : vector<32x8xf32>
    %175 = arith.divf %173, %174 : vector<32x8xf32>
    %176 = vector.extract_strided_slice %169 {offsets = [0, 8], sizes = [32, 8], strides = [1, 1]} : vector<32x16xf32> to vector<32x8xf32>
    %177 = math.tanh %176 : vector<32x8xf32>
    %178 = arith.mulf %175, %177 : vector<32x8xf32>
    %179 = arith.addf %157, %178 : vector<32x8xf32>
    %c0_129 = arith.constant 0 : index
    %c0_130 = arith.constant 0 : index
    %180 = vector.load %arg19[%c0_129, %c0_130] : memref<24x16xf32, #tpu.memory_space<vmem>>, vector<24x16xf32>
    %c0_131 = arith.constant 0 : index
    %c0_132 = arith.constant 0 : index
    %181 = vector.load %arg20[%c0_131, %c0_132] : memref<1x16xf32, #tpu.memory_space<vmem>>, vector<1x16xf32>
    %c3_133 = arith.constant 3 : index
    %c0_134 = arith.constant 0 : index
    %c0_135 = arith.constant 0 : index
    %182 = vector.load %arg1[%c3_133, %c0_134, %c0_135] : memref<6x32x32xf32, #tpu.memory_space<vmem>>, vector<1x32x32xf32>
    %183 = vector.shape_cast %182 : vector<1x32x32xf32> to vector<32x32xf32>
    %cst_136 = arith.constant dense<0.000000e+00> : vector<32x8xf32>
    %184 = tpu.matmul %183, %179, %cst_136 {dimension_numbers = #tpu.dot_dimension_numbers<[1], [0], [0], [1], [0, 0, 1, 1], [], []>} : vector<32x32xf32>, vector<32x8xf32>, vector<32x8xf32> -> vector<32x8xf32>
    %c1_137 = arith.constant 1 : index
    %c0_138 = arith.constant 0 : index
    %c0_139 = arith.constant 0 : index
    %185 = vector.load %arg1[%c1_137, %c0_138, %c0_139] : memref<6x32x32xf32, #tpu.memory_space<vmem>>, vector<1x32x32xf32>
    %186 = vector.shape_cast %185 : vector<1x32x32xf32> to vector<32x32xf32>
    %cst_140 = arith.constant dense<0.000000e+00> : vector<32x8xf32>
    %187 = tpu.matmul %186, %179, %cst_140 {dimension_numbers = #tpu.dot_dimension_numbers<[1], [0], [0], [1], [0, 0, 1, 1], [], []>} : vector<32x32xf32>, vector<32x8xf32>, vector<32x8xf32> -> vector<32x8xf32>
    %188 = tpu.concatenate %184, %187, %179 in 1 : vector<32x8xf32>, vector<32x8xf32>, vector<32x8xf32> -> vector<32x24xf32>
    %cst_141 = arith.constant dense<0.000000e+00> : vector<32x16xf32>
    %189 = tpu.matmul %188, %180, %cst_141 {dimension_numbers = #tpu.dot_dimension_numbers<[1], [0], [0], [1], [0, 0, 1, 1], [], []>} : vector<32x24xf32>, vector<24x16xf32>, vector<32x16xf32> -> vector<32x16xf32>
    %190 = vector.broadcast %181 : vector<1x16xf32> to vector<32x16xf32>
    %191 = arith.addf %189, %190 : vector<32x16xf32>
    %192 = vector.extract_strided_slice %191 {offsets = [0, 0], sizes = [32, 8], strides = [1, 1]} : vector<32x16xf32> to vector<32x8xf32>
    %193 = arith.negf %192 : vector<32x8xf32>
    %194 = math.exp %193 : vector<32x8xf32>
    %cst_142 = arith.constant 1.000000e+00 : f32
    %195 = vector.broadcast %cst_142 : f32 to vector<32x8xf32>
    %196 = arith.addf %195, %194 : vector<32x8xf32>
    %197 = arith.divf %195, %196 : vector<32x8xf32>
    %198 = vector.extract_strided_slice %191 {offsets = [0, 8], sizes = [32, 8], strides = [1, 1]} : vector<32x16xf32> to vector<32x8xf32>
    %199 = math.tanh %198 : vector<32x8xf32>
    %200 = arith.mulf %197, %199 : vector<32x8xf32>
    %201 = arith.addf %179, %200 : vector<32x8xf32>
    %c0_143 = arith.constant 0 : index
    %c0_144 = arith.constant 0 : index
    %202 = vector.load %arg21[%c0_143, %c0_144] : memref<24x16xf32, #tpu.memory_space<vmem>>, vector<24x16xf32>
    %c0_145 = arith.constant 0 : index
    %c0_146 = arith.constant 0 : index
    %203 = vector.load %arg22[%c0_145, %c0_146] : memref<1x16xf32, #tpu.memory_space<vmem>>, vector<1x16xf32>
    %c3_147 = arith.constant 3 : index
    %c0_148 = arith.constant 0 : index
    %c0_149 = arith.constant 0 : index
    %204 = vector.load %arg1[%c3_147, %c0_148, %c0_149] : memref<6x32x32xf32, #tpu.memory_space<vmem>>, vector<1x32x32xf32>
    %205 = vector.shape_cast %204 : vector<1x32x32xf32> to vector<32x32xf32>
    %cst_150 = arith.constant dense<0.000000e+00> : vector<32x8xf32>
    %206 = tpu.matmul %205, %201, %cst_150 {dimension_numbers = #tpu.dot_dimension_numbers<[1], [0], [0], [1], [0, 0, 1, 1], [], []>} : vector<32x32xf32>, vector<32x8xf32>, vector<32x8xf32> -> vector<32x8xf32>
    %c1_151 = arith.constant 1 : index
    %c0_152 = arith.constant 0 : index
    %c0_153 = arith.constant 0 : index
    %207 = vector.load %arg1[%c1_151, %c0_152, %c0_153] : memref<6x32x32xf32, #tpu.memory_space<vmem>>, vector<1x32x32xf32>
    %208 = vector.shape_cast %207 : vector<1x32x32xf32> to vector<32x32xf32>
    %cst_154 = arith.constant dense<0.000000e+00> : vector<32x8xf32>
    %209 = tpu.matmul %208, %201, %cst_154 {dimension_numbers = #tpu.dot_dimension_numbers<[1], [0], [0], [1], [0, 0, 1, 1], [], []>} : vector<32x32xf32>, vector<32x8xf32>, vector<32x8xf32> -> vector<32x8xf32>
    %210 = tpu.concatenate %206, %209, %201 in 1 : vector<32x8xf32>, vector<32x8xf32>, vector<32x8xf32> -> vector<32x24xf32>
    %cst_155 = arith.constant dense<0.000000e+00> : vector<32x16xf32>
    %211 = tpu.matmul %210, %202, %cst_155 {dimension_numbers = #tpu.dot_dimension_numbers<[1], [0], [0], [1], [0, 0, 1, 1], [], []>} : vector<32x24xf32>, vector<24x16xf32>, vector<32x16xf32> -> vector<32x16xf32>
    %212 = vector.broadcast %203 : vector<1x16xf32> to vector<32x16xf32>
    %213 = arith.addf %211, %212 : vector<32x16xf32>
    %214 = vector.extract_strided_slice %213 {offsets = [0, 0], sizes = [32, 8], strides = [1, 1]} : vector<32x16xf32> to vector<32x8xf32>
    %215 = arith.negf %214 : vector<32x8xf32>
    %216 = math.exp %215 : vector<32x8xf32>
    %cst_156 = arith.constant 1.000000e+00 : f32
    %217 = vector.broadcast %cst_156 : f32 to vector<32x8xf32>
    %218 = arith.addf %217, %216 : vector<32x8xf32>
    %219 = arith.divf %217, %218 : vector<32x8xf32>
    %220 = vector.extract_strided_slice %213 {offsets = [0, 8], sizes = [32, 8], strides = [1, 1]} : vector<32x16xf32> to vector<32x8xf32>
    %221 = math.tanh %220 : vector<32x8xf32>
    %222 = arith.mulf %219, %221 : vector<32x8xf32>
    %223 = arith.addf %201, %222 : vector<32x8xf32>
    %c0_157 = arith.constant 0 : index
    %c0_158 = arith.constant 0 : index
    %224 = vector.load %arg23[%c0_157, %c0_158] : memref<24x16xf32, #tpu.memory_space<vmem>>, vector<24x16xf32>
    %c0_159 = arith.constant 0 : index
    %c0_160 = arith.constant 0 : index
    %225 = vector.load %arg24[%c0_159, %c0_160] : memref<1x16xf32, #tpu.memory_space<vmem>>, vector<1x16xf32>
    %c3_161 = arith.constant 3 : index
    %c0_162 = arith.constant 0 : index
    %c0_163 = arith.constant 0 : index
    %226 = vector.load %arg1[%c3_161, %c0_162, %c0_163] : memref<6x32x32xf32, #tpu.memory_space<vmem>>, vector<1x32x32xf32>
    %227 = vector.shape_cast %226 : vector<1x32x32xf32> to vector<32x32xf32>
    %cst_164 = arith.constant dense<0.000000e+00> : vector<32x8xf32>
    %228 = tpu.matmul %227, %223, %cst_164 {dimension_numbers = #tpu.dot_dimension_numbers<[1], [0], [0], [1], [0, 0, 1, 1], [], []>} : vector<32x32xf32>, vector<32x8xf32>, vector<32x8xf32> -> vector<32x8xf32>
    %c1_165 = arith.constant 1 : index
    %c0_166 = arith.constant 0 : index
    %c0_167 = arith.constant 0 : index
    %229 = vector.load %arg1[%c1_165, %c0_166, %c0_167] : memref<6x32x32xf32, #tpu.memory_space<vmem>>, vector<1x32x32xf32>
    %230 = vector.shape_cast %229 : vector<1x32x32xf32> to vector<32x32xf32>
    %cst_168 = arith.constant dense<0.000000e+00> : vector<32x8xf32>
    %231 = tpu.matmul %230, %223, %cst_168 {dimension_numbers = #tpu.dot_dimension_numbers<[1], [0], [0], [1], [0, 0, 1, 1], [], []>} : vector<32x32xf32>, vector<32x8xf32>, vector<32x8xf32> -> vector<32x8xf32>
    %232 = tpu.concatenate %228, %231, %223 in 1 : vector<32x8xf32>, vector<32x8xf32>, vector<32x8xf32> -> vector<32x24xf32>
    %cst_169 = arith.constant dense<0.000000e+00> : vector<32x16xf32>
    %233 = tpu.matmul %232, %224, %cst_169 {dimension_numbers = #tpu.dot_dimension_numbers<[1], [0], [0], [1], [0, 0, 1, 1], [], []>} : vector<32x24xf32>, vector<24x16xf32>, vector<32x16xf32> -> vector<32x16xf32>
    %234 = vector.broadcast %225 : vector<1x16xf32> to vector<32x16xf32>
    %235 = arith.addf %233, %234 : vector<32x16xf32>
    %236 = vector.extract_strided_slice %235 {offsets = [0, 0], sizes = [32, 8], strides = [1, 1]} : vector<32x16xf32> to vector<32x8xf32>
    %237 = arith.negf %236 : vector<32x8xf32>
    %238 = math.exp %237 : vector<32x8xf32>
    %cst_170 = arith.constant 1.000000e+00 : f32
    %239 = vector.broadcast %cst_170 : f32 to vector<32x8xf32>
    %240 = arith.addf %239, %238 : vector<32x8xf32>
    %241 = arith.divf %239, %240 : vector<32x8xf32>
    %242 = vector.extract_strided_slice %235 {offsets = [0, 8], sizes = [32, 8], strides = [1, 1]} : vector<32x16xf32> to vector<32x8xf32>
    %243 = math.tanh %242 : vector<32x8xf32>
    %244 = arith.mulf %241, %243 : vector<32x8xf32>
    %c0_171 = arith.constant 0 : index
    %c0_172 = arith.constant 0 : index
    %245 = vector.load %arg25[%c0_171, %c0_172] : memref<24x32xf32, #tpu.memory_space<vmem>>, vector<24x32xf32>
    %c0_173 = arith.constant 0 : index
    %c0_174 = arith.constant 0 : index
    %246 = vector.load %arg26[%c0_173, %c0_174] : memref<1x32xf32, #tpu.memory_space<vmem>>, vector<1x32xf32>
    %c3_175 = arith.constant 3 : index
    %c0_176 = arith.constant 0 : index
    %c0_177 = arith.constant 0 : index
    %247 = vector.load %arg1[%c3_175, %c0_176, %c0_177] : memref<6x32x32xf32, #tpu.memory_space<vmem>>, vector<1x32x32xf32>
    %248 = vector.shape_cast %247 : vector<1x32x32xf32> to vector<32x32xf32>
    %cst_178 = arith.constant dense<0.000000e+00> : vector<32x8xf32>
    %249 = tpu.matmul %248, %223, %cst_178 {dimension_numbers = #tpu.dot_dimension_numbers<[1], [0], [0], [1], [0, 0, 1, 1], [], []>} : vector<32x32xf32>, vector<32x8xf32>, vector<32x8xf32> -> vector<32x8xf32>
    %c1_179 = arith.constant 1 : index
    %c0_180 = arith.constant 0 : index
    %c0_181 = arith.constant 0 : index
    %250 = vector.load %arg1[%c1_179, %c0_180, %c0_181] : memref<6x32x32xf32, #tpu.memory_space<vmem>>, vector<1x32x32xf32>
    %251 = vector.shape_cast %250 : vector<1x32x32xf32> to vector<32x32xf32>
    %cst_182 = arith.constant dense<0.000000e+00> : vector<32x8xf32>
    %252 = tpu.matmul %251, %223, %cst_182 {dimension_numbers = #tpu.dot_dimension_numbers<[1], [0], [0], [1], [0, 0, 1, 1], [], []>} : vector<32x32xf32>, vector<32x8xf32>, vector<32x8xf32> -> vector<32x8xf32>
    %253 = tpu.concatenate %249, %252, %223 in 1 : vector<32x8xf32>, vector<32x8xf32>, vector<32x8xf32> -> vector<32x24xf32>
    %cst_183 = arith.constant dense<0.000000e+00> : vector<32x32xf32>
    %254 = tpu.matmul %253, %245, %cst_183 {dimension_numbers = #tpu.dot_dimension_numbers<[1], [0], [0], [1], [0, 0, 1, 1], [], []>} : vector<32x24xf32>, vector<24x32xf32>, vector<32x32xf32> -> vector<32x32xf32>
    %255 = vector.broadcast %246 : vector<1x32xf32> to vector<32x32xf32>
    %256 = arith.addf %254, %255 : vector<32x32xf32>
    %257 = vector.extract_strided_slice %256 {offsets = [0, 0], sizes = [32, 16], strides = [1, 1]} : vector<32x32xf32> to vector<32x16xf32>
    %258 = arith.negf %257 : vector<32x16xf32>
    %259 = math.exp %258 : vector<32x16xf32>
    %cst_184 = arith.constant 1.000000e+00 : f32
    %260 = vector.broadcast %cst_184 : f32 to vector<32x16xf32>
    %261 = arith.addf %260, %259 : vector<32x16xf32>
    %262 = arith.divf %260, %261 : vector<32x16xf32>
    %263 = vector.extract_strided_slice %256 {offsets = [0, 16], sizes = [32, 16], strides = [1, 1]} : vector<32x32xf32> to vector<32x16xf32>
    %264 = math.tanh %263 : vector<32x16xf32>
    %265 = arith.mulf %262, %264 : vector<32x16xf32>
    %c0_185 = arith.constant 0 : index
    %c0_186 = arith.constant 0 : index
    %266 = vector.load %arg3[%c0_185, %c0_186] : memref<40x2xf32, #tpu.memory_space<vmem>>, vector<40x2xf32>
    %cst_187 = arith.constant 0.000000e+00 : f32
    %267 = vector.broadcast %cst_187 : f32 to vector<32x2xf32>
    %268 = vector.extract_strided_slice %266 {offsets = [0, 0], sizes = [8, 2], strides = [1, 1]} : vector<40x2xf32> to vector<8x2xf32>
    %cst_188 = arith.constant dense<0.000000e+00> : vector<32x2xf32>
    %269 = tpu.matmul %200, %268, %cst_188 {dimension_numbers = #tpu.dot_dimension_numbers<[1], [0], [0], [1], [0, 0, 1, 1], [], []>} : vector<32x8xf32>, vector<8x2xf32>, vector<32x2xf32> -> vector<32x2xf32>
    %270 = arith.addf %267, %269 : vector<32x2xf32>
    %271 = vector.extract_strided_slice %266 {offsets = [8, 0], sizes = [8, 2], strides = [1, 1]} : vector<40x2xf32> to vector<8x2xf32>
    %cst_189 = arith.constant dense<0.000000e+00> : vector<32x2xf32>
    %272 = tpu.matmul %222, %271, %cst_189 {dimension_numbers = #tpu.dot_dimension_numbers<[1], [0], [0], [1], [0, 0, 1, 1], [], []>} : vector<32x8xf32>, vector<8x2xf32>, vector<32x2xf32> -> vector<32x2xf32>
    %273 = arith.addf %270, %272 : vector<32x2xf32>
    %274 = vector.extract_strided_slice %266 {offsets = [16, 0], sizes = [8, 2], strides = [1, 1]} : vector<40x2xf32> to vector<8x2xf32>
    %cst_190 = arith.constant dense<0.000000e+00> : vector<32x2xf32>
    %275 = tpu.matmul %244, %274, %cst_190 {dimension_numbers = #tpu.dot_dimension_numbers<[1], [0], [0], [1], [0, 0, 1, 1], [], []>} : vector<32x8xf32>, vector<8x2xf32>, vector<32x2xf32> -> vector<32x2xf32>
    %276 = arith.addf %273, %275 : vector<32x2xf32>
    %277 = vector.extract_strided_slice %266 {offsets = [24, 0], sizes = [16, 2], strides = [1, 1]} : vector<40x2xf32> to vector<16x2xf32>
    %cst_191 = arith.constant dense<0.000000e+00> : vector<32x2xf32>
    %278 = tpu.matmul %265, %277, %cst_191 {dimension_numbers = #tpu.dot_dimension_numbers<[1], [0], [0], [1], [0, 0, 1, 1], [], []>} : vector<32x16xf32>, vector<16x2xf32>, vector<32x2xf32> -> vector<32x2xf32>
    %279 = arith.addf %276, %278 : vector<32x2xf32>
    %c0_192 = arith.constant 0 : index
    %c0_193 = arith.constant 0 : index
    %280 = vector.load %arg2[%c0_192, %c0_193] : memref<2x32xf32, #tpu.memory_space<vmem>>, vector<2x32xf32>
    %cst_194 = arith.constant dense<0.000000e+00> : vector<2x2xf32>
    %281 = tpu.matmul %280, %279, %cst_194 {dimension_numbers = #tpu.dot_dimension_numbers<[1], [0], [0], [1], [0, 0, 1, 1], [], []>} : vector<2x32xf32>, vector<32x2xf32>, vector<2x2xf32> -> vector<2x2xf32>
    %c0_195 = arith.constant 0 : index
    %c0_196 = arith.constant 0 : index
    %282 = vector.load %arg4[%c0_195, %c0_196] : memref<1x2xf32, #tpu.memory_space<vmem>>, vector<1x2xf32>
    %283 = vector.broadcast %282 : vector<1x2xf32> to vector<2x2xf32>
    %284 = arith.addf %281, %283 : vector<2x2xf32>
    %cst_197 = arith.constant dense<0xFF800000> : vector<2xf32>
    %285 = vector.multi_reduction <maximumf>, %284, %cst_197 [1] : vector<2x2xf32> to vector<2xf32>
    %286 = vector.shape_cast %285 : vector<2xf32> to vector<2x1xf32>
    %287 = vector.broadcast %286 : vector<2x1xf32> to vector<2x2xf32>
    %288 = arith.subf %284, %287 : vector<2x2xf32>
    %289 = math.exp %288 : vector<2x2xf32>
    %cst_198 = arith.constant dense<0.000000e+00> : vector<2xf32>
    %290 = vector.multi_reduction <add>, %289, %cst_198 [1] : vector<2x2xf32> to vector<2xf32>
    %291 = vector.shape_cast %290 : vector<2xf32> to vector<2x1xf32>
    %292 = vector.broadcast %291 : vector<2x1xf32> to vector<2x2xf32>
    %293 = arith.divf %289, %292 : vector<2x2xf32>
    %c0_199 = arith.constant 0 : index
    %c0_200 = arith.constant 0 : index
    %294 = vector.load %arg27[%c0_199, %c0_200] : memref<2x2xf32, #tpu.memory_space<vmem>>, vector<2x2xf32>
    tpu.vector_store %arg27[%c0_199, %c0_200], %293 {strides = array<i32>} : memref<2x2xf32, #tpu.memory_space<vmem>>, vector<2x2xf32>,
    return
  }
}

</mosaic_0001>

<bundles_post_ra>
// kernel: swishnet_forward.1
= control target key start
LH: loop header
LB: loop body
LE: loop exit
PB: predicated region body
PF: predicated region fallthrough
CT: control target
= control target key end

     0   :  { %s5633_s0 = inlined_call_operand.vmem [shape: f32[32,20], index: 0, kind: input, shape index: {}]   ;;  %s5634_s1 = inlined_call_operand.vmem [shape: f32[6,32,32], index: 1, kind: input, shape index: {}]   ;;  %s5635_s2 = inlined_call_operand.vmem [shape: f32[2,32], index: 2, kind: input, shape index: {}]   ;;  %s5636_s3 = inlined_call_operand.vmem [shape: f32[40,2], index: 3, kind: input, shape index: {}]   ;;  %s5637_s4 = inlined_call_operand.vmem [shape: f32[1,2], index: 4, kind: input, shape index: {}]   ;;  %s5638_s5 = inlined_call_operand.vmem [shape: f32[60,16], index: 5, kind: input, shape index: {}]   ;;  %s5639_s6 = inlined_call_operand.vmem [shape: f32[1,16], index: 6, kind: input, shape index: {}]   ;;  %s5640_s7 = inlined_call_operand.vmem [shape: f32[120,16], index: 7, kind: input, shape index: {}]   ;;  %s5641_s8 = inlined_call_operand.vmem [shape: f32[1,16], index: 8, kind: input, shape index: {}]   ;;  %s5642_s9 = inlined_call_operand.vmem [shape: f32[48,8], index: 9, kind: input, shape index: {}]   ;;  %s5643_s10 = inlined_call_operand.vmem [shape: f32[1,8], index: 10, kind: input, shape index: {}]   ;;  %s5644_s11 = inlined_call_operand.vmem [shape: f32[96,8], index: 11, kind: input, shape index: {}]   ;;  %s5645_s12 = inlined_call_operand.vmem [shape: f32[1,8], index: 12, kind: input, shape index: {}]   ;;  %s5646_s13 = inlined_call_operand.vmem [shape: f32[24,8], index: 13, kind: input, shape index: {}]   ;;  %s5647_s14 = inlined_call_operand.vmem [shape: f32[1,8], index: 14, kind: input, shape index: {}]   ;;  %s5648_s15 = inlined_call_operand.vmem [shape: f32[48,8], index: 15, kind: input, shape index: {}]   ;;  %s5649_s16 = inlined_call_operand.vmem [shape: f32[1,8], index: 16, kind: input, shape index: {}]   ;;  %s5650_s17 = inlined_call_operand.vmem [shape: f32[24,16], index: 17, kind: input, shape index: {}]   ;;  %s5651_s18 = inlined_call_operand.vmem [shape: f32[1,16], index: 18, kind: input, shape index: {}]   ;;  %s5652_s19 = inlined_call_operand.vmem [shape: f32[24,16], index: 19, kind: input, shape index: {}]   ;;  %s5653_s20 = inlined_call_operand.vmem [shape: f32[1,16], index: 20, kind: input, shape index: {}]   ;;  %s5654_s21 = inlined_call_operand.vmem [shape: f32[24,16], index: 21, kind: input, shape index: {}]   ;;  %s5655_s22 = inlined_call_operand.vmem [shape: f32[1,16], index: 22, kind: input, shape index: {}]   ;;  %s5656_s23 = inlined_call_operand.vmem [shape: f32[24,16], index: 23, kind: input, shape index: {}]   ;;  %s5657_s24 = inlined_call_operand.vmem [shape: f32[1,16], index: 24, kind: input, shape index: {}]   ;;  %s5658_s25 = inlined_call_operand.vmem [shape: f32[24,32], index: 25, kind: input, shape index: {}]   ;;  %s5659_s26 = inlined_call_operand.vmem [shape: f32[1,32], index: 26, kind: input, shape index: {}]   ;;  %s5660_s27 = inlined_call_operand.hbm [shape: f32[2,2], index: 27, kind: output, shape index: {}]  }
   0x1   :  { %5672 = sst [smem:[#allocation5_spill]] %s5633_s0 }
   0x2   :  { %5673 = sst [smem:[#allocation6_spill]] %s5634_s1 }
   0x3   :  { %5674 = sst [smem:[#allocation7_spill]] %s5635_s2 }
   0x4   :  { %5675 = sst [smem:[#allocation8_spill]] %s5636_s3 }
   0x5   :  { %5676 = sst [smem:[#allocation9_spill]] %s5637_s4 }
   0x6   :  { %5677 = sst [smem:[#allocation10_spill]] %s5638_s5 }
   0x7   :  { %5678 = sst [smem:[#allocation11_spill]] %s5639_s6 }
   0x8   :  { %5679 = sst [smem:[#allocation12_spill]] %s5640_s7 }
   0x9   :  { %5680 = sst [smem:[#allocation13_spill]] %s5641_s8 }
   0xa   :  { %5681 = sst [smem:[#allocation14_spill]] %s5642_s9 }
   0xb   :  { %5682 = sst [smem:[#allocation15_spill]] %s5643_s10 }
   0xc   :  { %5683 = sst [smem:[#allocation16_spill]] %s5644_s11 }
   0xd   :  { %s5684_s8 = sld [smem:[#allocation5_spill]]  ;;  %vm105_vm0 = vcmask 261120  }
   0xe   :  { %s5685_s6 = sld [smem:[#allocation6_spill]] }
  0x13   :  { %v4145_v0 = vld [vmem:[%s5684_s8 + $0x18] sm:$0xff]  ;;  %v4150_v1 = vld [vmem:[%s5684_s8 + $0x10] sm:$0xff]  ;;  %v4158_v2 = vld [vmem:[%s5684_s8 + $0x8] sm:$0xff] }
  0x14   :  { %130 = vmatpush.msra.mxu0 %v4145_v0  ;;  %3626 = vmatpush.msra.mxu1 %v4145_v0  ;;  %v4167_v3 = vld [vmem:[%s5684_s8] sm:$0xff]  ;;  %v4180_v5 = vld [vmem:[%s5685_s6 + $0x8] sm:$0xff] }
  0x15   :  { %3622 = vmatpush.msra.mxu2 %v4145_v0  ;;  %428 = vmatpush.msra.mxu3 %v4145_v0  ;;  %v4172_v4 = vld [vmem:[%s5685_s6 + $0x20] sm:$0xff]  ;;  %v4189_v6 = vld [vmem:[%s5685_s6 + $0x28] sm:$0xff] }
  0x16   :  { %131 = vmatpush.msra.mxu0 %v4150_v1  ;;  %3627 = vmatpush.msra.mxu1 %v4150_v1 }
  0x17   :  { %3623 = vmatpush.msra.mxu2 %v4150_v1  ;;  %429 = vmatpush.msra.mxu3 %v4150_v1 }
  0x18   :  { %132 = vmatpush.msra.mxu0 %v4158_v2  ;;  %3628 = vmatpush.msra.mxu1 %v4158_v2 }
  0x19   :  { %3624 = vmatpush.msra.mxu2 %v4158_v2  ;;  %430 = vmatpush.msra.mxu3 %v4158_v2 }
  0x1a   :  { %133 = vmatpush.msra.mxu0 %v4167_v3  ;;  %3629 = vmatpush.msra.mxu1 %v4167_v3 }
  0x1b   :  { %3408 = vmatmul.msk.f32.vlgmr.msra.gmra.mxu0 %vm105_vm0, %v4172_v4  ;;  %3413 = vmatmul.msk.f32.vlgmr.msra.gmra.mxu1 %vm105_vm0, %v4180_v5 }
  0x1c   :  { %3625 = vmatpush.msra.mxu2 %v4167_v3  ;;  %175 = vmatpush.msrb.mxu0 %v4145_v0 }
  0x1d   :  { %3409 = vmatmul.msk.f32.vlgmr.msra.gmra.mxu2 %vm105_vm0, %v4189_v6  ;;  %520 = vmatpush.msrb.mxu1 %v4145_v0 }
  0x1e   :  { %32 = vsyncpa [#allocation3], 0  ;;  %176 = vmatpush.msrb.mxu0 %v4150_v1  ;;  %431 = vmatpush.msra.mxu3 %v4167_v3  ;;  %s3986_s4 = smov 100   ;;  %v4209_v7 = vld [vmem:[%s5685_s6] sm:$0xff]  ;;  %v4214_v8 = vld [vmem:[%s5685_s6 + $0x10] sm:$0xff]  ;;  %s3987_s1 = smov 80  }
  0x1f   :  { %521 = vmatpush.msrb.mxu1 %v4150_v1  ;;  %597 = vrot.lane.b32.xlu2 %v4167_v3, %s3986_s4  ;;  %v4223_v9 = vld [vmem:[%s5685_s6 + $0x30] sm:$0xff]  ;;  %v4238_v10 = vld [vmem:[%s5685_s6 + $0x18] sm:$0xff]  ;;  %v4243_v11 = vld [vmem:[%s5685_s6 + $0x60] sm:$0xff]  ;;  %s3988_s11 = smov 60   ;;  %s3989_s2 = smov 20   ;;  %vm250_vm1 = vcmask 1043456  }
  0x20   :  { %177 = vmatpush.msrb.mxu0 %v4158_v2  ;;  %599 = vrot.lane.b32.xlu0 %v4158_v2, %s3986_s4  ;;  %v4253_v12 = vld [vmem:[%s5685_s6 + $0x38] sm:$0xff]  ;;  %v3425_v13 = vld [vmem:[%s5685_s6 + $0x80] sm:$0xff]  ;;  %v4264_v14 = vld [vmem:[%s5685_s6 + $0x68] sm:$0xff]  ;;  %s5670_s3 = smov 40   ;;  %s5686_s30 = sld [smem:[#allocation12_spill]]  ;;  %vm229_vm2 = vcmask 326656  }
  0x21   :  { %522 = vmatpush.msrb.mxu1 %v4158_v2  ;;  %3429 = vmatmul.msk.f32.vlgmr.msra.gmra.mxu3 %vm105_vm0, %v3425_v13  ;;  %v4269_v15 = vld [vmem:[%s5685_s6 + $0x40] sm:$0xff]  ;;  %v3426_v16 = vld [vmem:[%s5685_s6 + $0x88] sm:$0xff]  ;;  %v4282_v17 = vld [vmem:[%s5685_s6 + $0x70] sm:$0xff]  ;;  %vm224_vm3 = vcmask 162816   ;;  %vm237_vm4 = vcmask 490496   ;;  %vm621_vm5 = vcmask 654336  }
  0x22   :  { %178 = vmatpush.msrb.mxu0 %v4167_v3  ;;  %v4287_v18 = vld [vmem:[%s5685_s6 + $0x48] sm:$0xff]  ;;  %v4296_v19 = vld [vmem:[%s5685_s6 + $0x50] sm:$0xff]  ;;  %v4301_v20 = vld [vmem:[%s5685_s6 + $0x78] sm:$0xff]  ;;  %vm626_vm6 = vcmask 818176   ;;  %vm634_vm7 = vcmask 982016   ;;  %s5688_s9 = sld [smem:[#allocation13_spill]] }
  0x23   :  { %3412 = vmatmul.msk.f32.vlgmr.msrb.gmra.mxu0 %vm105_vm0, %v4209_v7  ;;  %3414 = vmatmul.msk.f32.gmra.mxu1 %vm105_vm0, %v4214_v8  ;;  %v4310_v21 = vld [vmem:[%s5685_s6 + $0x58] sm:$0xff]  ;;  %v3427_v22 = vld [vmem:[%s5685_s6 + $0x90] sm:$0xff]  ;;  %s5668_s5 = smov 120   ;;  %s5689_s10 = sld [smem:[#allocation11_spill]] }
  0x24   :  { %474 = vmatpush.msra.mxu0 %v4145_v0  ;;  %523 = vmatpush.msrb.mxu1 %v4167_v3  ;;  %v3428_v23 = vld [vmem:[%s5685_s6 + $0x98] sm:$0xff]  ;;  %s3992_s29 = smov 8   ;;  %s5690_s8 = sld [smem:[#allocation14_spill]] }
  0x25   :  { %3410 = vmatmul.msk.f32.gmra.mxu2 %vm105_vm0, %v4223_v9  ;;  %s3999_s28 = smov 24   ;;  %s5697_s0 = smov 40  }
  0x26   :  { %475 = vmatpush.msra.mxu0 %v4150_v1  ;;  %v397_v40 = vld [vmem:[%s5686_s30 + $0x70] sm:$0xff]  ;;  %v396_v41 = vld [vmem:[%s5686_s30 + $0x68] sm:$0xff]  ;;  %v395_v42 = vld [vmem:[%s5686_s30 + $0x60] sm:$0xff]  ;;  %s5705_s7 = sld [smem:[#allocation9_spill]] }
  0x27   :  { %648 = vmatpush.msrb.mxu3 %v397_v40  ;;  %v394_v43 = vld [vmem:[%s5686_s30 + $0x58] sm:$0xff]  ;;  %v393_v44 = vld [vmem:[%s5686_s30 + $0x50] sm:$0xff]  ;;  %v392_v45 = vld [vmem:[%s5686_s30 + $0x48] sm:$0xff] }
  0x28   :  { %476 = vmatpush.msra.mxu0 %v4158_v2  ;;  %v391_v46 = vld [vmem:[%s5686_s30 + $0x40] sm:$0xff]  ;;  %v390_v47 = vld [vmem:[%s5686_s30 + $0x38] sm:$0xff]  ;;  %v389_v48 = vld [vmem:[%s5686_s30 + $0x30] sm:$0xff] }
  0x29   :  { %3430 = vmatmul.msk.f32.gmra.mxu3 %vm105_vm0, %v3426_v16  ;;  %v388_v49 = vld [vmem:[%s5686_s30 + $0x28] sm:$0xff]  ;;  %v387_v50 = vld [vmem:[%s5686_s30 + $0x20] sm:$0xff]  ;;  %v386_v51 = vld [vmem:[%s5686_s30 + $0x18] sm:$0xff] }
  0x2a   :  { %477 = vmatpush.msra.mxu0 %v4167_v3  ;;  %649 = vmatpush.msrb.mxu3 %v396_v41  ;;  %v385_v52 = vld [vmem:[%s5686_s30 + $0x10] sm:$0xff]  ;;  %v384_v53 = vld [vmem:[%s5686_s30 + $0x8] sm:$0xff]  ;;  %v383_v54 = vld [vmem:[%s5686_s30] sm:$0xff]  ;;  %s4001_s30 = smov [#allocation2]  }
  0x2b   :  { %3415 = vmatmul.msk.f32.gmra.mxu1 %vm105_vm0, %v4238_v10  ;;  %3437 = vmatmul.msk.f32.vlgmr.msra.gmra.mxu0 %vm105_vm0, %v4243_v11 }
  0x2c   :  { %650 = vmatpush.msrb.mxu3 %v395_v42 }
  0x2d   :  { %3411 = vmatmul.msk.f32.gmra.mxu2 %vm105_vm0, %v4253_v12 }
  0x2e   :  { %651 = vmatpush.msrb.mxu3 %v394_v43 }
  0x30   :  { %652 = vmatpush.msrb.mxu3 %v393_v44 }
  0x31   :  { %3431 = vmatmul.msk.f32.gmra.mxu3 %vm105_vm0, %v3427_v22 }
  0x32   :  { %653 = vmatpush.msrb.mxu3 %v392_v45 }
  0x33   :  { %3438 = vmatmul.msk.f32.gmra.mxu0 %vm105_vm0, %v4264_v14  ;;  %3445 = vmatmul.msk.f32.vlgmr.msrb.gmra.mxu1 %vm105_vm0, %v4269_v15 }
  0x34   :  { %654 = vmatpush.msrb.mxu3 %v391_v46 }
  0x36   :  { %655 = vmatpush.msrb.mxu3 %v390_v47 }
  0x38   :  { %656 = vmatpush.msrb.mxu3 %v389_v48 }
  0x39   :  { %3432 = vmatmul.msk.f32.gmra.mxu3 %vm105_vm0, %v3428_v23 }
  0x3a   :  { %657 = vmatpush.msrb.mxu3 %v388_v49 }
  0x3b   :  { %3439 = vmatmul.msk.f32.gmra.mxu0 %vm105_vm0, %v4282_v17  ;;  %3446 = vmatmul.msk.f32.gmra.mxu1 %vm105_vm0, %v4287_v18 }
  0x3c   :  { %658 = vmatpush.msrb.mxu3 %v387_v50 }
  0x3e   :  { %659 = vmatpush.msrb.mxu3 %v386_v51 }
  0x40   :  { %660 = vmatpush.msrb.mxu3 %v385_v52 }
  0x42   :  { %661 = vmatpush.msrb.mxu3 %v384_v53 }
  0x43   :  { %3447 = vmatmul.msk.f32.gmra.mxu1 %vm105_vm0, %v4296_v19  ;;  %3440 = vmatmul.msk.f32.gmra.mxu0 %vm105_vm0, %v4301_v20 }
  0x44   :  { %662 = vmatpush.msrb.mxu3 %v383_v54 }
  0x4b   :  { %3448 = vmatmul.msk.f32.gmra.mxu1 %vm105_vm0, %v4310_v21 }
  0x79   :  { %v598_v56 = vpop.permute.xlu2 %597 }
  0x92   :  { %v600_v57 = vpop.permute.xlu0 %599 }
  0x98   :  { %v4322_v24 = vpop.f32.mrf.mxu0  ;;  %v183_v25 = vpop.f32.mrf.mxu1 }
  0x99   :  { %587 = vrot.lane.b32.xlu2 %v183_v25, %s3987_s1  ;;  %573 = vrot.lane.b32.xlu1 %v4322_v24, %s3988_s11 }
  0xa0   :  { %v4327_v26 = vpop.f32.mrf.mxu2  ;;  %v180_v27 = vpop.f32.mrf.mxu0 }
  0xa1   :  { %v186_v28 = vpop.f32.mrf.mxu1  ;;  %575 = vrot.lane.b32.xlu1 %v4327_v26, %s3988_s11 }
  0xa4   :  { %v433_v62 = vpop.f32.mrf.mxu3 }
  0xa8   :  { %v479_v29 = vpop.f32.mrf.mxu0  ;;  %v4338_v35 = vpop.f32.mrf.mxu2 }
  0xa9   :  { %v189_v30 = vpop.f32.mrf.mxu1  ;;  %585 = vrot.lane.b32.xlu1 %v180_v27, %s3987_s1  ;;  %541 = vrot.lane.b32.xlu0 %v479_v29, %s3989_s2 }
  0xb0   :  { %v482_v31 = vpop.f32.mrf.mxu0  ;;  %v4347_v39 = vpop.f32.mrf.mxu2 }
  0xb1   :  { %v525_v32 = vpop.f32.mrf.mxu1  ;;  %589 = vrot.lane.b32.xlu1 %v186_v28, %s3987_s1  ;;  %543 = vrot.lane.b32.xlu2 %v482_v31, %s3989_s2 }
  0xb2   :  { %557 = vrot.lane.b32.xlu0 %v525_v32, %s5670_s3 }
  0xb8   :  { %v485_v33 = vpop.f32.mrf.mxu0 }
  0xb9   :  { %v528_v34 = vpop.f32.mrf.mxu1  ;;  %545 = vrot.lane.b32.xlu1 %v485_v33, %s3989_s2 }
  0xba   :  { %559 = vrot.lane.b32.xlu0 %v528_v34, %s5670_s3 }
  0xc0   :  { %v488_v37 = vpop.f32.mrf.mxu0 }
  0xc1   :  { %v531_v36 = vpop.f32.mrf.mxu1 }
  0xc2   :  { %577 = vrot.lane.b32.xlu0 %v4338_v35, %s3988_s11  ;;  %561 = vrot.lane.b32.xlu2 %v531_v36, %s5670_s3 }
  0xc9   :  { %v534_v38 = vpop.f32.mrf.mxu1 }
  0xca   :  { %601 = vrot.lane.b32.xlu2 %v4150_v1, %s3986_s4  ;;  %563 = vrot.lane.b32.xlu1 %v534_v38, %s5670_s3 }
  0xcb   :  { %547 = vrot.lane.b32.xlu0 %v488_v37, %s3989_s2 }
  0xd2   :  { %579 = vrot.lane.b32.xlu2 %v4347_v39, %s3988_s11  ;;  %603 = vrot.lane.b32.xlu1 %v4145_v0, %s3986_s4  ;;  %s3995_s4 = smov 64   ;;  %s5701_s11 = sld [smem:[#allocation8_spill]] }
  0xd3   :  { %591 = vrot.lane.b32.xlu0 %v189_v30, %s3987_s1 }
  0xda   :  { %196 = vrot.lane.b32.xlu2 %v180_v27, %s3989_s2  ;;  %198 = vrot.lane.b32.xlu1 %v183_v25, %s3989_s2  ;;  %v436_v25 = vpop.f32.mrf.mxu3 }
  0xdb   :  { %212 = vrot.lane.b32.xlu0 %v4167_v3, %s5670_s3 }
  0xe2   :  { %214 = vrot.lane.b32.xlu2 %v4158_v2, %s5670_s3  ;;  %216 = vrot.lane.b32.xlu1 %v4150_v1, %s5670_s3  ;;  %v439_v40 = vpop.f32.mrf.mxu3 }
  0xe3   :  { %200 = vrot.lane.b32.xlu0 %v186_v28, %s3989_s2 }
  0xea   :  { %202 = vrot.lane.b32.xlu2 %v189_v30, %s3989_s2  ;;  %s5687_s2 = sld [smem:[#allocation10_spill]]  ;;  %v442_v52 = vpop.f32.mrf.mxu3 }
  0xeb   :  { %218 = vrot.lane.b32.xlu0 %v4145_v0, %s5670_s3  ;;  %s5696_s3 = sld [smem:[#allocation15_spill]] }
  0xf0   :  { %v98_v63 = vld [vmem:[%s5687_s2 + $0x38] sm:$0xf]  ;;  %v97_v0 = vld [vmem:[%s5687_s2 + $0x30] sm:$0xff]  ;;  %v96_v1 = vld [vmem:[%s5687_s2 + $0x28] sm:$0xff] }
  0xf1   :  { %3416 = vmatpush.msk.msrb.mxu2 %vm250_vm1, %v98_v63  ;;  %v95_v23 = vld [vmem:[%s5687_s2 + $0x20] sm:$0xff]  ;;  %v94_v28 = vld [vmem:[%s5687_s2 + $0x18] sm:$0xff]  ;;  %v93_v31 = vld [vmem:[%s5687_s2 + $0x10] sm:$0xff] }
  0xf2   :  { %v92_v32 = vld [vmem:[%s5687_s2 + $0x8] sm:$0xff]  ;;  %v91_v38 = vld [vmem:[%s5687_s2] sm:$0xff]  ;;  %s3994_s2 = smov 16  }
  0xf3   :  { %v588_v59 = vpop.permute.xlu2 %587  ;;  %263 = vmatpush.msrb.mxu2 %v97_v0 }
  0xf5   :  { %264 = vmatpush.msrb.mxu2 %v96_v1 }
  0xf7   :  { %265 = vmatpush.msrb.mxu2 %v95_v23 }
  0xf9   :  { %266 = vmatpush.msrb.mxu2 %v94_v28 }
  0xfb   :  { %267 = vmatpush.msrb.mxu2 %v93_v31 }
  0xfd   :  { %268 = vmatpush.msrb.mxu2 %v92_v32  ;;  %v3652_v32 = vld [vmem:[%s5688_s9] ss:$0 sm:$0xff]  ;;  %s3996_s9 = smov 48  }
  0xff   :  { %269 = vmatpush.msrb.mxu2 %v91_v38 }
 0x10b   :  { %v574_v55 = vpop.permute.xlu1 %573  ;;  %v544_v2 = vpop.permute.xlu2 %543 }
 0x10c   :  { %v610_v33 = vsel %vm224_vm3, %v436_v25, %v544_v2 }
 0x113   :  { %v576_v58 = vpop.permute.xlu1 %575 }
 0x11b   :  { %v586_v60 = vpop.permute.xlu1 %585  ;;  %v542_v61 = vpop.permute.xlu0 %541 }
 0x11c   :  { %v609_v3 = vsel %vm224_vm3, %v433_v62, %v542_v61  ;;  %v562_v34 = vpop.permute.xlu2 %561 }
 0x123   :  { %v590_v13 = vpop.permute.xlu1 %589 }
 0x124   :  { %v558_v16 = vpop.permute.xlu0 %557  ;;  %v602_v49 = vpop.permute.xlu2 %601 }
 0x125   :  { %v613_v22 = vsel %vm229_vm2, %v609_v3, %v558_v16 }
 0x126   :  { %v617_v27 = vsel %vm237_vm4, %v613_v22, %v574_v55 }
 0x127   :  { %v622_v29 = vsel %vm621_vm5, %v617_v27, %v586_v60 }
 0x128   :  { %v627_v30 = vsel %vm626_vm6, %v622_v29, %v598_v56 }
 0x129   :  { %3449 = vmatmul.msk.f32.vlgmr.msrb.gmra.mxu3 %vm634_vm7, %v627_v30 }
 0x12b   :  { %v546_v42 = vpop.permute.xlu1 %545 }
 0x12c   :  { %v560_v36 = vpop.permute.xlu0 %559  ;;  %v611_v45 = vsel %vm224_vm3, %v439_v40, %v546_v42  ;;  %v580_v56 = vpop.permute.xlu2 %579 }
 0x12d   :  { %v614_v37 = vsel %vm229_vm2, %v610_v33, %v560_v36  ;;  %v615_v47 = vsel %vm229_vm2, %v611_v45, %v562_v34 }
 0x12e   :  { %v618_v41 = vsel %vm237_vm4, %v614_v37, %v576_v58 }
 0x12f   :  { %v623_v43 = vsel %vm621_vm5, %v618_v41, %v588_v59 }
 0x130   :  { %v628_v44 = vsel %vm626_vm6, %v623_v43, %v600_v57 }
 0x131   :  { %3450 = vmatmul.msk.f32.gmra.mxu3 %vm634_vm7, %v628_v44 }
 0x134   :  { %v578_v46 = vpop.permute.xlu0 %577  ;;  %v197_v63 = vpop.permute.xlu2 %196 }
 0x135   :  { %v619_v48 = vsel %vm237_vm4, %v615_v47, %v578_v46  ;;  %v225_v0 = vsel %vm224_vm3, %v4322_v24, %v197_v63  ;;  %v4487_v46 = vld [vmem:[%s5689_s10] ss:$0 sm:$0xff] }
 0x136   :  { %v624_v50 = vsel %vm621_vm5, %v619_v48, %v590_v13 }
 0x137   :  { %v629_v51 = vsel %vm626_vm6, %v624_v50, %v602_v49 }
 0x139   :  { %3451 = vmatmul.msk.f32.gmra.mxu3 %vm634_vm7, %v629_v51 }
 0x13c   :  { %v564_v53 = vpop.permute.xlu1 %563  ;;  %v215_v16 = vpop.permute.xlu2 %214 }
 0x13d   :  { %v548_v54 = vpop.permute.xlu0 %547 }
 0x13e   :  { %v612_v55 = vsel %vm224_vm3, %v442_v52, %v548_v54 }
 0x13f   :  { %v616_v57 = vsel %vm229_vm2, %v612_v55, %v564_v53 }
 0x140   :  { %v620_v59 = vsel %vm237_vm4, %v616_v57, %v580_v56 }
 0x144   :  { %v604_v58 = vpop.permute.xlu1 %603  ;;  %v203_v28 = vpop.permute.xlu2 %202 }
 0x145   :  { %v592_v60 = vpop.permute.xlu0 %591  ;;  %v228_v30 = vsel %vm224_vm3, %v4347_v39, %v203_v28 }
 0x146   :  { %v625_v61 = vsel %vm621_vm5, %v620_v59, %v592_v60 }
 0x147   :  { %v630_v62 = vsel %vm626_vm6, %v625_v61, %v604_v58 }
 0x148   :  { %3452 = vmatmul.msk.f32.gmra.mxu3 %vm634_vm7, %v630_v62 }
 0x14c   :  { %v199_v3 = vpop.permute.xlu1 %198 }
 0x14d   :  { %v213_v1 = vpop.permute.xlu0 %212  ;;  %v226_v13 = vsel %vm224_vm3, %v4327_v26, %v199_v3 }
 0x14e   :  { %v230_v2 = vsel %vm229_vm2, %v225_v0, %v213_v1  ;;  %v231_v22 = vsel %vm229_vm2, %v226_v13, %v215_v16 }
 0x14f   :  { %3417 = vmatmul.msk.f32.vlgmr.msrb.gmra.mxu2 %vm237_vm4, %v230_v2 }
 0x154   :  { %v217_v27 = vpop.permute.xlu1 %216 }
 0x155   :  { %v201_v23 = vpop.permute.xlu0 %200 }
 0x156   :  { %v227_v25 = vsel %vm224_vm3, %v4338_v35, %v201_v23 }
 0x157   :  { %3418 = vmatmul.msk.f32.gmra.mxu2 %vm237_vm4, %v231_v22  ;;  %v232_v24 = vsel %vm229_vm2, %v227_v25, %v217_v27 }
 0x15d   :  { %v219_v29 = vpop.permute.xlu0 %218 }
 0x15e   :  { %v233_v26 = vsel %vm229_vm2, %v228_v30, %v219_v29 }
 0x15f   :  { %3419 = vmatmul.msk.f32.gmra.mxu2 %vm237_vm4, %v232_v24 }
 0x167   :  { %3420 = vmatmul.msk.f32.gmra.mxu2 %vm237_vm4, %v233_v26 }
 0x1ac   :  { %v664_v31 = vpop.f32.mrf.mxu3 }
 0x1ad   :  { %v665_v41 = vadd.f32 %v3652_v32, %v664_v31 }
 0x1af   :  { %v3453_v30 = vmul.f32 -1.442695, %v665_v41 }
 0x1b4   :  { %v667_v35 = vpop.f32.mrf.mxu3 }
 0x1b5   :  { %v668_v33 = vadd.f32 %v3652_v32, %v667_v35 }
 0x1b7   :  { %3664 = vtanh.f32 %v668_v33  ;;  %v3454_v58 = vmul.f32 -1.442695, %v668_v33 }
 0x1bc   :  { %v670_v34 = vpop.f32.mrf.mxu3 }
 0x1bd   :  { %v3665_v36 = vpop.eup %3664  ;;  %v671_v37 = vadd.f32 %v3652_v32, %v670_v34 }
 0x1be   :  { %762 = vrot.lane.b32.xlu0 %v3665_v36, %s5668_s5 }
 0x1bf   :  { %3666 = vtanh.f32 %v671_v37  ;;  %v3455_v54 = vmul.f32 -1.442695, %v671_v37 }
 0x1c5   :  { %v3667_v39 = vpop.eup %3666 }
 0x1c6   :  { %764 = vrot.lane.b32.xlu2 %v3667_v39, %s5668_s5 }
 0x1cb   :  { %v673_v38 = vpop.f32.mrf.mxu3 }
 0x1cc   :  { %v674_v40 = vadd.f32 %v3652_v32, %v673_v38 }
 0x1ce   :  { %3668 = vtanh.f32 %v674_v40  ;;  %v3456_v3 = vmul.f32 -1.442695, %v674_v40 }
 0x1cf   :  { %3670 = vtanh.f32 %v665_v41 }
 0x1d2   :  { %v4480_v42 = vpop.f32.mrf.mxu2 }
 0x1d4   :  { %v3669_v43 = vpop.eup %3668 }
 0x1d5   :  { %766 = vrot.lane.b32.xlu1 %v3669_v43, %s5668_s5  ;;  %v3671_v45 = vpop.eup %3670 }
 0x1da   :  { %v274_v44 = vpop.f32.mrf.mxu2 }
 0x1db   :  { %v4499_v52 = vadd.f32 %v4487_v46, %v274_v44 }
 0x1dd   :  { %760 = vrot.lane.b32.xlu1 %v3671_v45, %s5668_s5 }
 0x1e2   :  { %v277_v47 = vpop.f32.mrf.mxu2 }
 0x1e3   :  { %v4490_v48 = vadd.f32 %v4487_v46, %v277_v47 }
 0x1e5   :  { %3672 = vtanh.f32 %v4490_v48 }
 0x1ea   :  { %v280_v49 = vpop.f32.mrf.mxu2 }
 0x1eb   :  { %v3673_v50 = vpop.eup %3672  ;;  %v4494_v51 = vadd.f32 %v4487_v46, %v280_v49 }
 0x1ec   :  { %371 = vrot.lane.b32.xlu0 %v3673_v50, %s5668_s5 }
 0x1ed   :  { %3674 = vtanh.f32 %v4494_v51 }
 0x1ee   :  { %3676 = vtanh.f32 %v4499_v52 }
 0x1ef   :  { %3678 = vpow2.f32 %v3455_v54 }
 0x1f3   :  { %v3675_v53 = vpop.eup %3674 }
 0x1f4   :  { %373 = vrot.lane.b32.xlu2 %v3675_v53, %s5668_s5  ;;  %v3677_v55 = vpop.eup %3676 }
 0x1f5   :  { %v3679_v56 = vpop.eup %3678 }
 0x1f6   :  { %v690_v57 = vadd.f32 1.0, %v3679_v56 }
 0x1f8   :  { %3680 = vrcp.f32 %v690_v57  ;;  %v733_v13 = vand.u32 2147483648, %v690_v57  ;;  %vm727_vm9 = vweird.f32 %v690_v57  ;;  %v731_v16 = vand.u32 2147483647, %v690_v57 }
 0x1f9   :  { %3682 = vpow2.f32 %v3454_v58 }
 0x1fa   :  { %v734_v25 = vor.u32 1.1754944e-38, %v733_v13  ;;  %vm732_vm11 = vcmp.eq.f32.partialorder %v731_v16, 8.507059e+37 }
 0x1fc   :  { %369 = vrot.lane.b32.xlu2 %v3677_v55, %s5668_s5 }
 0x1fe   :  { %v3681_v59 = vpop.eup %3680 }
 0x1ff   :  { %v3683_v60 = vpop.eup %3682  ;;  %v723_v61 = vmul.f32 %v3681_v59, %v690_v57  ;;  %vm728_vm8 = vweird.f32 %v3681_v59 }
 0x200   :  { %v689_v62 = vadd.f32 1.0, %v3683_v60  ;;  %vm729_vm10 = vmor %vm727_vm9, %vm728_vm8 }
 0x201   :  { %v724_v63 = vsub.f32 1.0, %v723_v61  ;;  %v272_v61 = vadd.f32 %v4487_v46, %v4480_v42  ;;  %v802_v42 = vld [vmem:[%s5690_s8 + $0x28] sm:$0xff]  ;;  %v801_v46 = vld [vmem:[%s5690_s8 + $0x20] sm:$0xff] }
 0x202   :  { %3684 = vrcp.f32 %v689_v62  ;;  %v718_v33 = vand.u32 2147483648, %v689_v62  ;;  %vm712_vm13 = vweird.f32 %v689_v62  ;;  %v716_v34 = vand.u32 2147483647, %v689_v62  ;;  %3630 = vmatpush.msra.mxu3 %v802_v42  ;;  %929 = vmatpush.msra.mxu1 %v802_v42 }
 0x203   :  { %v725_v0 = vmul.f32 %v3681_v59, %v724_v63  ;;  %3686 = vpow2.f32 %v3456_v3 }
 0x204   :  { %3688 = vpow2.f32 %v3453_v30  ;;  %v719_v39 = vor.u32 1.1754944e-38, %v718_v33  ;;  %vm717_vm15 = vcmp.eq.f32.partialorder %v716_v34, 8.507059e+37  ;;  %3631 = vmatpush.msra.mxu3 %v801_v46  ;;  %930 = vmatpush.msra.mxu1 %v801_v46  ;;  %v3424_v30 = vmul.f32 -1.442695, %v4494_v51 }
 0x205   :  { %v726_v1 = vadd.f32 %v3681_v59, %v725_v0 }
 0x207   :  { %v730_v22 = vsel %vm729_vm10, %v3681_v59, %v726_v1 }
 0x208   :  { %v3685_v2 = vpop.eup %3684  ;;  %v735_v24 = vsel %vm732_vm11, %v734_v25, %v730_v22 }
 0x209   :  { %v708_v23 = vmul.f32 %v3685_v2, %v689_v62  ;;  %v3687_v26 = vpop.eup %3686  ;;  %vm713_vm12 = vweird.f32 %v3685_v2 }
 0x20a   :  { %v691_v32 = vadd.f32 1.0, %v3687_v26  ;;  %v3689_v36 = vpop.eup %3688  ;;  %vm714_vm14 = vmor %vm712_vm13, %vm713_vm12  ;;  %v3423_v26 = vmul.f32 -1.442695, %v4490_v48 }
 0x20b   :  { %v709_v29 = vsub.f32 1.0, %v708_v23  ;;  %v688_v38 = vadd.f32 1.0, %v3689_v36 }
 0x20c   :  { %3690 = vrcp.f32 %v691_v32  ;;  %v748_v56 = vand.u32 2147483648, %v691_v32  ;;  %vm742_vm3 = vweird.f32 %v691_v32  ;;  %v746_v57 = vand.u32 2147483647, %v691_v32 }
 0x20d   :  { %v710_v31 = vmul.f32 %v3685_v2, %v709_v29  ;;  %3692 = vrcp.f32 %v688_v38  ;;  %vm697_vm8 = vweird.f32 %v688_v38  ;;  %v701_v3 = vand.u32 2147483647, %v688_v38  ;;  %v798_v29 = vld [vmem:[%s5690_s8 + $0x8] sm:$0xff] }
 0x20e   :  { %v749_v60 = vor.u32 1.1754944e-38, %v748_v56  ;;  %vm747_vm6 = vcmp.eq.f32.partialorder %v746_v57, 8.507059e+37  ;;  %3694 = vtanh.f32 %v272_v61 }
 0x20f   :  { %v711_v35 = vadd.f32 %v3685_v2, %v710_v31  ;;  %vm702_vm10 = vcmp.eq.f32.partialorder %v701_v3, 8.507059e+37  ;;  %v3422_v31 = vmul.f32 -1.442695, %v4499_v52  ;;  %3696 = vpow2.f32 %v3424_v30 }
 0x210   :  { %3698 = vpow2.f32 %v3423_v26 }
 0x211   :  { %v715_v37 = vsel %vm714_vm14, %v3685_v2, %v711_v35  ;;  %v703_v2 = vand.u32 2147483648, %v688_v38  ;;  %3700 = vpow2.f32 %v3422_v31 }
 0x212   :  { %v720_v40 = vsel %vm717_vm15, %v719_v39, %v715_v37  ;;  %v3691_v43 = vpop.eup %3690  ;;  %v797_v39 = vld [vmem:[%s5690_s8] sm:$0xff] }
 0x213   :  { %v738_v45 = vmul.f32 %v3691_v43, %v691_v32  ;;  %v3693_v49 = vpop.eup %3692  ;;  %vm743_vm1 = vweird.f32 %v3691_v43  ;;  %v704_v16 = vor.u32 1.1754944e-38, %v703_v2  ;;  %v3421_v32 = vmul.f32 -1.442695, %v272_v61 }
 0x214   :  { %v693_v53 = vmul.f32 %v3693_v49, %v688_v38  ;;  %vm744_vm4 = vmor %vm742_vm3, %vm743_vm1  ;;  %vm698_vm7 = vweird.f32 %v3693_v49 }
 0x215   :  { %v739_v47 = vsub.f32 1.0, %v738_v45  ;;  %vm699_vm9 = vmor %vm697_vm8, %vm698_vm7  ;;  %3702 = vpow2.f32 %v3421_v32 }
 0x216   :  { %v694_v55 = vsub.f32 1.0, %v693_v53 }
 0x217   :  { %v740_v50 = vmul.f32 %v3691_v43, %v739_v47 }
 0x218   :  { %v695_v59 = vmul.f32 %v3693_v49, %v694_v55 }
 0x219   :  { %v741_v54 = vadd.f32 %v3691_v43, %v740_v50 }
 0x21a   :  { %v696_v1 = vadd.f32 %v3693_v49, %v695_v59 }
 0x21b   :  { %v745_v58 = vsel %vm744_vm4, %v3691_v43, %v741_v54 }
 0x21c   :  { %v750_v63 = vsel %vm747_vm6, %v749_v60, %v745_v58  ;;  %v700_v13 = vsel %vm699_vm9, %v3693_v49, %v696_v1  ;;  %vm792_vm9 = vcmask 64512  }
 0x21d   :  { %v705_v22 = vsel %vm702_vm10, %v704_v16, %v700_v13 }
 0x220   :  { %v765_v27 = vpop.permute.xlu2 %764 }
 0x221   :  { %v774_v28 = vmul.f32 %v765_v27, %v735_v24  ;;  %v3695_v27 = vpop.eup %3694  ;;  %v800_v24 = vld [vmem:[%s5690_s8 + $0x18] sm:$0xff] }
 0x222   :  { %3632 = vmatpush.msra.mxu3 %v800_v24  ;;  %931 = vmatpush.msra.mxu1 %v800_v24  ;;  %v3697_v35 = vpop.eup %3696 }
 0x223   :  { %784 = vrot.lane.b32.xlu0 %v774_v28, %s3992_s29  ;;  %v799_v28 = vld [vmem:[%s5690_s8 + $0x10] sm:$0xff]  ;;  %v3699_v33 = vpop.eup %3698  ;;  %v298_v34 = vadd.f32 1.0, %v3697_v35  ;;  %s3993_s8 = smov 32  }
 0x224   :  { %3633 = vmatpush.msra.mxu3 %v799_v28  ;;  %932 = vmatpush.msra.mxu1 %v799_v28  ;;  %v3701_v36 = vpop.eup %3700  ;;  %v297_v37 = vadd.f32 1.0, %v3699_v33 }
 0x225   :  { %v296_v38 = vadd.f32 1.0, %v3701_v36  ;;  %3704 = vrcp.f32 %v298_v34  ;;  %v3703_v48 = vpop.eup %3702  ;;  %v355_v60 = vand.u32 2147483648, %v298_v34  ;;  %vm349_vm12 = vweird.f32 %v298_v34 }
 0x226   :  { %3634 = vmatpush.msra.mxu3 %v798_v29  ;;  %933 = vmatpush.msra.mxu1 %v798_v29  ;;  %3706 = vrcp.f32 %v297_v37  ;;  %v4532_v51 = vadd.f32 1.0, %v3703_v48  ;;  %v340_v3 = vand.u32 2147483648, %v297_v37  ;;  %vm334_vm1 = vweird.f32 %v297_v37 }
 0x227   :  { %3708 = vrcp.f32 %v296_v38  ;;  %vm319_vm3 = vweird.f32 %v296_v38 }
 0x228   :  { %3635 = vmatpush.msra.mxu3 %v797_v39  ;;  %934 = vmatpush.msra.mxu1 %v797_v39  ;;  %3710 = vrcp.f32 %v4532_v51  ;;  %v341_v29 = vor.u32 1.1754944e-38, %v340_v3  ;;  %v310_v48 = vand.u32 2147483648, %v4532_v51 }
 0x22b   :  { %v3705_v52 = vpop.eup %3704 }
 0x22c   :  { %vm350_vm11 = vweird.f32 %v3705_v52 }
 0x22d   :  { %vm4539_vm14 = vmor %vm349_vm12, %vm350_vm11  ;;  %vm304_vm12 = vweird.f32 %v4532_v51 }
 0x230   :  { %v763_v41 = vpop.permute.xlu0 %762 }
 0x231   :  { %v773_v44 = vmul.f32 %v763_v41, %v720_v40  ;;  %v3707_v40 = vpop.eup %3706  ;;  %v345_v41 = vmul.f32 %v3705_v52, %v298_v34 }
 0x232   :  { %v3709_v43 = vpop.eup %3708  ;;  %vm335_vm13 = vweird.f32 %v3707_v40 }
 0x233   :  { %782 = vrot.lane.b32.xlu2 %v773_v44, %s3992_s29  ;;  %v330_v44 = vmul.f32 %v3707_v40, %v297_v37  ;;  %v346_v45 = vsub.f32 1.0, %v345_v41  ;;  %v315_v47 = vmul.f32 %v3709_v43, %v296_v38  ;;  %v4535_v50 = vpop.eup %3710  ;;  %vm320_vm15 = vweird.f32 %v3709_v43  ;;  %vm336_vm4 = vmor %vm334_vm1, %vm335_vm13 }
 0x234   :  { %v300_v56 = vmul.f32 %v4535_v50, %v4532_v51  ;;  %vm4547_vm7 = vmor %vm319_vm3, %vm320_vm15  ;;  %vm305_vm10 = vweird.f32 %v4535_v50  ;;  %v308_v41 = vand.u32 2147483647, %v4532_v51  ;;  %vm894_vm15 = vcmask 130048  }
 0x235   :  { %v331_v53 = vsub.f32 1.0, %v330_v44  ;;  %v347_v54 = vmul.f32 %v3705_v52, %v346_v45  ;;  %v316_v55 = vsub.f32 1.0, %v315_v47  ;;  %vm306_vm13 = vmor %vm304_vm12, %vm305_vm10  ;;  %v311_v45 = vor.u32 1.1754944e-38, %v310_v48 }
 0x236   :  { %vm906_vm1 = vcmask 392192   ;;  %vm1232_vm3 = vcmask 523264  }
 0x237   :  { %v332_v57 = vmul.f32 %v3707_v40, %v331_v53  ;;  %v348_v58 = vadd.f32 %v3705_v52, %v347_v54  ;;  %v317_v59 = vmul.f32 %v3709_v43, %v316_v55 }
 0x239   :  { %v352_v13 = vsel %vm4539_vm14, %v3705_v52, %v348_v58  ;;  %v318_v16 = vadd.f32 %v3709_v43, %v317_v59  ;;  %vm309_vm14 = vcmp.eq.f32.partialorder %v308_v41, 8.507059e+37 }
 0x23b   :  { %v322_v26 = vsel %vm4547_vm7, %v3709_v43, %v318_v16 }
 0x247   :  { %v767_v62 = vpop.permute.xlu1 %766 }
 0x248   :  { %v775_v0 = vmul.f32 %v767_v62, %v750_v63  ;;  %v301_v62 = vsub.f32 1.0, %v300_v56  ;;  %v353_v63 = vand.u32 2147483647, %v298_v34 }
 0x24a   :  { %786 = vrot.lane.b32.xlu1 %v775_v0, %s3992_s29  ;;  %v333_v0 = vadd.f32 %v3707_v40, %v332_v57  ;;  %vm354_vm6 = vcmp.eq.f32.partialorder %v353_v63, 8.507059e+37  ;;  %v302_v46 = vmul.f32 %v4535_v50, %v301_v62  ;;  %v4648_v62 = vld [vmem:[%s5685_s6 + $0x80] sm:$0xff] }
 0x24c   :  { %v337_v42 = vsel %vm336_vm4, %v3707_v40, %v333_v0  ;;  %vm1244_vm4 = vcmask 785408  }
 0x24e   :  { %v374_v49 = vpop.permute.xlu2 %373 }
 0x24f   :  { %v761_v23 = vpop.permute.xlu1 %760 }
 0x250   :  { %v772_v25 = vmul.f32 %v761_v23, %v705_v22  ;;  %v338_v22 = vand.u32 2147483647, %v297_v37  ;;  %v356_v23 = vor.u32 1.1754944e-38, %v355_v60  ;;  %v303_v37 = vadd.f32 %v4535_v50, %v302_v46 }
 0x252   :  { %367 = vrot.lane.b32.xlu1 %v3695_v27, %s5668_s5  ;;  %780 = vrot.lane.b32.xlu0 %v772_v25, %s3992_s29  ;;  %v325_v25 = vand.u32 2147483648, %v296_v38  ;;  %v323_v27 = vand.u32 2147483647, %v296_v38  ;;  %v357_v24 = vsel %vm354_vm6, %v356_v23, %v352_v13  ;;  %vm339_vm8 = vcmp.eq.f32.partialorder %v338_v22, 8.507059e+37  ;;  %v4658_v13 = vld [vmem:[%s5685_s6 + $0x88] sm:$0xff]  ;;  %s3997_s5 = smov 124  }
 0x253   :  { %v382_v30 = vmul.f32 %v374_v49, %v357_v24  ;;  %v342_v32 = vsel %vm339_vm8, %v341_v29, %v337_v42  ;;  %v307_v44 = vsel %vm306_vm13, %v4535_v50, %v303_v37 }
 0x254   :  { %v326_v31 = vor.u32 1.1754944e-38, %v325_v25  ;;  %vm324_vm11 = vcmp.eq.f32.partialorder %v323_v27, 8.507059e+37  ;;  %v312_v51 = vsel %vm309_vm14, %v311_v45, %v307_v44  ;;  %v4668_v25 = vld [vmem:[%s5685_s6 + $0x90] sm:$0xff]  ;;  %v4675_v27 = vld [vmem:[%s5685_s6 + $0x98] sm:$0xff] }
 0x256   :  { %v370_v2 = vpop.permute.xlu2 %369  ;;  %v327_v39 = vsel %vm324_vm11, %v326_v31, %v322_v26 }
 0x257   :  { %v380_v52 = vmul.f32 %v370_v2, %v327_v39 }
 0x25e   :  { %v372_v61 = vpop.permute.xlu0 %371 }
 0x25f   :  { %v381_v34 = vmul.f32 %v372_v61, %v342_v32 }
 0x28d   :  { %v783_v38 = vpop.permute.xlu2 %782 }
 0x28e   :  { %v794_v43 = vsel %vm792_vm9, %v380_v52, %v783_v38 }
 0x295   :  { %v785_v35 = vpop.permute.xlu0 %784 }
 0x296   :  { %v4562_v40 = vsel %vm792_vm9, %v381_v34, %v785_v35 }
 0x2bc   :  { %v787_v33 = vpop.permute.xlu1 %786 }
 0x2bd   :  { %v4555_v36 = vsel %vm792_vm9, %v382_v30, %v787_v33 }
 0x2be   :  { %816 = vmatpush.msra.mxu2 %v4555_v36  ;;  %845 = vmatpush.msrb.mxu0 %v4555_v36 }
 0x2bf   :  { %1073 = vmatpush.msrb.mxu3 %v4555_v36  ;;  %888 = vrot.lane.b32.xlu2 %v4555_v36, %s3993_s8 }
 0x2c0   :  { %817 = vmatpush.msra.mxu2 %v4562_v40  ;;  %846 = vmatpush.msrb.mxu0 %v4562_v40 }
 0x2c1   :  { %1074 = vmatpush.msrb.mxu3 %v4562_v40 }
 0x2c2   :  { %818 = vmatpush.msra.mxu2 %v794_v43  ;;  %847 = vmatpush.msrb.mxu0 %v794_v43 }
 0x2c3   :  { %1075 = vmatpush.msrb.mxu3 %v794_v43 }
 0x2c4   :  { %v368_v47 = vpop.permute.xlu1 %367  ;;  %v781_v53 = vpop.permute.xlu0 %780 }
 0x2c5   :  { %v379_v49 = vmul.f32 %v368_v47, %v312_v51 }
 0x2c7   :  { %v793_v54 = vsel %vm792_vm9, %v379_v49, %v781_v53 }
 0x2c8   :  { %819 = vmatpush.msra.mxu2 %v793_v54  ;;  %848 = vmatpush.msrb.mxu0 %v793_v54 }
 0x2c9   :  { %1076 = vmatpush.msrb.mxu3 %v793_v54  ;;  %3457 = vmatmul.msk.f32.vlgmr.msra.gmra.mxu2 %vm105_vm0, %v4172_v4 }
 0x2ca   :  { %3461 = vmatmul.msk.f32.vlgmr.msrb.gmra.mxu0 %vm105_vm0, %v4209_v7  ;;  %1102 = vmatpush.msrb.mxu2 %v4555_v36 }
 0x2cb   :  { %1131 = vmatpush.msra.mxu0 %v4555_v36 }
 0x2cc   :  { %1103 = vmatpush.msrb.mxu2 %v4562_v40 }
 0x2cd   :  { %1132 = vmatpush.msra.mxu0 %v4562_v40 }
 0x2ce   :  { %1104 = vmatpush.msrb.mxu2 %v794_v43 }
 0x2cf   :  { %1133 = vmatpush.msra.mxu0 %v794_v43 }
 0x2d0   :  { %1105 = vmatpush.msrb.mxu2 %v793_v54 }
 0x2d1   :  { %1134 = vmatpush.msra.mxu0 %v793_v54  ;;  %3458 = vmatmul.msk.f32.gmra.mxu2 %vm105_vm0, %v4189_v6 }
 0x2d2   :  { %3462 = vmatmul.msk.f32.gmra.mxu0 %vm105_vm0, %v4180_v5 }
 0x2d9   :  { %3459 = vmatmul.msk.f32.gmra.mxu2 %vm105_vm0, %v4223_v9 }
 0x2da   :  { %3463 = vmatmul.msk.f32.gmra.mxu0 %vm105_vm0, %v4214_v8 }
 0x2e1   :  { %3460 = vmatmul.msk.f32.gmra.mxu2 %vm105_vm0, %v4253_v12 }
 0x2e2   :  { %3464 = vmatmul.msk.f32.gmra.mxu0 %vm105_vm0, %v4238_v10 }
 0x2e9   :  { %3477 = vmatmul.msk.f32.vlgmr.msrb.gmra.mxu2 %vm105_vm0, %v4243_v11 }
 0x2ea   :  { %3481 = vmatmul.msk.f32.vlgmr.msra.gmra.mxu0 %vm105_vm0, %v4269_v15 }
 0x2f1   :  { %3478 = vmatmul.msk.f32.gmra.mxu2 %vm105_vm0, %v4264_v14 }
 0x2f2   :  { %3482 = vmatmul.msk.f32.gmra.mxu0 %vm105_vm0, %v4287_v18 }
 0x2f9   :  { %3479 = vmatmul.msk.f32.gmra.mxu2 %vm105_vm0, %v4282_v17 }
 0x2fa   :  { %3483 = vmatmul.msk.f32.gmra.mxu0 %vm105_vm0, %v4296_v19 }
 0x301   :  { %3480 = vmatmul.msk.f32.gmra.mxu2 %vm105_vm0, %v4301_v20 }
 0x302   :  { %3484 = vmatmul.msk.f32.gmra.mxu0 %vm105_vm0, %v4310_v21 }
 0x319   :  { %v889_v55 = vpop.permute.xlu2 %888 }
 0x347   :  { %v850_v4 = vpop.f32.mrf.mxu0 }
 0x348   :  { %866 = vrot.lane.b32.xlu0 %v850_v4, %s3994_s2 }
 0x34c   :  { %v821_v5 = vpop.f32.mrf.mxu2 }
 0x34f   :  { %v853_v6 = vpop.f32.mrf.mxu0 }
 0x350   :  { %884 = vrot.lane.b32.xlu0 %v794_v43, %s3993_s8  ;;  %868 = vrot.lane.b32.xlu2 %v853_v6, %s3994_s2 }
 0x354   :  { %v824_v7 = vpop.f32.mrf.mxu2 }
 0x357   :  { %v856_v8 = vpop.f32.mrf.mxu0 }
 0x358   :  { %1196 = vrot.lane.b32.xlu0 %v850_v4, %s3995_s4  ;;  %886 = vrot.lane.b32.xlu2 %v4562_v40, %s3993_s8 }
 0x35c   :  { %v827_v9 = vpop.f32.mrf.mxu2 }
 0x35f   :  { %v859_v10 = vpop.f32.mrf.mxu0 }
 0x360   :  { %1210 = vrot.lane.b32.xlu0 %v794_v43, %s3987_s1  ;;  %872 = vrot.lane.b32.xlu1 %v859_v10, %s3994_s2 }
 0x361   :  { %1184 = vrot.lane.b32.xlu2 %v821_v5, %s3996_s9 }
 0x364   :  { %v830_v11 = vpop.f32.mrf.mxu2 }
 0x367   :  { %v1136_v12 = vpop.f32.mrf.mxu0 }
 0x368   :  { %882 = vrot.lane.b32.xlu1 %v793_v54, %s3993_s8 }
 0x369   :  { %1198 = vrot.lane.b32.xlu2 %v853_v6, %s3995_s4 }
 0x36c   :  { %v1107_v14 = vpop.f32.mrf.mxu2 }
 0x36d   :  { %1152 = vrot.lane.b32.xlu0 %v1107_v14, %s3994_s2 }
 0x36f   :  { %v1139_v15 = vpop.f32.mrf.mxu0 }
 0x370   :  { %870 = vrot.lane.b32.xlu1 %v856_v8, %s3994_s2 }
 0x374   :  { %v1110_v17 = vpop.f32.mrf.mxu2 }
 0x375   :  { %1170 = vrot.lane.b32.xlu0 %v1139_v15, %s3993_s8  ;;  %1154 = vrot.lane.b32.xlu2 %v1110_v17, %s3994_s2 }
 0x377   :  { %v1142_v18 = vpop.f32.mrf.mxu0 }
 0x378   :  { %1208 = vrot.lane.b32.xlu1 %v793_v54, %s3987_s1 }
 0x37c   :  { %v1113_v19 = vpop.f32.mrf.mxu2 }
 0x37d   :  { %1188 = vrot.lane.b32.xlu0 %v827_v9, %s3996_s9  ;;  %1172 = vrot.lane.b32.xlu2 %v1142_v18, %s3993_s8 }
 0x37f   :  { %v1145_v21 = vpop.f32.mrf.mxu0 }
 0x380   :  { %1186 = vrot.lane.b32.xlu1 %v824_v7, %s3996_s9 }
 0x384   :  { %v1116_v20 = vpop.f32.mrf.mxu2 }
 0x385   :  { %1212 = vrot.lane.b32.xlu2 %v4562_v40, %s3987_s1  ;;  %1158 = vrot.lane.b32.xlu0 %v1116_v20, %s3994_s2 }
 0x388   :  { %1168 = vrot.lane.b32.xlu1 %v1136_v12, %s3993_s8 }
 0x38d   :  { %1202 = vrot.lane.b32.xlu0 %v859_v10, %s3995_s4  ;;  %1190 = vrot.lane.b32.xlu2 %v830_v11, %s3996_s9 }
 0x390   :  { %1200 = vrot.lane.b32.xlu1 %v856_v8, %s3995_s4  ;;  %s5700_s4 = smov 120  }
 0x398   :  { %1156 = vrot.lane.b32.xlu1 %v1113_v19, %s3994_s2 }
 0x3a0   :  { %1174 = vrot.lane.b32.xlu1 %v1145_v21, %s3993_s8 }
 0x3a8   :  { %1214 = vrot.lane.b32.xlu1 %v4555_v36, %s3987_s1  ;;  %s5695_s1 = sld [smem:[#allocation16_spill]] }
 0x3aa   :  { %v869_v63 = vpop.permute.xlu2 %868 }
 0x3ab   :  { %v896_v1 = vsel %vm894_vm15, %v824_v7, %v869_v63 }
 0x3ae   :  { %v1059_v42 = vld [vmem:[%s5695_s1 + $0x58] sm:$0xff]  ;;  %v1058_v46 = vld [vmem:[%s5695_s1 + $0x50] sm:$0xff]  ;;  %v1057_v24 = vld [vmem:[%s5695_s1 + $0x48] sm:$0xff] }
 0x3af   :  { %1261 = vmatpush.msrb.mxu1 %v1059_v42  ;;  %v1056_v28 = vld [vmem:[%s5695_s1 + $0x40] sm:$0xff]  ;;  %v1055_v29 = vld [vmem:[%s5695_s1 + $0x38] sm:$0xff]  ;;  %v1054_v30 = vld [vmem:[%s5695_s1 + $0x30] sm:$0xff] }
 0x3b0   :  { %v1053_v26 = vld [vmem:[%s5695_s1 + $0x28] sm:$0xff]  ;;  %v1052_v31 = vld [vmem:[%s5695_s1 + $0x20] sm:$0xff]  ;;  %v1051_v32 = vld [vmem:[%s5695_s1 + $0x18] sm:$0xff] }
 0x3b1   :  { %1262 = vmatpush.msrb.mxu1 %v1058_v46  ;;  %v1050_v34 = vld [vmem:[%s5695_s1 + $0x10] sm:$0xff]  ;;  %v1049_v36 = vld [vmem:[%s5695_s1 + $0x8] sm:$0xff]  ;;  %v1048_v37 = vld [vmem:[%s5695_s1] sm:$0xff] }
 0x3b2   :  { %v887_v22 = vpop.permute.xlu2 %886  ;;  %v3655_v46 = vld [vmem:[%s5645_s12] ss:$0 sm:$0xff]  ;;  %s3998_s12 = smov 4  }
 0x3b3   :  { %1263 = vmatpush.msrb.mxu1 %v1057_v24 }
 0x3b5   :  { %1264 = vmatpush.msrb.mxu1 %v1056_v28 }
 0x3b7   :  { %1265 = vmatpush.msrb.mxu1 %v1055_v29  ;;  %v4747_v29 = vld [vmem:[%s5696_s3] ss:$0 sm:$0xff]  ;;  %s3393_s3 = sshll.u32 %s4001_s30, 4  ;;  %s3394_s3 = int_to_ptr.vmem [resolvable:$true] %s3393_s3 }
 0x3b9   :  { %1266 = vmatpush.msrb.mxu1 %v1054_v30 }
 0x3ba   :  { %v867_v58 = vpop.permute.xlu0 %866 }
 0x3bb   :  { %v895_v59 = vsel %vm894_vm15, %v821_v5, %v867_v58  ;;  %1267 = vmatpush.msrb.mxu1 %v1053_v26  ;;  %v1185_v38 = vpop.permute.xlu2 %1184 }
 0x3bd   :  { %1268 = vmatpush.msrb.mxu1 %v1052_v31 }
 0x3bf   :  { %1269 = vmatpush.msrb.mxu1 %v1051_v32 }
 0x3c1   :  { %1270 = vmatpush.msrb.mxu1 %v1050_v34 }
 0x3c2   :  { %v885_v0 = vpop.permute.xlu0 %884 }
 0x3c3   :  { %v900_v2 = vsel %vm105_vm0, %v896_v1, %v885_v0  ;;  %1271 = vmatpush.msrb.mxu1 %v1049_v36  ;;  %v1199_v41 = vpop.permute.xlu2 %1198 }
 0x3c5   :  { %1272 = vmatpush.msrb.mxu1 %v1048_v37 }
 0x3ca   :  { %v1197_v33 = vpop.permute.xlu0 %1196 }
 0x3cf   :  { %v1155_v44 = vpop.permute.xlu2 %1154 }
 0x3d2   :  { %v873_v50 = vpop.permute.xlu1 %872  ;;  %v1211_v48 = vpop.permute.xlu0 %1210 }
 0x3d3   :  { %v898_v56 = vsel %vm894_vm15, %v830_v11, %v873_v50 }
 0x3d4   :  { %v902_v57 = vsel %vm105_vm0, %v898_v56, %v889_v55 }
 0x3d5   :  { %3468 = vmatmul.msk.f32.vlgmr.msra.gmra.mxu3 %vm906_vm1, %v902_v57 }
 0x3d7   :  { %v1173_v6 = vpop.permute.xlu2 %1172 }
 0x3da   :  { %v883_v60 = vpop.permute.xlu1 %882 }
 0x3db   :  { %v899_v61 = vsel %vm105_vm0, %v895_v59, %v883_v60 }
 0x3dc   :  { %3465 = vmatmul.msk.f32.vlgmr.msra.gmra.mxu1 %vm906_vm1, %v899_v61 }
 0x3dd   :  { %3473 = vmatmul.msk.f32.vlgmr.msrb.gmra.mxu3 %vm105_vm0, %v4648_v62 }
 0x3df   :  { %v1153_v52 = vpop.permute.xlu0 %1152  ;;  %v1213_v20 = vpop.permute.xlu2 %1212 }
 0x3e2   :  { %v871_v3 = vpop.permute.xlu1 %870 }
 0x3e3   :  { %v897_v16 = vsel %vm894_vm15, %v827_v9, %v871_v3 }
 0x3e4   :  { %3466 = vmatmul.msk.f32.gmra.mxu1 %vm906_vm1, %v900_v2  ;;  %v901_v23 = vsel %vm105_vm0, %v897_v16, %v887_v22 }
 0x3e5   :  { %3474 = vmatmul.msk.f32.gmra.mxu3 %vm105_vm0, %v4658_v13 }
 0x3e7   :  { %v1171_v45 = vpop.permute.xlu0 %1170  ;;  %v1191_v60 = vpop.permute.xlu2 %1190 }
 0x3ea   :  { %v1209_v35 = vpop.permute.xlu1 %1208 }
 0x3ec   :  { %3467 = vmatmul.msk.f32.gmra.mxu1 %vm906_vm1, %v901_v23 }
 0x3ed   :  { %3475 = vmatmul.msk.f32.gmra.mxu3 %vm105_vm0, %v4668_v25 }
 0x3ef   :  { %v1189_v7 = vpop.permute.xlu0 %1188 }
 0x3f2   :  { %v1187_v39 = vpop.permute.xlu1 %1186 }
 0x3f5   :  { %3476 = vmatmul.msk.f32.gmra.mxu3 %vm105_vm0, %v4675_v27 }
 0x3f7   :  { %v1159_v18 = vpop.permute.xlu0 %1158 }
 0x3fa   :  { %v1169_v40 = vpop.permute.xlu1 %1168 }
 0x3ff   :  { %v1203_v63 = vpop.permute.xlu0 %1202 }
 0x402   :  { %v1201_v47 = vpop.permute.xlu1 %1200 }
 0x40a   :  { %v1157_v8 = vpop.permute.xlu1 %1156 }
 0x412   :  { %v1175_v21 = vpop.permute.xlu1 %1174 }
 0x41a   :  { %v1215_v1 = vpop.permute.xlu1 %1214 }
 0x458   :  { %v945_v43 = vpop.f32.mrf.mxu3 }
 0x459   :  { %v4739_v16 = vpop.f32.mrf.mxu1 }
 0x460   :  { %v1078_v51 = vpop.f32.mrf.mxu3 }
 0x461   :  { %v1220_v49 = vsel %vm894_vm15, %v1078_v51, %v1153_v52  ;;  %v939_v22 = vpop.f32.mrf.mxu1 }
 0x462   :  { %v1224_v53 = vsel %vm105_vm0, %v1220_v49, %v1169_v40 }
 0x463   :  { %v1228_v54 = vsel %vm906_vm1, %v1224_v53, %v1185_v38 }
 0x464   :  { %v1233_v4 = vsel %vm1232_vm3, %v1228_v54, %v1197_v33 }
 0x465   :  { %v1237_v5 = vsel %vm621_vm5, %v1233_v4, %v1209_v35  ;;  %v4755_v35 = vadd.f32 %v4747_v29, %v945_v43 }
 0x466   :  { %3485 = vmatmul.msk.f32.vlgmr.msrb.gmra.mxu1 %vm1244_vm4, %v1237_v5 }
 0x468   :  { %v1081_v9 = vpop.f32.mrf.mxu3 }
 0x469   :  { %v1221_v10 = vsel %vm894_vm15, %v1081_v9, %v1155_v44  ;;  %v942_v23 = vpop.f32.mrf.mxu1 }
 0x46a   :  { %v1225_v11 = vsel %vm105_vm0, %v1221_v10, %v1171_v45  ;;  %v4750_v30 = vadd.f32 %v4747_v29, %v942_v23 }
 0x46b   :  { %v1229_v12 = vsel %vm906_vm1, %v1225_v11, %v1187_v39  ;;  %v4761_v39 = vadd.f32 %v4747_v29, %v939_v22 }
 0x46c   :  { %v1234_v14 = vsel %vm1232_vm3, %v1229_v12, %v1199_v41 }
 0x46d   :  { %v1238_v15 = vsel %vm621_vm5, %v1234_v14, %v1211_v48 }
 0x46e   :  { %3486 = vmatmul.msk.f32.gmra.mxu1 %vm1244_vm4, %v1238_v15 }
 0x470   :  { %v1084_v17 = vpop.f32.mrf.mxu3 }
 0x471   :  { %v1222_v19 = vsel %vm894_vm15, %v1084_v17, %v1157_v8 }
 0x472   :  { %v1226_v50 = vsel %vm105_vm0, %v1222_v19, %v1173_v6 }
 0x473   :  { %v1230_v55 = vsel %vm906_vm1, %v1226_v50, %v1189_v7 }
 0x474   :  { %v1235_v56 = vsel %vm1232_vm3, %v1230_v55, %v1201_v47 }
 0x475   :  { %v1239_v57 = vsel %vm621_vm5, %v1235_v56, %v1213_v20 }
 0x476   :  { %3487 = vmatmul.msk.f32.gmra.mxu1 %vm1244_vm4, %v1239_v57  ;;  %v4773_v57 = vadd.f32 %v4747_v29, %v4739_v16 }
 0x478   :  { %v1087_v58 = vpop.f32.mrf.mxu3 }
 0x479   :  { %v1223_v59 = vsel %vm894_vm15, %v1087_v58, %v1159_v18 }
 0x47a   :  { %v1227_v61 = vsel %vm105_vm0, %v1223_v59, %v1175_v21 }
 0x47b   :  { %v1231_v0 = vsel %vm906_vm1, %v1227_v61, %v1191_v60 }
 0x47c   :  { %v1236_v2 = vsel %vm1232_vm3, %v1231_v0, %v1203_v63 }
 0x47d   :  { %v1240_v3 = vsel %vm621_vm5, %v1236_v2, %v1215_v1 }
 0x47e   :  { %3488 = vmatmul.msk.f32.gmra.mxu1 %vm1244_vm4, %v1240_v3 }
 0x4e3   :  { %v1274_v42 = vpop.f32.mrf.mxu1 }
 0x4e4   :  { %v1275_v38 = vadd.f32 %v3655_v46, %v1274_v42 }
 0x4e6   :  { %v3489_v4 = vmul.f32 -1.442695, %v1275_v38 }
 0x4eb   :  { %v1277_v24 = vpop.f32.mrf.mxu1 }
 0x4ec   :  { %v1278_v28 = vadd.f32 %v3655_v46, %v1277_v24 }
 0x4ee   :  { %3712 = vtanh.f32 %v1278_v28  ;;  %v3490_v44 = vmul.f32 -1.442695, %v1278_v28 }
 0x4ef   :  { %3714 = vtanh.f32 %v4750_v30 }
 0x4f3   :  { %v1280_v26 = vpop.f32.mrf.mxu1 }
 0x4f4   :  { %v3713_v31 = vpop.eup %3712  ;;  %v1281_v32 = vadd.f32 %v3655_v46, %v1280_v26 }
 0x4f5   :  { %1372 = vrot.lane.b32.xlu1 %v3713_v31, %s3997_s5  ;;  %v3715_v33 = vpop.eup %3714 }
 0x4f6   :  { %3716 = vtanh.f32 %v1281_v32  ;;  %v3491_v51 = vmul.f32 -1.442695, %v1281_v32 }
 0x4f7   :  { %3718 = vtanh.f32 %v4755_v35 }
 0x4fb   :  { %v1283_v34 = vpop.f32.mrf.mxu1 }
 0x4fc   :  { %v3717_v36 = vpop.eup %3716  ;;  %v1284_v37 = vadd.f32 %v3655_v46, %v1283_v34 }
 0x4fd   :  { %1036 = vrot.lane.b32.xlu1 %v3715_v33, %s3997_s5  ;;  %1374 = vrot.lane.b32.xlu0 %v3717_v36, %s3997_s5  ;;  %v3719_v48 = vpop.eup %3718 }
 0x4fe   :  { %3720 = vtanh.f32 %v1284_v37  ;;  %v3492_v43 = vmul.f32 -1.442695, %v1284_v37 }
 0x4ff   :  { %3722 = vtanh.f32 %v4761_v39 }
 0x500   :  { %3724 = vtanh.f32 %v1275_v38 }
 0x501   :  { %3726 = vpow2.f32 %v3492_v43 }
 0x502   :  { %3728 = vpow2.f32 %v3490_v44 }
 0x504   :  { %v3721_v52 = vpop.eup %3720 }
 0x505   :  { %1376 = vrot.lane.b32.xlu2 %v3721_v52, %s3997_s5  ;;  %1038 = vrot.lane.b32.xlu0 %v3719_v48, %s3997_s5  ;;  %v3723_v40 = vpop.eup %3722 }
 0x506   :  { %v3725_v41 = vpop.eup %3724 }
 0x507   :  { %v3727_v45 = vpop.eup %3726 }
 0x508   :  { %v1301_v47 = vadd.f32 1.0, %v3727_v45  ;;  %v3729_v49 = vpop.eup %3728 }
 0x509   :  { %v1299_v53 = vadd.f32 1.0, %v3729_v49  ;;  %v3472_v49 = vmul.f32 -1.442695, %v4755_v35 }
 0x50a   :  { %3730 = vrcp.f32 %v1301_v47  ;;  %v1358_v19 = vand.u32 2147483648, %v1301_v47  ;;  %vm1352_vm6 = vweird.f32 %v1301_v47  ;;  %v1356_v20 = vand.u32 2147483647, %v1301_v47 }
 0x50b   :  { %3732 = vpow2.f32 %v3491_v51  ;;  %v1328_v1 = vand.u32 2147483648, %v1299_v53  ;;  %vm1322_vm11 = vweird.f32 %v1299_v53  ;;  %v1326_v2 = vand.u32 2147483647, %v1299_v53 }
 0x50c   :  { %3734 = vrcp.f32 %v1299_v53  ;;  %v1359_v56 = vor.u32 1.1754944e-38, %v1358_v19  ;;  %vm1357_vm8 = vcmp.eq.f32.partialorder %v1356_v20, 8.507059e+37 }
 0x50d   :  { %1370 = vrot.lane.b32.xlu2 %v3725_v41, %s3997_s5  ;;  %1034 = vrot.lane.b32.xlu0 %v3723_v40, %s3997_s5  ;;  %3736 = vpow2.f32 %v3489_v4  ;;  %v1329_v23 = vor.u32 1.1754944e-38, %v1328_v1  ;;  %vm1327_vm13 = vcmp.eq.f32.partialorder %v1326_v2, 8.507059e+37 }
 0x510   :  { %v3731_v54 = vpop.eup %3730 }
 0x511   :  { %v3733_v5 = vpop.eup %3732  ;;  %v1348_v6 = vmul.f32 %v3731_v54, %v1301_v47  ;;  %vm1353_vm5 = vweird.f32 %v3731_v54 }
 0x512   :  { %v1300_v7 = vadd.f32 1.0, %v3733_v5  ;;  %v3735_v9 = vpop.eup %3734  ;;  %vm1354_vm7 = vmor %vm1352_vm6, %vm1353_vm5 }
 0x513   :  { %v1349_v8 = vsub.f32 1.0, %v1348_v6  ;;  %v3737_v10 = vpop.eup %3736  ;;  %v1318_v12 = vmul.f32 %v3735_v9, %v1299_v53  ;;  %vm1323_vm10 = vweird.f32 %v3735_v9 }
 0x514   :  { %3738 = vrcp.f32 %v1300_v7  ;;  %v4768_v14 = vadd.f32 1.0, %v3737_v10  ;;  %vm1324_vm12 = vmor %vm1322_vm11, %vm1323_vm10  ;;  %v1343_v31 = vand.u32 2147483648, %v1300_v7  ;;  %vm1337_vm3 = vweird.f32 %v1300_v7 }
 0x515   :  { %v1350_v11 = vmul.f32 %v3731_v54, %v1349_v8  ;;  %v1319_v17 = vsub.f32 1.0, %v1318_v12  ;;  %v1341_v32 = vand.u32 2147483647, %v1300_v7 }
 0x516   :  { %3740 = vrcp.f32 %v4768_v14  ;;  %v1344_v36 = vor.u32 1.1754944e-38, %v1343_v31  ;;  %v1313_v40 = vand.u32 2147483648, %v4768_v14  ;;  %v1311_v41 = vand.u32 2147483647, %v4768_v14 }
 0x517   :  { %v1351_v15 = vadd.f32 %v3731_v54, %v1350_v11  ;;  %v1320_v50 = vmul.f32 %v3735_v9, %v1319_v17  ;;  %3742 = vtanh.f32 %v4773_v57  ;;  %vm1342_vm5 = vcmp.eq.f32.partialorder %v1341_v32, 8.507059e+37 }
 0x518   :  { %v1314_v44 = vor.u32 1.1754944e-38, %v1313_v40  ;;  %vm1312_vm10 = vcmp.eq.f32.partialorder %v1311_v41, 8.507059e+37  ;;  %3744 = vpow2.f32 %v3472_v49  ;;  %v3471_v11 = vmul.f32 -1.442695, %v4750_v30 }
 0x519   :  { %v1355_v21 = vsel %vm1354_vm7, %v3731_v54, %v1351_v15  ;;  %v1321_v61 = vadd.f32 %v3735_v9, %v1320_v50  ;;  %vm1307_vm7 = vweird.f32 %v4768_v14 }
 0x51a   :  { %v3739_v18 = vpop.eup %3738  ;;  %v1360_v59 = vsel %vm1357_vm8, %v1359_v56, %v1355_v21  ;;  %v3469_v21 = vmul.f32 -1.442695, %v4773_v57 }
 0x51b   :  { %v1333_v55 = vmul.f32 %v3739_v18, %v1300_v7  ;;  %v1325_v3 = vsel %vm1324_vm12, %v3735_v9, %v1321_v61  ;;  %vm1338_vm14 = vweird.f32 %v3739_v18  ;;  %v3470_v7 = vmul.f32 -1.442695, %v4761_v39 }
 0x51c   :  { %v3741_v0 = vpop.eup %3740  ;;  %v1330_v46 = vsel %vm1327_vm13, %v1329_v23, %v1325_v3  ;;  %vm1339_vm4 = vmor %vm1337_vm3, %vm1338_vm14  ;;  %vm1402_vm3 = vcmask 31744  }
 0x51d   :  { %v1334_v63 = vsub.f32 1.0, %v1333_v55  ;;  %v1303_v16 = vmul.f32 %v3741_v0, %v4768_v14  ;;  %v3743_v26 = vpop.eup %3742  ;;  %vm1308_vm6 = vweird.f32 %v3741_v0 }
 0x51e   :  { %vm1309_vm8 = vmor %vm1307_vm7, %vm1308_vm6  ;;  %v3745_v53 = vpop.eup %3744 }
 0x51f   :  { %v1335_v22 = vmul.f32 %v3739_v18, %v1334_v63  ;;  %v1304_v28 = vsub.f32 1.0, %v1303_v16  ;;  %v963_v54 = vadd.f32 1.0, %v3745_v53 }
 0x521   :  { %v1336_v29 = vadd.f32 %v3739_v18, %v1335_v22  ;;  %v1305_v33 = vmul.f32 %v3741_v0, %v1304_v28  ;;  %3746 = vrcp.f32 %v963_v54  ;;  %v1020_v10 = vand.u32 2147483648, %v963_v54 }
 0x522   :  { %3748 = vpow2.f32 %v3470_v7  ;;  %vm1014_vm12 = vweird.f32 %v963_v54  ;;  %v1018_v12 = vand.u32 2147483647, %v963_v54 }
 0x523   :  { %v1340_v34 = vsel %vm1339_vm4, %v3739_v18, %v1336_v29  ;;  %v1306_v48 = vadd.f32 %v3741_v0, %v1305_v33  ;;  %v1021_v17 = vor.u32 1.1754944e-38, %v1020_v10  ;;  %3750 = vpow2.f32 %v3471_v11  ;;  %v3937_v10 = vld [vmem:[%s5685_s6] sm:$0xff]  ;;  %v3938_v11 = vld [vmem:[%s5685_s6 + $0x28] sm:$0xff] }
 0x524   :  { %v1345_v38 = vsel %vm1342_vm5, %v1344_v36, %v1340_v34  ;;  %vm1019_vm14 = vcmp.eq.f32.partialorder %v1018_v12, 8.507059e+37  ;;  %v3940_v12 = vld [vmem:[%s5685_s6 + $0x30] sm:$0xff] }
 0x525   :  { %v1310_v43 = vsel %vm1309_vm8, %v3741_v0, %v1306_v48 }
 0x526   :  { %v1315_v47 = vsel %vm1312_vm10, %v1314_v44, %v1310_v43 }
 0x527   :  { %v3747_v4 = vpop.eup %3746 }
 0x528   :  { %v1010_v5 = vmul.f32 %v3747_v4, %v963_v54  ;;  %vm1015_vm11 = vweird.f32 %v3747_v4  ;;  %v3749_v35 = vpop.eup %3748 }
 0x529   :  { %vm1016_vm13 = vmor %vm1014_vm12, %vm1015_vm11  ;;  %v961_v18 = vadd.f32 1.0, %v3749_v35  ;;  %v3751_v30 = vpop.eup %3750  ;;  %v3941_v35 = vld [vmem:[%s5685_s6 + $0x10] sm:$0xff] }
 0x52a   :  { %v1011_v6 = vsub.f32 1.0, %v1010_v5  ;;  %v962_v55 = vadd.f32 1.0, %v3751_v30 }
 0x52b   :  { %3752 = vrcp.f32 %v961_v18  ;;  %v990_v16 = vand.u32 2147483648, %v961_v18  ;;  %vm984_vm5 = vweird.f32 %v961_v18  ;;  %v988_v23 = vand.u32 2147483647, %v961_v18 }
 0x52c   :  { %v1012_v8 = vmul.f32 %v3747_v4, %v1011_v6  ;;  %3754 = vpow2.f32 %v3469_v21  ;;  %v1005_v33 = vand.u32 2147483648, %v962_v55  ;;  %vm999_vm10 = vweird.f32 %v962_v55 }
 0x52d   :  { %3756 = vrcp.f32 %v962_v55  ;;  %v991_v28 = vor.u32 1.1754944e-38, %v990_v16  ;;  %vm989_vm7 = vcmp.eq.f32.partialorder %v988_v23, 8.507059e+37 }
 0x52e   :  { %v1013_v9 = vadd.f32 %v3747_v4, %v1012_v8  ;;  %v1006_v40 = vor.u32 1.1754944e-38, %v1005_v33 }
 0x530   :  { %v1017_v14 = vsel %vm1016_vm13, %v3747_v4, %v1013_v9  ;;  %v3936_v9 = vld [vmem:[%s5685_s6 + $0x20] sm:$0xff] }
 0x531   :  { %v1022_v19 = vsel %vm1019_vm14, %v1021_v17, %v1017_v14  ;;  %v3753_v56 = vpop.eup %3752  ;;  %v3942_v14 = vld [vmem:[%s5685_s6 + $0x38] sm:$0xff]  ;;  %v3946_v17 = vld [vmem:[%s5685_s6 + $0x68] sm:$0xff] }
 0x532   :  { %vm985_vm4 = vweird.f32 %v3753_v56 }
 0x533   :  { %vm986_vm6 = vmor %vm984_vm5, %vm985_vm4 }
 0x55f   :  { %v1377_v58 = vpop.permute.xlu2 %1376 }
 0x560   :  { %v1385_v60 = vmul.f32 %v1377_v58, %v1360_v59  ;;  %v3755_v58 = vpop.eup %3754  ;;  %v980_v59 = vmul.f32 %v3753_v56, %v961_v18  ;;  %v3948_v18 = vld [vmem:[%s5685_s6 + $0x70] sm:$0xff] }
 0x561   :  { %v3757_v57 = vpop.eup %3756 }
 0x562   :  { %1396 = vrot.lane.b32.xlu2 %v1385_v60, %s3998_s12  ;;  %v960_v60 = vadd.f32 1.0, %v3755_v58  ;;  %v981_v61 = vsub.f32 1.0, %v980_v59  ;;  %v995_v63 = vmul.f32 %v3757_v57, %v962_v55  ;;  %vm1000_vm8 = vweird.f32 %v3757_v57 }
 0x563   :  { %vm1001_vm11 = vmor %vm999_vm10, %vm1000_vm8 }
 0x564   :  { %3758 = vrcp.f32 %v960_v60  ;;  %v982_v0 = vmul.f32 %v3753_v56, %v981_v61  ;;  %v996_v1 = vsub.f32 1.0, %v995_v63  ;;  %vm969_vm14 = vweird.f32 %v960_v60 }
 0x566   :  { %v983_v2 = vadd.f32 %v3753_v56, %v982_v0  ;;  %v1409_v0 = vld [vmem:[%s5646_s13 + $0x10] sm:$0xff] }
 0x567   :  { %v1373_v42 = vpop.permute.xlu1 %1372  ;;  %v1371_v45 = vpop.permute.xlu2 %1370  ;;  %1538 = vmatpush.msrb.mxu0 %v1409_v0 }
 0x568   :  { %v1383_v24 = vmul.f32 %v1373_v42, %v1330_v46  ;;  %v1382_v51 = vmul.f32 %v1371_v45, %v1315_v47  ;;  %v997_v42 = vmul.f32 %v3757_v57, %v996_v1  ;;  %v987_v46 = vsel %vm986_vm6, %v3753_v56, %v983_v2  ;;  %v1408_v1 = vld [vmem:[%s5646_s13 + $0x8] sm:$0xff] }
 0x569   :  { %v992_v29 = vsel %vm989_vm7, %v991_v28, %v987_v46  ;;  %v975_v45 = vand.u32 2147483648, %v960_v60  ;;  %1539 = vmatpush.msrb.mxu0 %v1408_v1  ;;  %v1407_v46 = vld [vmem:[%s5646_s13] sm:$0xff]  ;;  %vm1512_vm6 = vcmask 195584  }
 0x56a   :  { %1032 = vrot.lane.b32.xlu2 %v3743_v26, %s3997_s5  ;;  %1392 = vrot.lane.b32.xlu0 %v1383_v24, %s3998_s12  ;;  %v3759_v3 = vpop.eup %3758  ;;  %v998_v26 = vadd.f32 %v3757_v57, %v997_v42 }
 0x56b   :  { %v965_v24 = vmul.f32 %v3759_v3, %v960_v60  ;;  %vm970_vm13 = vweird.f32 %v3759_v3  ;;  %v976_v54 = vor.u32 1.1754944e-38, %v975_v45  ;;  %1540 = vmatpush.msrb.mxu0 %v1407_v46 }
 0x56c   :  { %v1002_v48 = vsel %vm1001_vm11, %v3757_v57, %v998_v26  ;;  %vm971_vm4 = vmor %vm969_vm14, %vm970_vm13 }
 0x56d   :  { %v966_v32 = vsub.f32 1.0, %v965_v24 }
 0x56f   :  { %v1375_v37 = vpop.permute.xlu0 %1374  ;;  %v1037_v34 = vpop.permute.xlu1 %1036 }
 0x570   :  { %v1384_v52 = vmul.f32 %v1375_v37, %v1345_v38  ;;  %v1003_v37 = vand.u32 2147483647, %v962_v55 }
 0x572   :  { %1394 = vrot.lane.b32.xlu1 %v1384_v52, %s3998_s12  ;;  %v967_v52 = vmul.f32 %v3759_v3, %v966_v32  ;;  %vm1004_vm12 = vcmp.eq.f32.partialorder %v1003_v37, 8.507059e+37  ;;  %v1657_v37 = vld [vmem:[%s5648_s15 + $0x18] sm:$0xff] }
 0x573   :  { %v1007_v41 = vsel %vm1004_vm12, %v1006_v40, %v1002_v48  ;;  %v1656_v40 = vld [vmem:[%s5648_s15 + $0x10] sm:$0xff] }
 0x574   :  { %v1046_v43 = vmul.f32 %v1037_v34, %v1007_v41  ;;  %v968_v44 = vadd.f32 %v3759_v3, %v967_v52  ;;  %v1659_v34 = vld [vmem:[%s5648_s15 + $0x28] sm:$0xff] }
 0x575   :  { %1865 = vmatpush.msra.mxu0 %v1659_v34  ;;  %v1655_v41 = vld [vmem:[%s5648_s15 + $0x8] sm:$0xff] }
 0x576   :  { %v972_v53 = vsel %vm971_vm4, %v3759_v3, %v968_v44 }
 0x577   :  { %v1039_v15 = vpop.permute.xlu0 %1038 }
 0x578   :  { %v1047_v39 = vmul.f32 %v1039_v15, %v1022_v19  ;;  %v3944_v15 = vld [vmem:[%s5685_s6 + $0x60] sm:$0xff]  ;;  %v4898_v19 = vld [vmem:[%s5685_s6 + $0x50] sm:$0xff] }
 0x57a   :  { %1390 = vrot.lane.b32.xlu1 %v1382_v51, %s3998_s12  ;;  %v973_v51 = vand.u32 2147483647, %v960_v60 }
 0x57c   :  { %vm974_vm5 = vcmp.eq.f32.partialorder %v973_v51, 8.507059e+37 }
 0x57d   :  { %v977_v5 = vsel %vm974_vm5, %v976_v54, %v972_v53 }
 0x57f   :  { %v1035_v22 = vpop.permute.xlu0 %1034 }
 0x580   :  { %v1045_v31 = vmul.f32 %v1035_v22, %v992_v29 }
 0x5bc   :  { %v1397_v20 = vpop.permute.xlu2 %1396 }
 0x5bd   :  { %v4790_v50 = vsel %vm1402_vm3, %v1047_v39, %v1397_v20  ;;  %v3950_v39 = vld [vmem:[%s5685_s6 + $0x78] sm:$0xff] }
 0x5be   :  { %1423 = vmatpush.msra.mxu3 %v4790_v50  ;;  %1452 = vmatpush.msra.mxu2 %v4790_v50  ;;  %v4909_v20 = vld [vmem:[%s5685_s6 + $0x58] sm:$0xff] }
 0x5bf   :  { %1673 = vmatpush.msra.mxu1 %v4790_v50 }
 0x5c4   :  { %v1033_v4 = vpop.permute.xlu2 %1032 }
 0x5c5   :  { %v1044_v6 = vmul.f32 %v1033_v4, %v977_v5 }
 0x5dc   :  { %v1393_v36 = vpop.permute.xlu0 %1392 }
 0x5dd   :  { %v4796_v38 = vsel %vm1402_vm3, %v1045_v31, %v1393_v36  ;;  %v1658_v36 = vld [vmem:[%s5648_s15 + $0x20] sm:$0xff] }
 0x5de   :  { %1491 = vrot.lane.b32.xlu2 %v4796_v38, %s3994_s2  ;;  %1866 = vmatpush.msra.mxu0 %v1658_v36 }
 0x5e0   :  { %1867 = vmatpush.msra.mxu0 %v1657_v37 }
 0x5e2   :  { %1868 = vmatpush.msra.mxu0 %v1656_v40 }
 0x5e4   :  { %v1395_v47 = vpop.permute.xlu1 %1394  ;;  %1869 = vmatpush.msra.mxu0 %v1655_v41 }
 0x5e5   :  { %v4801_v49 = vsel %vm1402_vm3, %v1046_v43, %v1395_v47  ;;  %v1654_v43 = vld [vmem:[%s5648_s15] sm:$0xff] }
 0x5e6   :  { %1493 = vrot.lane.b32.xlu1 %v4801_v49, %s3994_s2  ;;  %1424 = vmatpush.msra.mxu3 %v4801_v49 }
 0x5e7   :  { %1453 = vmatpush.msra.mxu2 %v4801_v49  ;;  %1674 = vmatpush.msra.mxu1 %v4801_v49 }
 0x5e8   :  { %1425 = vmatpush.msra.mxu3 %v4796_v38  ;;  %1870 = vmatpush.msra.mxu0 %v1654_v43 }
 0x5e9   :  { %1454 = vmatpush.msra.mxu2 %v4796_v38  ;;  %1675 = vmatpush.msra.mxu1 %v4796_v38 }
 0x5ec   :  { %v1391_v7 = vpop.permute.xlu1 %1390 }
 0x5ed   :  { %v4812_v8 = vsel %vm1402_vm3, %v1044_v6, %v1391_v7 }
 0x5ee   :  { %1489 = vrot.lane.b32.xlu0 %v4812_v8, %s3994_s2  ;;  %1426 = vmatpush.msra.mxu3 %v4812_v8 }
 0x5ef   :  { %1455 = vmatpush.msra.mxu2 %v4812_v8  ;;  %1676 = vmatpush.msra.mxu1 %v4812_v8 }
 0x5f0   :  { %3493 = vmatmul.msk.f32.vlgmr.msra.gmra.mxu3 %vm105_vm0, %v3936_v9  ;;  %3497 = vmatmul.msk.f32.vlgmr.msra.gmra.mxu2 %vm105_vm0, %v3937_v10 }
 0x5f1   :  { %1702 = vmatpush.msrb.mxu3 %v4790_v50  ;;  %1731 = vmatpush.msrb.mxu2 %v4790_v50 }
 0x5f2   :  { %3509 = vmatmul.msk.f32.vlgmr.msra.gmra.mxu1 %vm105_vm0, %v4648_v62  ;;  %v3939_v62 = vld [vmem:[%s5685_s6 + $0x8] sm:$0xff] }
 0x5f3   :  { %1703 = vmatpush.msrb.mxu3 %v4801_v49  ;;  %1732 = vmatpush.msrb.mxu2 %v4801_v49 }
 0x5f5   :  { %1704 = vmatpush.msrb.mxu3 %v4796_v38  ;;  %1733 = vmatpush.msrb.mxu2 %v4796_v38 }
 0x5f6   :  { %1495 = vrot.lane.b32.xlu0 %v4790_v50, %s3994_s2 }
 0x5f7   :  { %1705 = vmatpush.msrb.mxu3 %v4812_v8  ;;  %1734 = vmatpush.msrb.mxu2 %v4812_v8 }
 0x5f8   :  { %3494 = vmatmul.msk.f32.gmra.mxu3 %vm105_vm0, %v3938_v11  ;;  %3498 = vmatmul.msk.f32.gmra.mxu2 %vm105_vm0, %v3939_v62 }
 0x5fa   :  { %3510 = vmatmul.msk.f32.gmra.mxu1 %vm105_vm0, %v4658_v13  ;;  %v3943_v13 = vld [vmem:[%s5685_s6 + $0x18] sm:$0xff] }
 0x600   :  { %3495 = vmatmul.msk.f32.gmra.mxu3 %vm105_vm0, %v3940_v12  ;;  %3499 = vmatmul.msk.f32.gmra.mxu2 %vm105_vm0, %v3941_v35 }
 0x602   :  { %3511 = vmatmul.msk.f32.gmra.mxu1 %vm105_vm0, %v4668_v25  ;;  %v4876_v25 = vld [vmem:[%s5685_s6 + $0x40] sm:$0xff] }
 0x608   :  { %3496 = vmatmul.msk.f32.gmra.mxu3 %vm105_vm0, %v3942_v14  ;;  %3500 = vmatmul.msk.f32.gmra.mxu2 %vm105_vm0, %v3943_v13 }
 0x60a   :  { %3512 = vmatmul.msk.f32.gmra.mxu1 %vm105_vm0, %v4675_v27  ;;  %v4887_v27 = vld [vmem:[%s5685_s6 + $0x48] sm:$0xff] }
 0x610   :  { %3513 = vmatmul.msk.f32.vlgmr.msrb.gmra.mxu3 %vm105_vm0, %v3944_v15  ;;  %3517 = vmatmul.msk.f32.vlgmr.msrb.gmra.mxu2 %vm105_vm0, %v4876_v25 }
 0x618   :  { %3514 = vmatmul.msk.f32.gmra.mxu3 %vm105_vm0, %v3946_v17  ;;  %3518 = vmatmul.msk.f32.gmra.mxu2 %vm105_vm0, %v4887_v27 }
 0x620   :  { %3515 = vmatmul.msk.f32.gmra.mxu3 %vm105_vm0, %v3948_v18  ;;  %3519 = vmatmul.msk.f32.gmra.mxu2 %vm105_vm0, %v4898_v19 }
 0x628   :  { %3516 = vmatmul.msk.f32.gmra.mxu3 %vm105_vm0, %v3950_v39  ;;  %3520 = vmatmul.msk.f32.gmra.mxu2 %vm105_vm0, %v4909_v20 }
 0x638   :  { %v1492_v24 = vpop.permute.xlu2 %1491 }
 0x658   :  { %v1494_v32 = vpop.permute.xlu1 %1493 }
 0x660   :  { %v1490_v29 = vpop.permute.xlu0 %1489 }
 0x668   :  { %v1496_v48 = vpop.permute.xlu0 %1495 }
 0x66f   :  { %v1678_v11 = vpop.f32.mrf.mxu1 }
 0x673   :  { %v1428_v21 = vpop.f32.mrf.mxu3  ;;  %v1457_v30 = vpop.f32.mrf.mxu2 }
 0x674   :  { %1796 = vrot.lane.b32.xlu1 %v1457_v30, %s3993_s8  ;;  %1473 = vrot.lane.b32.xlu2 %v1457_v30, %s3992_s29 }
 0x675   :  { %1784 = vrot.lane.b32.xlu0 %v1428_v21, %s3999_s28 }
 0x677   :  { %v1681_v18 = vpop.f32.mrf.mxu1 }
 0x67b   :  { %v4916_v55 = vpop.f32.mrf.mxu3  ;;  %v1460_v56 = vpop.f32.mrf.mxu2 }
 0x67c   :  { %1808 = vrot.lane.b32.xlu2 %v4812_v8, %s5697_s0  ;;  %1475 = vrot.lane.b32.xlu1 %v1460_v56, %s3992_s29 }
 0x683   :  { %v4921_v58 = vpop.f32.mrf.mxu3  ;;  %v1463_v59 = vpop.f32.mrf.mxu2 }
 0x684   :  { %1810 = vrot.lane.b32.xlu1 %v4796_v38, %s5697_s0  ;;  %1477 = vrot.lane.b32.xlu0 %v1463_v59, %s3992_s29 }
 0x685   :  { %1786 = vrot.lane.b32.xlu2 %v4916_v55, %s3999_s28 }
 0x68b   :  { %v4928_v60 = vpop.f32.mrf.mxu3  ;;  %v1466_v61 = vpop.f32.mrf.mxu2 }
 0x68c   :  { %1798 = vrot.lane.b32.xlu0 %v1460_v56, %s3993_s8 }
 0x68d   :  { %1479 = vrot.lane.b32.xlu2 %v1466_v61, %s3992_s29 }
 0x693   :  { %v1707_v57 = vpop.f32.mrf.mxu3  ;;  %v1736_v63 = vpop.f32.mrf.mxu2 }
 0x694   :  { %1752 = vrot.lane.b32.xlu1 %v1707_v57, %s3992_s29 }
 0x695   :  { %1768 = vrot.lane.b32.xlu2 %v1736_v63, %s3994_s2  ;;  %v1684_v63 = vpop.f32.mrf.mxu1 }
 0x69b   :  { %v1710_v2 = vpop.f32.mrf.mxu3  ;;  %v1739_v3 = vpop.f32.mrf.mxu2 }
 0x69c   :  { %1770 = vrot.lane.b32.xlu1 %v1739_v3, %s3994_s2  ;;  %1754 = vrot.lane.b32.xlu0 %v1710_v2, %s3992_s29 }
 0x69d   :  { %1800 = vrot.lane.b32.xlu2 %v1463_v59, %s3993_s8 }
 0x6a3   :  { %v1713_v16 = vpop.f32.mrf.mxu3  ;;  %v1742_v22 = vpop.f32.mrf.mxu2 }
 0x6a4   :  { %1788 = vrot.lane.b32.xlu1 %v4921_v58, %s3999_s28  ;;  %1772 = vrot.lane.b32.xlu0 %v1742_v22, %s3994_s2 }
 0x6a5   :  { %1756 = vrot.lane.b32.xlu2 %v1713_v16, %s3992_s29 }
 0x6ab   :  { %v1716_v23 = vpop.f32.mrf.mxu3  ;;  %v1745_v42 = vpop.f32.mrf.mxu2 }
 0x6ac   :  { %1812 = vrot.lane.b32.xlu0 %v4801_v49, %s5697_s0  ;;  %1758 = vrot.lane.b32.xlu1 %v1716_v23, %s3992_s29 }
 0x6ad   :  { %1774 = vrot.lane.b32.xlu2 %v1745_v42, %s3994_s2 }
 0x6b4   :  { %1790 = vrot.lane.b32.xlu0 %v4928_v60, %s3999_s28  ;;  %1802 = vrot.lane.b32.xlu1 %v1466_v61, %s3993_s8 }
 0x6b5   :  { %1814 = vrot.lane.b32.xlu2 %v4790_v50, %s5697_s0 }
 0x6ce   :  { %v1474_v28 = vpop.permute.xlu2 %1473 }
 0x6cf   :  { %v1501_v26 = vsel %vm792_vm9, %v1428_v21, %v1474_v28  ;;  %v1687_v28 = vpop.f32.mrf.mxu1 }
 0x6d0   :  { %v1505_v31 = vsel %vm894_vm15, %v1501_v26, %v1490_v29 }
 0x6d1   :  { %3501 = vmatmul.msk.f32.vlgmr.msrb.gmra.mxu0 %vm1512_vm6, %v1505_v31 }
 0x6d6   :  { %v1809_v33 = vpop.permute.xlu2 %1808 }
 0x6df   :  { %v1787_v44 = vpop.permute.xlu2 %1786 }
 0x6e6   :  { %v1797_v52 = vpop.permute.xlu1 %1796 }
 0x6e7   :  { %v1785_v45 = vpop.permute.xlu0 %1784  ;;  %v1480_v54 = vpop.permute.xlu2 %1479 }
 0x6e8   :  { %v1504_v7 = vsel %vm792_vm9, %v4928_v60, %v1480_v54 }
 0x6e9   :  { %v1508_v62 = vsel %vm894_vm15, %v1504_v7, %v1496_v48  ;;  %v3656_v48 = vld [vmem:[%s5647_s14] ss:$0 sm:$0xff] }
 0x6ee   :  { %v1476_v47 = vpop.permute.xlu1 %1475 }
 0x6ef   :  { %v1502_v51 = vsel %vm792_vm9, %v4916_v55, %v1476_v47  ;;  %v1769_v10 = vpop.permute.xlu2 %1768  ;;  %v3657_v47 = vld [vmem:[%s5649_s16] ss:$0 sm:$0xff] }
 0x6f0   :  { %v1506_v53 = vsel %vm894_vm15, %v1502_v51, %v1492_v24 }
 0x6f1   :  { %3502 = vmatmul.msk.f32.gmra.mxu0 %vm1512_vm6, %v1506_v53 }
 0x6f6   :  { %v1478_v4 = vpop.permute.xlu0 %1477  ;;  %v1811_v9 = vpop.permute.xlu1 %1810 }
 0x6f7   :  { %v1503_v5 = vsel %vm792_vm9, %v4921_v58, %v1478_v4  ;;  %v1801_v15 = vpop.permute.xlu2 %1800 }
 0x6f8   :  { %v1507_v6 = vsel %vm894_vm15, %v1503_v5, %v1494_v32 }
 0x6f9   :  { %3503 = vmatmul.msk.f32.gmra.mxu0 %vm1512_vm6, %v1507_v6 }
 0x6fe   :  { %v1799_v12 = vpop.permute.xlu0 %1798 }
 0x6ff   :  { %v1757_v61 = vpop.permute.xlu2 %1756 }
 0x700   :  { %v1822_v2 = vsel %vm792_vm9, %v1684_v63, %v1757_v61 }
 0x701   :  { %3504 = vmatmul.msk.f32.gmra.mxu0 %vm1512_vm6, %v1508_v62 }
 0x706   :  { %v1753_v35 = vpop.permute.xlu1 %1752 }
 0x707   :  { %v1820_v14 = vsel %vm792_vm9, %v1678_v11, %v1753_v35  ;;  %v1775_v22 = vpop.permute.xlu2 %1774 }
 0x708   :  { %v1824_v13 = vsel %vm894_vm15, %v1820_v14, %v1769_v10 }
 0x709   :  { %v1828_v17 = vsel %vm1512_vm6, %v1824_v13, %v1785_v45 }
 0x70a   :  { %v1832_v39 = vsel %vm105_vm0, %v1828_v17, %v1797_v52 }
 0x70b   :  { %v1836_v21 = vsel %vm229_vm2, %v1832_v39, %v1809_v33 }
 0x70c   :  { %3521 = vmatmul.msk.f32.vlgmr.msra.gmra.mxu0 %vm906_vm1, %v1836_v21 }
 0x70e   :  { %v1771_v30 = vpop.permute.xlu1 %1770  ;;  %v1755_v55 = vpop.permute.xlu0 %1754 }
 0x70f   :  { %v1821_v56 = vsel %vm792_vm9, %v1681_v18, %v1755_v55  ;;  %v1815_v34 = vpop.permute.xlu2 %1814 }
 0x710   :  { %v1825_v58 = vsel %vm894_vm15, %v1821_v56, %v1771_v30 }
 0x711   :  { %v1829_v59 = vsel %vm1512_vm6, %v1825_v58, %v1787_v44 }
 0x712   :  { %v1833_v60 = vsel %vm105_vm0, %v1829_v59, %v1799_v12 }
 0x713   :  { %v1837_v57 = vsel %vm229_vm2, %v1833_v60, %v1811_v9 }
 0x714   :  { %3522 = vmatmul.msk.f32.gmra.mxu0 %vm906_vm1, %v1837_v57 }
 0x716   :  { %v1789_v0 = vpop.permute.xlu1 %1788  ;;  %v1773_v1 = vpop.permute.xlu0 %1772 }
 0x717   :  { %v1826_v3 = vsel %vm894_vm15, %v1822_v2, %v1773_v1 }
 0x718   :  { %v1830_v16 = vsel %vm1512_vm6, %v1826_v3, %v1789_v0 }
 0x719   :  { %v1834_v46 = vsel %vm105_vm0, %v1830_v16, %v1801_v15 }
 0x71e   :  { %v1813_v23 = vpop.permute.xlu0 %1812  ;;  %v1759_v42 = vpop.permute.xlu1 %1758 }
 0x71f   :  { %v1838_v24 = vsel %vm229_vm2, %v1834_v46, %v1813_v23  ;;  %v1823_v29 = vsel %vm792_vm9, %v1687_v28, %v1759_v42 }
 0x720   :  { %3523 = vmatmul.msk.f32.gmra.mxu0 %vm906_vm1, %v1838_v24  ;;  %v1827_v31 = vsel %vm894_vm15, %v1823_v29, %v1775_v22 }
 0x726   :  { %v1791_v26 = vpop.permute.xlu0 %1790  ;;  %v1803_v32 = vpop.permute.xlu1 %1802 }
 0x727   :  { %v1831_v33 = vsel %vm1512_vm6, %v1827_v31, %v1791_v26 }
 0x728   :  { %v1835_v36 = vsel %vm105_vm0, %v1831_v33, %v1803_v32 }
 0x729   :  { %v1839_v37 = vsel %vm229_vm2, %v1835_v36, %v1815_v34 }
 0x72a   :  { %3524 = vmatmul.msk.f32.gmra.mxu0 %vm906_vm1, %v1839_v37 }
 0x74e   :  { %v1542_v52 = vpop.f32.mrf.mxu0 }
 0x74f   :  { %v5019_v40 = vadd.f32 %v3656_v48, %v1542_v52 }
 0x76e   :  { %v1545_v41 = vpop.f32.mrf.mxu0 }
 0x76f   :  { %v5033_v12 = vadd.f32 %v3656_v48, %v1545_v41 }
 0x776   :  { %v1548_v43 = vpop.f32.mrf.mxu0 }
 0x777   :  { %v5024_v54 = vadd.f32 %v3656_v48, %v1548_v43 }
 0x77e   :  { %v1551_v44 = vpop.f32.mrf.mxu0 }
 0x77f   :  { %v5029_v9 = vadd.f32 %v3656_v48, %v1551_v44 }
 0x789   :  { %v1872_v45 = vpop.f32.mrf.mxu0 }
 0x78a   :  { %v1873_v14 = vadd.f32 %v3657_v47, %v1872_v45 }
 0x78c   :  { %v3525_v42 = vmul.f32 -1.442695, %v1873_v14 }
 0x791   :  { %v1875_v51 = vpop.f32.mrf.mxu0 }
 0x792   :  { %v1876_v53 = vadd.f32 %v3657_v47, %v1875_v51 }
 0x794   :  { %3760 = vtanh.f32 %v1876_v53  ;;  %v3526_v18 = vmul.f32 -1.442695, %v1876_v53 }
 0x795   :  { %3762 = vtanh.f32 %v5024_v54 }
 0x79a   :  { %v3761_v4 = vpop.eup %3760 }
 0x79b   :  { %1970 = vrot.lane.b32.xlu2 %v3761_v4, %s3997_s5  ;;  %v3763_v7 = vpop.eup %3762 }
 0x79d   :  { %v1878_v5 = vpop.f32.mrf.mxu0 }
 0x79e   :  { %v1879_v6 = vadd.f32 %v3657_v47, %v1878_v5 }
 0x7a0   :  { %3764 = vtanh.f32 %v1879_v6  ;;  %v3527_v59 = vmul.f32 -1.442695, %v1879_v6 }
 0x7a1   :  { %3766 = vtanh.f32 %v5029_v9 }
 0x7a3   :  { %1642 = vrot.lane.b32.xlu2 %v3763_v7, %s3997_s5 }
 0x7a6   :  { %v3765_v10 = vpop.eup %3764 }
 0x7a7   :  { %v1881_v11 = vpop.f32.mrf.mxu0  ;;  %1972 = vrot.lane.b32.xlu1 %v3765_v10, %s3997_s5  ;;  %v3767_v35 = vpop.eup %3766 }
 0x7a8   :  { %v1882_v62 = vadd.f32 %v3657_v47, %v1881_v11 }
 0x7aa   :  { %3768 = vtanh.f32 %v1882_v62  ;;  %v3528_v16 = vmul.f32 -1.442695, %v1882_v62 }
 0x7ab   :  { %3770 = vtanh.f32 %v5033_v12 }
 0x7ac   :  { %3772 = vtanh.f32 %v1873_v14 }
 0x7ad   :  { %3774 = vpow2.f32 %v3526_v18 }
 0x7af   :  { %1644 = vrot.lane.b32.xlu1 %v3767_v35, %s3997_s5 }
 0x7b0   :  { %v3769_v13 = vpop.eup %3768 }
 0x7b1   :  { %1974 = vrot.lane.b32.xlu0 %v3769_v13, %s3997_s5  ;;  %v3771_v15 = vpop.eup %3770 }
 0x7b2   :  { %v3773_v17 = vpop.eup %3772 }
 0x7b3   :  { %v3775_v39 = vpop.eup %3774 }
 0x7b4   :  { %v1897_v21 = vadd.f32 1.0, %v3775_v39 }
 0x7b6   :  { %3776 = vrcp.f32 %v1897_v21  ;;  %v1926_v61 = vand.u32 2147483648, %v1897_v21  ;;  %vm1920_vm1 = vweird.f32 %v1897_v21  ;;  %v1924_v57 = vand.u32 2147483647, %v1897_v21 }
 0x7b7   :  { %1640 = vrot.lane.b32.xlu1 %v3771_v15, %s3997_s5  ;;  %3778 = vpow2.f32 %v3527_v59 }
 0x7b8   :  { %v1927_v0 = vor.u32 1.1754944e-38, %v1926_v61  ;;  %vm1925_vm8 = vcmp.eq.f32.partialorder %v1924_v57, 8.507059e+37  ;;  %3780 = vpow2.f32 %v3528_v16  ;;  %v3507_v61 = vmul.f32 -1.442695, %v5024_v54 }
 0x7b9   :  { %1968 = vrot.lane.b32.xlu0 %v3773_v17, %s3997_s5  ;;  %v3508_v57 = vmul.f32 -1.442695, %v5029_v9 }
 0x7bc   :  { %v3777_v30 = vpop.eup %3776 }
 0x7bd   :  { %v1916_v55 = vmul.f32 %v3777_v30, %v1897_v21  ;;  %vm1921_vm2 = vweird.f32 %v3777_v30  ;;  %v3779_v3 = vpop.eup %3778 }
 0x7be   :  { %vm1922_vm7 = vmor %vm1920_vm1, %vm1921_vm2  ;;  %v1898_v23 = vadd.f32 1.0, %v3779_v3  ;;  %v3781_v46 = vpop.eup %3780 }
 0x7bf   :  { %v1917_v56 = vsub.f32 1.0, %v1916_v55  ;;  %v1899_v28 = vadd.f32 1.0, %v3781_v46 }
 0x7c0   :  { %3782 = vrcp.f32 %v1898_v23  ;;  %v1941_v48 = vand.u32 2147483648, %v1898_v23  ;;  %vm1935_vm11 = vweird.f32 %v1898_v23  ;;  %v1939_v52 = vand.u32 2147483647, %v1898_v23 }
 0x7c1   :  { %v1918_v58 = vmul.f32 %v3777_v30, %v1917_v56  ;;  %3784 = vpow2.f32 %v3525_v42  ;;  %v1956_v10 = vand.u32 2147483648, %v1899_v28  ;;  %vm1950_vm4 = vweird.f32 %v1899_v28 }
 0x7c2   :  { %3786 = vrcp.f32 %v1899_v28  ;;  %v1942_v45 = vor.u32 1.1754944e-38, %v1941_v48  ;;  %vm1940_vm13 = vcmp.eq.f32.partialorder %v1939_v52, 8.507059e+37  ;;  %v1954_v11 = vand.u32 2147483647, %v1899_v28 }
 0x7c3   :  { %v1919_v60 = vadd.f32 %v3777_v30, %v1918_v58  ;;  %v1957_v14 = vor.u32 1.1754944e-38, %v1956_v10 }
 0x7c4   :  { %vm1955_vm2 = vcmp.eq.f32.partialorder %v1954_v11, 8.507059e+37 }
 0x7c5   :  { %v1923_v63 = vsel %vm1922_vm7, %v3777_v30, %v1919_v60 }
 0x7c6   :  { %v1928_v2 = vsel %vm1925_vm8, %v1927_v0, %v1923_v63  ;;  %v3783_v24 = vpop.eup %3782  ;;  %v3506_v63 = vmul.f32 -1.442695, %v5033_v12  ;;  %v3505_v0 = vmul.f32 -1.442695, %v5019_v40 }
 0x7c7   :  { %v1931_v29 = vmul.f32 %v3783_v24, %v1898_v23  ;;  %v3785_v26 = vpop.eup %3784  ;;  %vm1936_vm10 = vweird.f32 %v3783_v24 }
 0x7c8   :  { %v1896_v32 = vadd.f32 1.0, %v3785_v26  ;;  %v3787_v33 = vpop.eup %3786  ;;  %vm1937_vm12 = vmor %vm1935_vm11, %vm1936_vm10 }
 0x7c9   :  { %v1932_v31 = vsub.f32 1.0, %v1931_v29  ;;  %v1946_v36 = vmul.f32 %v3787_v33, %v1899_v28  ;;  %vm1951_vm14 = vweird.f32 %v3787_v33 }
 0x7ca   :  { %3788 = vrcp.f32 %v1896_v32  ;;  %vm1952_vm5 = vmor %vm1950_vm4, %vm1951_vm14  ;;  %v1911_v39 = vand.u32 2147483648, %v1896_v32  ;;  %vm1905_vm7 = vweird.f32 %v1896_v32  ;;  %v1909_v21 = vand.u32 2147483647, %v1896_v32 }
 0x7cb   :  { %v1933_v34 = vmul.f32 %v3783_v24, %v1932_v31  ;;  %v1947_v41 = vsub.f32 1.0, %v1946_v36  ;;  %3790 = vtanh.f32 %v5019_v40 }
 0x7cc   :  { %v1912_v55 = vor.u32 1.1754944e-38, %v1911_v39  ;;  %vm1910_vm10 = vcmp.eq.f32.partialorder %v1909_v21, 8.507059e+37  ;;  %3792 = vpow2.f32 %v3507_v61 }
 0x7cd   :  { %v1934_v37 = vadd.f32 %v3783_v24, %v1933_v34  ;;  %v1948_v47 = vmul.f32 %v3787_v33, %v1947_v41  ;;  %3794 = vpow2.f32 %v3508_v57 }
 0x7ce   :  { %3796 = vpow2.f32 %v3506_v63 }
 0x7cf   :  { %v1938_v44 = vsel %vm1937_vm12, %v3783_v24, %v1934_v37  ;;  %v1949_v6 = vadd.f32 %v3787_v33, %v1948_v47  ;;  %3798 = vpow2.f32 %v3505_v0 }
 0x7d0   :  { %v3789_v43 = vpop.eup %3788  ;;  %v1943_v4 = vsel %vm1940_vm13, %v1942_v45, %v1938_v44 }
 0x7d1   :  { %v1901_v51 = vmul.f32 %v3789_v43, %v1896_v32  ;;  %v1953_v62 = vsel %vm1952_vm5, %v3787_v33, %v1949_v6  ;;  %vm1906_vm1 = vweird.f32 %v3789_v43  ;;  %v3791_v60 = vpop.eup %3790 }
 0x7d2   :  { %v1958_v15 = vsel %vm1955_vm2, %v1957_v14, %v1953_v62  ;;  %vm1907_vm8 = vmor %vm1905_vm7, %vm1906_vm1 }
 0x7d3   :  { %v1902_v7 = vsub.f32 1.0, %v1901_v51 }
 0x7d5   :  { %v1903_v35 = vmul.f32 %v3789_v43, %v1902_v7 }
 0x7d7   :  { %v1904_v18 = vadd.f32 %v3789_v43, %v1903_v35 }
 0x7d9   :  { %v1908_v30 = vsel %vm1907_vm8, %v3789_v43, %v1904_v18 }
 0x7da   :  { %v1913_v58 = vsel %vm1910_vm10, %v1912_v55, %v1908_v30 }
 0x7f5   :  { %v1971_v1 = vpop.permute.xlu2 %1970 }
 0x7f6   :  { %v1981_v22 = vmul.f32 %v1971_v1, %v1928_v2  ;;  %v3793_v1 = vpop.eup %3792 }
 0x7f7   :  { %v3795_v2 = vpop.eup %3794  ;;  %v1568_v16 = vadd.f32 1.0, %v3793_v1 }
 0x7f8   :  { %1990 = vrot.lane.b32.xlu1 %v1981_v22, %s3998_s12  ;;  %v3797_v3 = vpop.eup %3796  ;;  %v1569_v22 = vadd.f32 1.0, %v3795_v2 }
 0x7f9   :  { %v1567_v23 = vadd.f32 1.0, %v3797_v3  ;;  %3800 = vrcp.f32 %v1568_v16  ;;  %v3799_v42 = vpop.eup %3798  ;;  %vm1605_vm13 = vweird.f32 %v1568_v16  ;;  %v1611_v45 = vand.u32 2147483648, %v1568_v16 }
 0x7fa   :  { %3802 = vrcp.f32 %v1569_v22  ;;  %v5050_v54 = vadd.f32 1.0, %v3799_v42  ;;  %v1626_v47 = vand.u32 2147483648, %v1569_v22  ;;  %vm1620_vm5 = vweird.f32 %v1569_v22 }
 0x7fb   :  { %3804 = vrcp.f32 %v1567_v23  ;;  %v1596_v7 = vand.u32 2147483648, %v1567_v23  ;;  %vm1590_vm1 = vweird.f32 %v1567_v23  ;;  %v1594_v62 = vand.u32 2147483647, %v1567_v23 }
 0x7fc   :  { %3806 = vrcp.f32 %v5050_v54  ;;  %v1612_v35 = vor.u32 1.1754944e-38, %v1611_v45  ;;  %v1627_v14 = vor.u32 1.1754944e-38, %v1626_v47  ;;  %v1581_v1 = vand.u32 2147483648, %v5050_v54 }
 0x7fd   :  { %v1643_v52 = vpop.permute.xlu2 %1642  ;;  %v1597_v39 = vor.u32 1.1754944e-38, %v1596_v7  ;;  %v1579_v3 = vand.u32 2147483647, %v5050_v54 }
 0x7ff   :  { %v3801_v9 = vpop.eup %3800 }
 0x800   :  { %v3803_v12 = vpop.eup %3802  ;;  %v1601_v24 = vmul.f32 %v3801_v9, %v1568_v16  ;;  %vm1606_vm11 = vweird.f32 %v3801_v9 }
 0x801   :  { %v3805_v46 = vpop.eup %3804  ;;  %v1616_v40 = vmul.f32 %v3803_v12, %v1569_v22  ;;  %vm1621_vm12 = vweird.f32 %v3803_v12  ;;  %vm5057_vm4 = vmor %vm1605_vm13, %vm1606_vm11  ;;  %vm1595_vm11 = vcmp.eq.f32.partialorder %v1594_v62, 8.507059e+37  ;;  %vm1575_vm13 = vweird.f32 %v5050_v54  ;;  %v3658_v62 = vld [vmem:[%s5651_s18] ss:$0 sm:$0xff] }
 0x802   :  { %v1586_v28 = vmul.f32 %v3805_v46, %v1567_v23  ;;  %v1602_v26 = vsub.f32 1.0, %v1601_v24  ;;  %v5053_v32 = vpop.eup %3806  ;;  %vm1591_vm14 = vweird.f32 %v3805_v46  ;;  %vm1622_vm2 = vmor %vm1620_vm5, %vm1621_vm12  ;;  %v1582_v23 = vor.u32 1.1754944e-38, %v1581_v1  ;;  %v3531_v24 = vld [vmem:[%s5685_s6 + $0xb0] sm:$0xff] }
 0x803   :  { %v1617_v31 = vsub.f32 1.0, %v1616_v40  ;;  %v1571_v37 = vmul.f32 %v5053_v32, %v5050_v54  ;;  %vm1592_vm7 = vmor %vm1590_vm1, %vm1591_vm14  ;;  %vm1576_vm12 = vweird.f32 %v5053_v32 }
 0x804   :  { %v1587_v33 = vsub.f32 1.0, %v1586_v28  ;;  %v1603_v34 = vmul.f32 %v3801_v9, %v1602_v26  ;;  %vm1577_vm14 = vmor %vm1575_vm13, %vm1576_vm12  ;;  %v2010_v28 = vld [vmem:[%s5650_s17 + $0x10] sm:$0xff]  ;;  %v2008_v26 = vld [vmem:[%s5650_s17] sm:$0xff] }
 0x805   :  { %v1618_v36 = vmul.f32 %v3803_v12, %v1617_v31  ;;  %v1572_v44 = vsub.f32 1.0, %v1571_v37  ;;  %2155 = vmatpush.msra.mxu2 %v2010_v28 }
 0x806   :  { %v1588_v48 = vmul.f32 %v3805_v46, %v1587_v33  ;;  %v1604_v41 = vadd.f32 %v3801_v9, %v1603_v34 }
 0x807   :  { %v1619_v43 = vadd.f32 %v3803_v12, %v1618_v36 }
 0x808   :  { %v1589_v6 = vadd.f32 %v3805_v46, %v1588_v48  ;;  %v1608_v10 = vsel %vm5057_vm4, %v3801_v9, %v1604_v41  ;;  %vm1580_vm4 = vcmp.eq.f32.partialorder %v1579_v3, 8.507059e+37 }
 0x809   :  { %v1623_v11 = vsel %vm1622_vm2, %v3803_v12, %v1619_v43 }
 0x819   :  { %v1973_v53 = vpop.permute.xlu1 %1972 }
 0x81a   :  { %v1982_v5 = vmul.f32 %v1973_v53, %v1943_v4  ;;  %v1609_v4 = vand.u32 2147483647, %v1568_v16 }
 0x81c   :  { %1992 = vrot.lane.b32.xlu2 %v1982_v5, %s3998_s12  ;;  %v1624_v5 = vand.u32 2147483647, %v1569_v22  ;;  %vm1610_vm8 = vcmp.eq.f32.partialorder %v1609_v4, 8.507059e+37 }
 0x81e   :  { %vm1625_vm10 = vcmp.eq.f32.partialorder %v1624_v5, 8.507059e+37 }
 0x81f   :  { %v1628_v18 = vsel %vm1625_vm10, %v1627_v14, %v1623_v11 }
 0x821   :  { %v1645_v29 = vpop.permute.xlu1 %1644 }
 0x822   :  { %v1653_v55 = vmul.f32 %v1645_v29, %v1628_v18  ;;  %v2009_v29 = vld [vmem:[%s5650_s17 + $0x8] sm:$0xff]  ;;  %s3395_s17 = sshll.u32 %s5660_s27, 4  ;;  %s3396_s17 = int_to_ptr.hbm [resolvable:$true] %s3395_s17 }
 0x823   :  { %v1975_v13 = vpop.permute.xlu0 %1974  ;;  %2156 = vmatpush.msra.mxu2 %v2009_v29 }
 0x824   :  { %v1983_v17 = vmul.f32 %v1975_v13, %v1958_v15  ;;  %v1593_v13 = vsel %vm1592_vm7, %v3805_v46, %v1589_v6  ;;  %v1573_v15 = vmul.f32 %v5053_v32, %v1572_v44 }
 0x825   :  { %2157 = vmatpush.msra.mxu2 %v2008_v26 }
 0x826   :  { %1994 = vrot.lane.b32.xlu0 %v1983_v17, %s3998_s12  ;;  %v1613_v17 = vsel %vm1610_vm8, %v1612_v35, %v1608_v10  ;;  %v1574_v63 = vadd.f32 %v5053_v32, %v1573_v15 }
 0x827   :  { %v1652_v30 = vmul.f32 %v1643_v52, %v1613_v17 }
 0x828   :  { %v1578_v22 = vsel %vm1577_vm14, %v5053_v32, %v1574_v63 }
 0x829   :  { %v1641_v51 = vpop.permute.xlu1 %1640  ;;  %v1583_v42 = vsel %vm1580_vm4, %v1582_v23, %v1578_v22 }
 0x82b   :  { %v1969_v56 = vpop.permute.xlu0 %1968 }
 0x82c   :  { %v1980_v59 = vmul.f32 %v1969_v56, %v1913_v58  ;;  %v1598_v56 = vsel %vm1595_vm11, %v1597_v39, %v1593_v13 }
 0x82e   :  { %1638 = vrot.lane.b32.xlu0 %v3791_v60, %s3997_s5  ;;  %1988 = vrot.lane.b32.xlu2 %v1980_v59, %s3998_s12  ;;  %v1651_v60 = vmul.f32 %v1641_v51, %v1598_v56 }
 0x86a   :  { %v1991_v58 = vpop.permute.xlu1 %1990 }
 0x86b   :  { %v2001_v2 = vsel %vm1402_vm3, %v1651_v60, %v1991_v58 }
 0x876   :  { %v1993_v21 = vpop.permute.xlu2 %1992 }
 0x877   :  { %v2002_v61 = vsel %vm1402_vm3, %v1652_v30, %v1993_v21 }
 0x878   :  { %v5077_v16 = vadd.f32 %v2002_v61, %v4801_v49 }
 0x888   :  { %v1989_v9 = vpop.permute.xlu2 %1988 }
 0x898   :  { %v1995_v59 = vpop.permute.xlu0 %1994 }
 0x899   :  { %v2003_v57 = vsel %vm1402_vm3, %v1653_v55, %v1995_v59 }
 0x89a   :  { %v5070_v0 = vadd.f32 %v2003_v57, %v4790_v50  ;;  %v5083_v50 = vadd.f32 %v2001_v2, %v4796_v38  ;;  %v3529_v38 = vld [vmem:[%s5685_s6 + $0xa0] sm:$0xff] }
 0x89c   :  { %2041 = vmatpush.msrb.mxu1 %v5070_v0  ;;  %2070 = vmatpush.msra.mxu3 %v5070_v0 }
 0x89e   :  { %2042 = vmatpush.msrb.mxu1 %v5077_v16  ;;  %2071 = vmatpush.msra.mxu3 %v5077_v16 }
 0x8a0   :  { %v1639_v54 = vpop.permute.xlu0 %1638  ;;  %2043 = vmatpush.msrb.mxu1 %v5083_v50  ;;  %2072 = vmatpush.msra.mxu3 %v5083_v50 }
 0x8a1   :  { %v1650_v49 = vmul.f32 %v1639_v54, %v1583_v42 }
 0x8a3   :  { %v2000_v12 = vsel %vm1402_vm3, %v1650_v49, %v1989_v9 }
 0x8a4   :  { %v5091_v46 = vadd.f32 %v2000_v12, %v4812_v8  ;;  %v3530_v8 = vld [vmem:[%s5685_s6 + $0xa8] sm:$0xff] }
 0x8a6   :  { %2107 = vrot.lane.b32.xlu1 %v5091_v46, %s3994_s2  ;;  %2044 = vmatpush.msrb.mxu1 %v5091_v46 }
 0x8a7   :  { %2073 = vmatpush.msra.mxu3 %v5091_v46  ;;  %3533 = vmatmul.msk.f32.vlgmr.msrb.gmra.mxu1 %vm105_vm0, %v3529_v38 }
 0x8a8   :  { %3537 = vmatmul.msk.f32.vlgmr.msra.gmra.mxu3 %vm105_vm0, %v4876_v25  ;;  %v3532_v25 = vld [vmem:[%s5685_s6 + $0xb8] sm:$0xff] }
 0x8af   :  { %3534 = vmatmul.msk.f32.gmra.mxu1 %vm105_vm0, %v3530_v8 }
 0x8b0   :  { %3538 = vmatmul.msk.f32.gmra.mxu3 %vm105_vm0, %v4887_v27 }
 0x8b7   :  { %3535 = vmatmul.msk.f32.gmra.mxu1 %vm105_vm0, %v3531_v24 }
 0x8b8   :  { %3539 = vmatmul.msk.f32.gmra.mxu3 %vm105_vm0, %v4898_v19 }
 0x8bf   :  { %3536 = vmatmul.msk.f32.gmra.mxu1 %vm105_vm0, %v3532_v25 }
 0x8c0   :  { %3540 = vmatmul.msk.f32.gmra.mxu3 %vm105_vm0, %v4909_v20 }
 0x918   :  { %v2108_v33 = vpop.permute.xlu1 %2107 }
 0x924   :  { %v2046_v31 = vpop.f32.mrf.mxu1 }
 0x92b   :  { %v2075_v40 = vpop.f32.mrf.mxu3 }
 0x92c   :  { %2091 = vrot.lane.b32.xlu0 %v2075_v40, %s3992_s29  ;;  %v2049_v37 = vpop.f32.mrf.mxu1 }
 0x933   :  { %v2078_v27 = vpop.f32.mrf.mxu3 }
 0x934   :  { %2109 = vrot.lane.b32.xlu0 %v5083_v50, %s3994_s2  ;;  %2093 = vrot.lane.b32.xlu2 %v2078_v27, %s3992_s29  ;;  %v2052_v44 = vpop.f32.mrf.mxu1 }
 0x93b   :  { %v2081_v19 = vpop.f32.mrf.mxu3 }
 0x93c   :  { %2111 = vrot.lane.b32.xlu2 %v5077_v16, %s3994_s2  ;;  %2095 = vrot.lane.b32.xlu1 %v2081_v19, %s3992_s29  ;;  %v2055_v4 = vpop.f32.mrf.mxu1 }
 0x943   :  { %v2084_v20 = vpop.f32.mrf.mxu3 }
 0x944   :  { %2113 = vrot.lane.b32.xlu1 %v5070_v0, %s3994_s2  ;;  %2097 = vrot.lane.b32.xlu0 %v2084_v20, %s3992_s29 }
 0x98e   :  { %v2094_v48 = vpop.permute.xlu2 %2093 }
 0x98f   :  { %v2120_v52 = vsel %vm792_vm9, %v2049_v37, %v2094_v48 }
 0x996   :  { %v2112_v47 = vpop.permute.xlu2 %2111 }
 0x99e   :  { %v2092_v32 = vpop.permute.xlu0 %2091 }
 0x99f   :  { %v2119_v34 = vsel %vm792_vm9, %v2046_v31, %v2092_v32 }
 0x9a0   :  { %v2123_v36 = vsel %vm894_vm15, %v2119_v34, %v2108_v33 }
 0x9a1   :  { %3541 = vmatmul.msk.f32.vlgmr.msra.gmra.mxu2 %vm1512_vm6, %v2123_v36 }
 0x9a6   :  { %v2110_v41 = vpop.permute.xlu0 %2109 }
 0x9a7   :  { %v2124_v43 = vsel %vm894_vm15, %v2120_v52, %v2110_v41 }
 0x9a9   :  { %3542 = vmatmul.msk.f32.gmra.mxu2 %vm1512_vm6, %v2124_v43 }
 0x9ae   :  { %v2096_v45 = vpop.permute.xlu1 %2095 }
 0x9af   :  { %v2121_v51 = vsel %vm792_vm9, %v2052_v44, %v2096_v45 }
 0x9b0   :  { %v2125_v53 = vsel %vm894_vm15, %v2121_v51, %v2112_v47 }
 0x9b1   :  { %3543 = vmatmul.msk.f32.gmra.mxu2 %vm1512_vm6, %v2125_v53 }
 0x9b6   :  { %v2114_v5 = vpop.permute.xlu1 %2113  ;;  %v2098_v6 = vpop.permute.xlu0 %2097 }
 0x9b7   :  { %v2122_v7 = vsel %vm792_vm9, %v2055_v4, %v2098_v6 }
 0x9b8   :  { %v2126_v10 = vsel %vm894_vm15, %v2122_v7, %v2114_v5 }
 0x9b9   :  { %3544 = vmatmul.msk.f32.gmra.mxu2 %vm1512_vm6, %v2126_v10 }
 0xa24   :  { %v2159_v11 = vpop.f32.mrf.mxu2 }
 0xa25   :  { %v2160_v30 = vadd.f32 %v3658_v62, %v2159_v11 }
 0xa27   :  { %v3545_v59 = vmul.f32 -1.442695, %v2160_v30 }
 0xa2c   :  { %v2162_v35 = vpop.f32.mrf.mxu2 }
 0xa2d   :  { %v2163_v14 = vadd.f32 %v3658_v62, %v2162_v35 }
 0xa2f   :  { %3808 = vtanh.f32 %v2163_v14  ;;  %v3546_v57 = vmul.f32 -1.442695, %v2163_v14 }
 0xa34   :  { %v2165_v13 = vpop.f32.mrf.mxu2 }
 0xa35   :  { %v3809_v15 = vpop.eup %3808  ;;  %v2166_v17 = vadd.f32 %v3658_v62, %v2165_v13 }
 0xa36   :  { %2257 = vrot.lane.b32.xlu1 %v3809_v15, %s5700_s4 }
 0xa37   :  { %3810 = vtanh.f32 %v2166_v17  ;;  %v3547_v63 = vmul.f32 -1.442695, %v2166_v17 }
 0xa3c   :  { %v2168_v18 = vpop.f32.mrf.mxu2 }
 0xa3d   :  { %v3811_v39 = vpop.eup %3810  ;;  %v2169_v21 = vadd.f32 %v3658_v62, %v2168_v18 }
 0xa3e   :  { %2259 = vrot.lane.b32.xlu0 %v3811_v39, %s5700_s4 }
 0xa3f   :  { %3812 = vtanh.f32 %v2169_v21  ;;  %v3548_v58 = vmul.f32 -1.442695, %v2169_v21 }
 0xa40   :  { %3814 = vtanh.f32 %v2160_v30 }
 0xa41   :  { %3816 = vpow2.f32 %v3548_v58 }
 0xa42   :  { %3818 = vpow2.f32 %v3545_v59 }
 0xa45   :  { %v3813_v55 = vpop.eup %3812 }
 0xa46   :  { %2261 = vrot.lane.b32.xlu2 %v3813_v55, %s5700_s4  ;;  %v3815_v56 = vpop.eup %3814 }
 0xa47   :  { %v3817_v60 = vpop.eup %3816 }
 0xa48   :  { %v2186_v61 = vadd.f32 1.0, %v3817_v60  ;;  %v3819_v1 = vpop.eup %3818  ;;  %v5212_v60 = vld [vmem:[%s5685_s6 + $0x28] sm:$0xff] }
 0xa49   :  { %v2183_v2 = vadd.f32 1.0, %v3819_v1  ;;  %v5240_v1 = vld [vmem:[%s5685_s6 + $0x38] sm:$0xff] }
 0xa4a   :  { %3820 = vrcp.f32 %v2186_v61  ;;  %v2243_v19 = vand.u32 2147483648, %v2186_v61  ;;  %vm2237_vm5 = vweird.f32 %v2186_v61  ;;  %v2241_v20 = vand.u32 2147483647, %v2186_v61 }
 0xa4b   :  { %3822 = vpow2.f32 %v3546_v57  ;;  %v2198_v41 = vand.u32 2147483648, %v2183_v2  ;;  %vm2192_vm8 = vweird.f32 %v2183_v2  ;;  %v2196_v44 = vand.u32 2147483647, %v2183_v2  ;;  %v5226_v57 = vld [vmem:[%s5685_s6 + $0x30] sm:$0xff] }
 0xa4c   :  { %3824 = vpow2.f32 %v3547_v63  ;;  %v2244_v32 = vor.u32 1.1754944e-38, %v2243_v19  ;;  %vm2242_vm1 = vcmp.eq.f32.partialorder %v2241_v20, 8.507059e+37  ;;  %v5233_v63 = vld [vmem:[%s5685_s6 + $0x70] sm:$0xff] }
 0xa4d   :  { %3826 = vrcp.f32 %v2183_v2  ;;  %v2199_v53 = vor.u32 1.1754944e-38, %v2198_v41  ;;  %vm2197_vm11 = vcmp.eq.f32.partialorder %v2196_v44, 8.507059e+37  ;;  %v3659_v44 = vld [vmem:[%s5653_s20] ss:$0 sm:$0xff] }
 0xa4e   :  { %2255 = vrot.lane.b32.xlu2 %v3815_v56, %s5700_s4 }
 0xa50   :  { %v3821_v3 = vpop.eup %3820 }
 0xa51   :  { %v3823_v22 = vpop.eup %3822  ;;  %v2233_v42 = vmul.f32 %v3821_v3, %v2186_v61  ;;  %vm2238_vm3 = vweird.f32 %v3821_v3  ;;  %v5219_v61 = vld [vmem:[%s5685_s6 + $0x68] sm:$0xff] }
 0xa52   :  { %v3825_v23 = vpop.eup %3824  ;;  %v5159_v54 = vadd.f32 1.0, %v3823_v22  ;;  %vm2239_vm2 = vmor %vm2237_vm5, %vm2238_vm3 }
 0xa53   :  { %v5161_v49 = vadd.f32 1.0, %v3825_v23  ;;  %v2234_v9 = vsub.f32 1.0, %v2233_v42  ;;  %v3827_v12 = vpop.eup %3826 }
 0xa54   :  { %3828 = vrcp.f32 %v5159_v54  ;;  %v2188_v8 = vmul.f32 %v3827_v12, %v2183_v2  ;;  %vm2193_vm7 = vweird.f32 %v3827_v12  ;;  %vm2207_vm14 = vweird.f32 %v5159_v54  ;;  %v5247_v2 = vld [vmem:[%s5685_s6 + $0x78] sm:$0xff] }
 0xa55   :  { %3830 = vrcp.f32 %v5161_v49  ;;  %v2235_v38 = vmul.f32 %v3821_v3, %v2234_v9  ;;  %vm2194_vm10 = vmor %vm2192_vm8, %vm2193_vm7  ;;  %v2228_v11 = vand.u32 2147483648, %v5161_v49  ;;  %v2211_v62 = vand.u32 2147483647, %v5159_v54  ;;  %v2275_v9 = vld [vmem:[%s5652_s19] sm:$0xff] }
 0xa56   :  { %v2189_v40 = vsub.f32 1.0, %v2188_v8  ;;  %vm2222_vm3 = vweird.f32 %v5161_v49  ;;  %v2226_v14 = vand.u32 2147483647, %v5161_v49 }
 0xa57   :  { %v2236_v25 = vadd.f32 %v3821_v3, %v2235_v38  ;;  %v2229_v39 = vor.u32 1.1754944e-38, %v2228_v11 }
 0xa58   :  { %v2190_v26 = vmul.f32 %v3827_v12, %v2189_v40 }
 0xa59   :  { %v2240_v28 = vsel %vm2239_vm2, %v3821_v3, %v2236_v25  ;;  %vm2212_vm2 = vcmp.eq.f32.partialorder %v2211_v62, 8.507059e+37 }
 0xa5a   :  { %v3829_v24 = vpop.eup %3828  ;;  %v2245_v34 = vsel %vm2242_vm1, %v2244_v32, %v2240_v28  ;;  %v2191_v48 = vadd.f32 %v3827_v12, %v2190_v26  ;;  %vm2227_vm1 = vcmp.eq.f32.partialorder %v2226_v14, 8.507059e+37 }
 0xa5b   :  { %v3831_v27 = vpop.eup %3830  ;;  %v2203_v29 = vmul.f32 %v3829_v24, %v5159_v54  ;;  %vm2208_vm12 = vweird.f32 %v3829_v24 }
 0xa5c   :  { %v2218_v31 = vmul.f32 %v3831_v27, %v5161_v49  ;;  %v2195_v47 = vsel %vm2194_vm10, %v3827_v12, %v2191_v48  ;;  %vm2223_vm13 = vweird.f32 %v3831_v27  ;;  %vm2209_vm4 = vmor %vm2207_vm14, %vm2208_vm12  ;;  %v2276_v49 = vld [vmem:[%s5652_s19 + $0x8] sm:$0xff] }
 0xa5d   :  { %v2204_v37 = vsub.f32 1.0, %v2203_v29  ;;  %v2200_v4 = vsel %vm2197_vm11, %v2199_v53, %v2195_v47  ;;  %vm2224_vm5 = vmor %vm2222_vm3, %vm2223_vm13 }
 0xa5e   :  { %v2219_v52 = vsub.f32 1.0, %v2218_v31 }
 0xa5f   :  { %v2205_v45 = vmul.f32 %v3829_v24, %v2204_v37 }
 0xa60   :  { %v2220_v51 = vmul.f32 %v3831_v27, %v2219_v52 }
 0xa61   :  { %v2206_v6 = vadd.f32 %v3829_v24, %v2205_v45 }
 0xa62   :  { %v2221_v10 = vadd.f32 %v3831_v27, %v2220_v51 }
 0xa63   :  { %v2210_v13 = vsel %vm2209_vm4, %v3829_v24, %v2206_v6 }
 0xa64   :  { %v2225_v15 = vsel %vm2224_vm5, %v3831_v27, %v2221_v10 }
 0xa65   :  { %v2230_v55 = vsel %vm2227_vm1, %v2229_v39, %v2225_v15 }
 0xaa0   :  { %v2262_v33 = vpop.permute.xlu2 %2261 }
 0xaa1   :  { %v2270_v36 = vmul.f32 %v2262_v33, %v2245_v34 }
 0xaa3   :  { %v5168_v43 = vadd.f32 %v2270_v36, %v5070_v0  ;;  %v2213_v0 = vand.u32 2147483648, %v5159_v54  ;;  %v2277_v54 = vld [vmem:[%s5652_s19 + $0x10] sm:$0xff] }
 0xaa4   :  { %2405 = vmatpush.msrb.mxu3 %v2277_v54 }
 0xaa5   :  { %2291 = vmatpush.msrb.mxu0 %v5168_v43  ;;  %2320 = vmatpush.msra.mxu1 %v5168_v43  ;;  %v2214_v18 = vor.u32 1.1754944e-38, %v2213_v0 }
 0xaa6   :  { %2406 = vmatpush.msrb.mxu3 %v2276_v49 }
 0xaa7   :  { %v2215_v21 = vsel %vm2212_vm2, %v2214_v18, %v2210_v13 }
 0xaa8   :  { %v2256_v5 = vpop.permute.xlu2 %2255  ;;  %v2258_v17 = vpop.permute.xlu1 %2257  ;;  %2407 = vmatpush.msrb.mxu3 %v2275_v9 }
 0xaa9   :  { %v2267_v7 = vmul.f32 %v2256_v5, %v2200_v4 }
 0xaab   :  { %v5177_v35 = vadd.f32 %v2267_v7, %v5091_v46  ;;  %v2268_v46 = vmul.f32 %v2258_v17, %v2215_v21 }
 0xaad   :  { %2357 = vrot.lane.b32.xlu1 %v5177_v35, %s3994_s2  ;;  %v5187_v59 = vadd.f32 %v2268_v46, %v5083_v50  ;;  %v5205_v50 = vld [vmem:[%s5685_s6 + $0x60] sm:$0xff] }
 0xab0   :  { %v2260_v30 = vpop.permute.xlu0 %2259 }
 0xab1   :  { %v2269_v56 = vmul.f32 %v2260_v30, %v2230_v55 }
 0xab3   :  { %v5184_v58 = vadd.f32 %v2269_v56, %v5077_v16  ;;  %v5198_v16 = vld [vmem:[%s5685_s6 + $0x20] sm:$0xff] }
 0xab5   :  { %2292 = vmatpush.msrb.mxu0 %v5184_v58  ;;  %2321 = vmatpush.msra.mxu1 %v5184_v58 }
 0xab7   :  { %2293 = vmatpush.msrb.mxu0 %v5187_v59  ;;  %2322 = vmatpush.msra.mxu1 %v5187_v59 }
 0xab9   :  { %2294 = vmatpush.msrb.mxu0 %v5177_v35  ;;  %2323 = vmatpush.msra.mxu1 %v5177_v35 }
 0xaba   :  { %3553 = vmatmul.msk.f32.vlgmr.msra.gmra.mxu1 %vm105_vm0, %v5198_v16  ;;  %3549 = vmatmul.msk.f32.vlgmr.msrb.gmra.mxu0 %vm105_vm0, %v5205_v50 }
 0xac2   :  { %3554 = vmatmul.msk.f32.gmra.mxu1 %vm105_vm0, %v5212_v60  ;;  %3550 = vmatmul.msk.f32.gmra.mxu0 %vm105_vm0, %v5219_v61 }
 0xaca   :  { %3555 = vmatmul.msk.f32.gmra.mxu1 %vm105_vm0, %v5226_v57  ;;  %3551 = vmatmul.msk.f32.gmra.mxu0 %vm105_vm0, %v5233_v63 }
 0xad2   :  { %3556 = vmatmul.msk.f32.gmra.mxu1 %vm105_vm0, %v5240_v1  ;;  %3552 = vmatmul.msk.f32.gmra.mxu0 %vm105_vm0, %v5247_v2 }
 0xb1f   :  { %v2358_v8 = vpop.permute.xlu1 %2357 }
 0xb37   :  { %v2325_v3 = vpop.f32.mrf.mxu1  ;;  %v2296_v12 = vpop.f32.mrf.mxu0 }
 0xb38   :  { %2341 = vrot.lane.b32.xlu0 %v2325_v3, %s3992_s29 }
 0xb3f   :  { %v2328_v22 = vpop.f32.mrf.mxu1  ;;  %v2299_v40 = vpop.f32.mrf.mxu0 }
 0xb40   :  { %2359 = vrot.lane.b32.xlu0 %v5187_v59, %s3994_s2  ;;  %2343 = vrot.lane.b32.xlu2 %v2328_v22, %s3992_s29 }
 0xb47   :  { %v2331_v23 = vpop.f32.mrf.mxu1  ;;  %v2302_v29 = vpop.f32.mrf.mxu0 }
 0xb48   :  { %2361 = vrot.lane.b32.xlu2 %v5184_v58, %s3994_s2  ;;  %2345 = vrot.lane.b32.xlu1 %v2331_v23, %s3992_s29 }
 0xb4f   :  { %v2334_v42 = vpop.f32.mrf.mxu1  ;;  %v2305_v34 = vpop.f32.mrf.mxu0 }
 0xb50   :  { %2363 = vrot.lane.b32.xlu1 %v5168_v43, %s3994_s2  ;;  %2347 = vrot.lane.b32.xlu0 %v2334_v42, %s3992_s29 }
 0xb9a   :  { %v2344_v27 = vpop.permute.xlu2 %2343 }
 0xb9b   :  { %v2370_v19 = vsel %vm792_vm9, %v2299_v40, %v2344_v27 }
 0xba2   :  { %v2362_v31 = vpop.permute.xlu2 %2361 }
 0xbaa   :  { %v2342_v38 = vpop.permute.xlu0 %2341 }
 0xbab   :  { %v2369_v24 = vsel %vm792_vm9, %v2296_v12, %v2342_v38 }
 0xbac   :  { %v2373_v25 = vsel %vm894_vm15, %v2369_v24, %v2358_v8 }
 0xbad   :  { %3557 = vmatmul.msk.f32.vlgmr.msrb.gmra.mxu3 %vm1512_vm6, %v2373_v25 }
 0xbb2   :  { %v2360_v20 = vpop.permute.xlu0 %2359 }
 0xbb3   :  { %v2374_v28 = vsel %vm894_vm15, %v2370_v19, %v2360_v20 }
 0xbb5   :  { %3558 = vmatmul.msk.f32.gmra.mxu3 %vm1512_vm6, %v2374_v28 }
 0xbba   :  { %v2346_v26 = vpop.permute.xlu1 %2345 }
 0xbbb   :  { %v2371_v32 = vsel %vm792_vm9, %v2302_v29, %v2346_v26 }
 0xbbc   :  { %v2375_v33 = vsel %vm894_vm15, %v2371_v32, %v2362_v31 }
 0xbbd   :  { %3559 = vmatmul.msk.f32.gmra.mxu3 %vm1512_vm6, %v2375_v33 }
 0xbc2   :  { %v2364_v36 = vpop.permute.xlu1 %2363  ;;  %v2348_v37 = vpop.permute.xlu0 %2347 }
 0xbc3   :  { %v2372_v48 = vsel %vm792_vm9, %v2305_v34, %v2348_v37 }
 0xbc4   :  { %v2376_v52 = vsel %vm894_vm15, %v2372_v48, %v2364_v36 }
 0xbc5   :  { %3560 = vmatmul.msk.f32.gmra.mxu3 %vm1512_vm6, %v2376_v52 }
 0xc30   :  { %v2409_v41 = vpop.f32.mrf.mxu3 }
 0xc31   :  { %v2410_v10 = vadd.f32 %v3659_v44, %v2409_v41 }
 0xc33   :  { %v3561_v14 = vmul.f32 -1.442695, %v2410_v10 }
 0xc38   :  { %v2412_v45 = vpop.f32.mrf.mxu3 }
 0xc39   :  { %v2413_v47 = vadd.f32 %v3659_v44, %v2412_v45 }
 0xc3b   :  { %3832 = vtanh.f32 %v2413_v47  ;;  %v3562_v17 = vmul.f32 -1.442695, %v2413_v47 }
 0xc40   :  { %v2415_v51 = vpop.f32.mrf.mxu3 }
 0xc41   :  { %v3833_v53 = vpop.eup %3832  ;;  %v2416_v4 = vadd.f32 %v3659_v44, %v2415_v51 }
 0xc42   :  { %2507 = vrot.lane.b32.xlu1 %v3833_v53, %s5700_s4 }
 0xc43   :  { %3834 = vtanh.f32 %v2416_v4  ;;  %v3563_v18 = vmul.f32 -1.442695, %v2416_v4 }
 0xc48   :  { %v2418_v5 = vpop.f32.mrf.mxu3 }
 0xc49   :  { %v3835_v6 = vpop.eup %3834  ;;  %v2419_v7 = vadd.f32 %v3659_v44, %v2418_v5 }
 0xc4a   :  { %2509 = vrot.lane.b32.xlu0 %v3835_v6, %s5700_s4 }
 0xc4b   :  { %3836 = vtanh.f32 %v2419_v7  ;;  %v3564_v62 = vmul.f32 -1.442695, %v2419_v7 }
 0xc4c   :  { %3838 = vtanh.f32 %v2410_v10 }
 0xc4d   :  { %3840 = vpow2.f32 %v3564_v62 }
 0xc4e   :  { %3842 = vpow2.f32 %v3561_v14 }
 0xc51   :  { %v3837_v0 = vpop.eup %3836 }
 0xc52   :  { %2511 = vrot.lane.b32.xlu2 %v3837_v0, %s5700_s4  ;;  %v3839_v11 = vpop.eup %3838 }
 0xc53   :  { %v3841_v13 = vpop.eup %3840 }
 0xc54   :  { %v2436_v15 = vadd.f32 1.0, %v3841_v13  ;;  %v3843_v39 = vpop.eup %3842 }
 0xc55   :  { %v2433_v21 = vadd.f32 1.0, %v3843_v39 }
 0xc56   :  { %3844 = vrcp.f32 %v2436_v15  ;;  %v2493_v24 = vand.u32 2147483648, %v2436_v15  ;;  %vm2487_vm8 = vweird.f32 %v2436_v15  ;;  %v2491_v25 = vand.u32 2147483647, %v2436_v15 }
 0xc57   :  { %3846 = vpow2.f32 %v3562_v17  ;;  %v2448_v36 = vand.u32 2147483648, %v2433_v21  ;;  %vm2442_vm13 = vweird.f32 %v2433_v21  ;;  %v2446_v48 = vand.u32 2147483647, %v2433_v21 }
 0xc58   :  { %3848 = vpow2.f32 %v3563_v18  ;;  %v2494_v28 = vor.u32 1.1754944e-38, %v2493_v24  ;;  %vm2492_vm11 = vcmp.eq.f32.partialorder %v2491_v25, 8.507059e+37 }
 0xc59   :  { %3850 = vrcp.f32 %v2433_v21  ;;  %v2449_v45 = vor.u32 1.1754944e-38, %v2448_v36  ;;  %vm2447_vm4 = vcmp.eq.f32.partialorder %v2446_v48, 8.507059e+37 }
 0xc5a   :  { %2505 = vrot.lane.b32.xlu2 %v3839_v11, %s5700_s4 }
 0xc5c   :  { %v3845_v30 = vpop.eup %3844 }
 0xc5d   :  { %v3847_v55 = vpop.eup %3846  ;;  %v2483_v56 = vmul.f32 %v3845_v30, %v2436_v15  ;;  %vm2488_vm7 = vweird.f32 %v3845_v30 }
 0xc5e   :  { %v3849_v46 = vpop.eup %3848  ;;  %v5289_v3 = vadd.f32 1.0, %v3847_v55  ;;  %vm2489_vm10 = vmor %vm2487_vm8, %vm2488_vm7 }
 0xc5f   :  { %v5291_v22 = vadd.f32 1.0, %v3849_v46  ;;  %v2484_v23 = vsub.f32 1.0, %v2483_v56  ;;  %v3851_v42 = vpop.eup %3850 }
 0xc60   :  { %3852 = vrcp.f32 %v5289_v3  ;;  %v2438_v49 = vmul.f32 %v3851_v42, %v2433_v21  ;;  %vm2443_vm12 = vweird.f32 %v3851_v42  ;;  %vm2457_vm2 = vweird.f32 %v5289_v3 }
 0xc61   :  { %3854 = vrcp.f32 %v5291_v22  ;;  %v2485_v54 = vmul.f32 %v3845_v30, %v2484_v23  ;;  %vm2444_vm14 = vmor %vm2442_vm13, %vm2443_vm12  ;;  %v2463_v5 = vand.u32 2147483648, %v5289_v3  ;;  %v2478_v6 = vand.u32 2147483648, %v5291_v22  ;;  %v2525_v23 = vld [vmem:[%s5654_s21] sm:$0xff] }
 0xc62   :  { %v2439_v38 = vsub.f32 1.0, %v2438_v49  ;;  %v2461_v7 = vand.u32 2147483647, %v5289_v3  ;;  %vm2472_vm7 = vweird.f32 %v5291_v22  ;;  %v2476_v0 = vand.u32 2147483647, %v5291_v22 }
 0xc63   :  { %v2486_v12 = vadd.f32 %v3845_v30, %v2485_v54  ;;  %v2464_v13 = vor.u32 1.1754944e-38, %v2463_v5  ;;  %v2479_v15 = vor.u32 1.1754944e-38, %v2478_v6 }
 0xc64   :  { %v2440_v19 = vmul.f32 %v3851_v42, %v2439_v38 }
 0xc65   :  { %v2490_v40 = vsel %vm2489_vm10, %v3845_v30, %v2486_v12  ;;  %vm2462_vm10 = vcmp.eq.f32.partialorder %v2461_v7, 8.507059e+37 }
 0xc66   :  { %v3853_v9 = vpop.eup %3852  ;;  %v2495_v26 = vsel %vm2492_vm11, %v2494_v28, %v2490_v40  ;;  %v2441_v33 = vadd.f32 %v3851_v42, %v2440_v19  ;;  %vm2477_vm11 = vcmp.eq.f32.partialorder %v2476_v0, 8.507059e+37 }
 0xc67   :  { %v3855_v8 = vpop.eup %3854  ;;  %v2453_v27 = vmul.f32 %v3853_v9, %v5289_v3  ;;  %vm2458_vm3 = vweird.f32 %v3853_v9  ;;  %v2527_v3 = vld [vmem:[%s5654_s21 + $0x10] sm:$0xff] }
 0xc68   :  { %v2468_v20 = vmul.f32 %v3855_v8, %v5291_v22  ;;  %v2445_v41 = vsel %vm2444_vm14, %v3851_v42, %v2441_v33  ;;  %vm2473_vm5 = vweird.f32 %v3855_v8  ;;  %vm2459_vm1 = vmor %vm2457_vm2, %vm2458_vm3  ;;  %v2526_v22 = vld [vmem:[%s5654_s21 + $0x8] sm:$0xff]  ;;  %2655 = vmatpush.msrb.mxu1 %v2527_v3 }
 0xc69   :  { %v2454_v32 = vsub.f32 1.0, %v2453_v27  ;;  %v2450_v47 = vsel %vm2447_vm4, %v2449_v45, %v2445_v41  ;;  %vm2474_vm8 = vmor %vm2472_vm7, %vm2473_vm5 }
 0xc6a   :  { %v2469_v34 = vsub.f32 1.0, %v2468_v20  ;;  %2656 = vmatpush.msrb.mxu1 %v2526_v22 }
 0xc6b   :  { %v2455_v52 = vmul.f32 %v3853_v9, %v2454_v32 }
 0xc6c   :  { %v2470_v44 = vmul.f32 %v3855_v8, %v2469_v34  ;;  %2657 = vmatpush.msrb.mxu1 %v2525_v23 }
 0xc6d   :  { %v2456_v53 = vadd.f32 %v3853_v9, %v2455_v52  ;;  %v3660_v52 = vld [vmem:[%s5655_s22] ss:$0 sm:$0xff]  ;;  %s5704_s22 = sld [smem:[#allocation7_spill]] }
 0xc6f   :  { %v2460_v11 = vsel %vm2459_vm1, %v3853_v9, %v2456_v53 }
 0xc70   :  { %v2465_v17 = vsel %vm2462_vm10, %v2464_v13, %v2460_v11 }
 0xcac   :  { %v2512_v29 = vpop.permute.xlu2 %2511 }
 0xcad   :  { %v5297_v31 = vmul.f32 %v2512_v29, %v2495_v26 }
 0xcaf   :  { %v5301_v37 = vadd.f32 %v5297_v31, %v5168_v43  ;;  %v2471_v43 = vadd.f32 %v3855_v8, %v2470_v44 }
 0xcb1   :  { %2541 = vmatpush.msrb.mxu2 %v5301_v37  ;;  %2570 = vmatpush.msra.mxu0 %v5301_v37  ;;  %v2475_v62 = vsel %vm2474_vm8, %v3855_v8, %v2471_v43 }
 0xcb2   :  { %v2480_v39 = vsel %vm2477_vm11, %v2479_v15, %v2475_v62 }
 0xcb4   :  { %v2506_v51 = vpop.permute.xlu2 %2505  ;;  %v2508_v14 = vpop.permute.xlu1 %2507 }
 0xcb5   :  { %v5305_v4 = vmul.f32 %v2506_v51, %v2450_v47 }
 0xcb7   :  { %v5313_v10 = vadd.f32 %v5305_v4, %v5177_v35  ;;  %v5319_v35 = vmul.f32 %v2508_v14, %v2465_v17 }
 0xcb9   :  { %2607 = vrot.lane.b32.xlu1 %v5313_v10, %s3994_s2  ;;  %v5329_v55 = vadd.f32 %v5319_v35, %v5187_v59 }
 0xcbc   :  { %v2510_v18 = vpop.permute.xlu0 %2509 }
 0xcbd   :  { %v5321_v21 = vmul.f32 %v2510_v18, %v2480_v39 }
 0xcbf   :  { %v5325_v30 = vadd.f32 %v5321_v21, %v5184_v58 }
 0xcc1   :  { %2542 = vmatpush.msrb.mxu2 %v5325_v30  ;;  %2571 = vmatpush.msra.mxu0 %v5325_v30 }
 0xcc3   :  { %2543 = vmatpush.msrb.mxu2 %v5329_v55  ;;  %2572 = vmatpush.msra.mxu0 %v5329_v55 }
 0xcc5   :  { %2544 = vmatpush.msrb.mxu2 %v5313_v10  ;;  %2573 = vmatpush.msra.mxu0 %v5313_v10 }
 0xcc6   :  { %3569 = vmatmul.msk.f32.vlgmr.msra.gmra.mxu0 %vm105_vm0, %v5198_v16  ;;  %3565 = vmatmul.msk.f32.vlgmr.msrb.gmra.mxu2 %vm105_vm0, %v5205_v50 }
 0xcce   :  { %3570 = vmatmul.msk.f32.gmra.mxu0 %vm105_vm0, %v5212_v60  ;;  %3566 = vmatmul.msk.f32.gmra.mxu2 %vm105_vm0, %v5219_v61 }
 0xcd6   :  { %3571 = vmatmul.msk.f32.gmra.mxu0 %vm105_vm0, %v5226_v57  ;;  %3567 = vmatmul.msk.f32.gmra.mxu2 %vm105_vm0, %v5233_v63 }
 0xcde   :  { %3572 = vmatmul.msk.f32.gmra.mxu0 %vm105_vm0, %v5240_v1  ;;  %3568 = vmatmul.msk.f32.gmra.mxu2 %vm105_vm0, %v5247_v2 }
 0xd2b   :  { %v2608_v49 = vpop.permute.xlu1 %2607 }
 0xd43   :  { %v2575_v58 = vpop.f32.mrf.mxu0 }
 0xd44   :  { %2591 = vrot.lane.b32.xlu0 %v2575_v58, %s3992_s29 }
 0xd49   :  { %v2546_v42 = vpop.f32.mrf.mxu2 }
 0xd4b   :  { %v2578_v59 = vpop.f32.mrf.mxu0 }
 0xd4c   :  { %2609 = vrot.lane.b32.xlu0 %v5329_v55, %s3994_s2  ;;  %2593 = vrot.lane.b32.xlu2 %v2578_v59, %s3992_s29 }
 0xd51   :  { %v2549_v38 = vpop.f32.mrf.mxu2 }
 0xd53   :  { %v2581_v46 = vpop.f32.mrf.mxu0 }
 0xd54   :  { %2611 = vrot.lane.b32.xlu2 %v5325_v30, %s3994_s2  ;;  %2595 = vrot.lane.b32.xlu1 %v2581_v46, %s3992_s29 }
 0xd59   :  { %v2552_v27 = vpop.f32.mrf.mxu2 }
 0xd5b   :  { %v2584_v56 = vpop.f32.mrf.mxu0 }
 0xd5c   :  { %2613 = vrot.lane.b32.xlu1 %v5301_v37, %s3994_s2  ;;  %2597 = vrot.lane.b32.xlu0 %v2584_v56, %s3992_s29 }
 0xd61   :  { %v2555_v26 = vpop.f32.mrf.mxu2 }
 0xda6   :  { %v2594_v8 = vpop.permute.xlu2 %2593 }
 0xda7   :  { %v2620_v24 = vsel %vm792_vm9, %v2549_v38, %v2594_v8 }
 0xdae   :  { %v2612_v20 = vpop.permute.xlu2 %2611 }
 0xdb6   :  { %v2592_v54 = vpop.permute.xlu0 %2591 }
 0xdb7   :  { %v2619_v9 = vsel %vm792_vm9, %v2546_v42, %v2592_v54 }
 0xdb8   :  { %v2623_v12 = vsel %vm894_vm15, %v2619_v9, %v2608_v49 }
 0xdb9   :  { %3573 = vmatmul.msk.f32.vlgmr.msrb.gmra.mxu1 %vm1512_vm6, %v2623_v12 }
 0xdbe   :  { %v2610_v25 = vpop.permute.xlu0 %2609 }
 0xdbf   :  { %v2624_v40 = vsel %vm894_vm15, %v2620_v24, %v2610_v25 }
 0xdc1   :  { %3574 = vmatmul.msk.f32.gmra.mxu1 %vm1512_vm6, %v2624_v40 }
 0xdc6   :  { %v2596_v19 = vpop.permute.xlu1 %2595 }
 0xdc7   :  { %v2621_v28 = vsel %vm792_vm9, %v2552_v27, %v2596_v19 }
 0xdc8   :  { %v2625_v29 = vsel %vm894_vm15, %v2621_v28, %v2612_v20 }
 0xdc9   :  { %3575 = vmatmul.msk.f32.gmra.mxu1 %vm1512_vm6, %v2625_v29 }
 0xdce   :  { %v2614_v32 = vpop.permute.xlu1 %2613  ;;  %v2598_v33 = vpop.permute.xlu0 %2597 }
 0xdcf   :  { %v2622_v34 = vsel %vm792_vm9, %v2555_v26, %v2598_v33 }
 0xdd0   :  { %v2626_v36 = vsel %vm894_vm15, %v2622_v34, %v2614_v32 }
 0xdd1   :  { %3576 = vmatmul.msk.f32.gmra.mxu1 %vm1512_vm6, %v2626_v36 }
 0xe36   :  { %v2659_v48 = vpop.f32.mrf.mxu1 }
 0xe37   :  { %v2660_v6 = vadd.f32 %v3660_v52, %v2659_v48 }
 0xe39   :  { %v3577_v62 = vmul.f32 -1.442695, %v2660_v6 }
 0xe3e   :  { %v2662_v41 = vpop.f32.mrf.mxu1 }
 0xe3f   :  { %v2663_v44 = vadd.f32 %v3660_v52, %v2662_v41 }
 0xe41   :  { %3856 = vtanh.f32 %v2663_v44  ;;  %v3578_v15 = vmul.f32 -1.442695, %v2663_v44 }
 0xe46   :  { %v2665_v45 = vpop.f32.mrf.mxu1 }
 0xe47   :  { %v3857_v47 = vpop.eup %3856  ;;  %v2666_v51 = vadd.f32 %v3660_v52, %v2665_v45 }
 0xe48   :  { %2757 = vrot.lane.b32.xlu1 %v3857_v47, %s5700_s4 }
 0xe49   :  { %3858 = vtanh.f32 %v2666_v51  ;;  %v3579_v17 = vmul.f32 -1.442695, %v2666_v51 }
 0xe4e   :  { %v2668_v53 = vpop.f32.mrf.mxu1 }
 0xe4f   :  { %v3859_v43 = vpop.eup %3858  ;;  %v2669_v5 = vadd.f32 %v3660_v52, %v2668_v53 }
 0xe50   :  { %2759 = vrot.lane.b32.xlu0 %v3859_v43, %s5700_s4 }
 0xe51   :  { %3860 = vtanh.f32 %v2669_v5  ;;  %v3580_v11 = vmul.f32 -1.442695, %v2669_v5 }
 0xe52   :  { %3862 = vtanh.f32 %v2660_v6 }
 0xe53   :  { %3864 = vpow2.f32 %v3580_v11 }
 0xe54   :  { %3866 = vpow2.f32 %v3577_v62 }
 0xe57   :  { %v3861_v7 = vpop.eup %3860 }
 0xe58   :  { %2761 = vrot.lane.b32.xlu2 %v3861_v7, %s5700_s4  ;;  %v3863_v0 = vpop.eup %3862 }
 0xe59   :  { %v3865_v14 = vpop.eup %3864 }
 0xe5a   :  { %v2686_v13 = vadd.f32 1.0, %v3865_v14  ;;  %v3867_v18 = vpop.eup %3866 }
 0xe5b   :  { %v2683_v39 = vadd.f32 1.0, %v3867_v18 }
 0xe5c   :  { %3868 = vrcp.f32 %v2686_v13  ;;  %v2743_v24 = vand.u32 2147483648, %v2686_v13  ;;  %vm2737_vm13 = vweird.f32 %v2686_v13  ;;  %v2741_v25 = vand.u32 2147483647, %v2686_v13 }
 0xe5d   :  { %3870 = vpow2.f32 %v3578_v15  ;;  %v2698_v48 = vand.u32 2147483648, %v2683_v39  ;;  %vm2692_vm5 = vweird.f32 %v2683_v39  ;;  %v2696_v41 = vand.u32 2147483647, %v2683_v39 }
 0xe5e   :  { %3872 = vpow2.f32 %v3579_v17  ;;  %v2744_v28 = vor.u32 1.1754944e-38, %v2743_v24  ;;  %vm2742_vm4 = vcmp.eq.f32.partialorder %v2741_v25, 8.507059e+37 }
 0xe5f   :  { %3874 = vrcp.f32 %v2683_v39  ;;  %v2699_v51 = vor.u32 1.1754944e-38, %v2698_v48  ;;  %vm2697_vm1 = vcmp.eq.f32.partialorder %v2696_v41, 8.507059e+37 }
 0xe60   :  { %2755 = vrot.lane.b32.xlu2 %v3863_v0, %s5700_s4 }
 0xe62   :  { %v3869_v58 = vpop.eup %3868 }
 0xe63   :  { %v3871_v59 = vpop.eup %3870  ;;  %v2733_v56 = vmul.f32 %v3869_v58, %v2686_v13  ;;  %vm2738_vm12 = vweird.f32 %v3869_v58 }
 0xe64   :  { %v3873_v46 = vpop.eup %3872  ;;  %v5391_v3 = vadd.f32 1.0, %v3871_v59  ;;  %vm2739_vm14 = vmor %vm2737_vm13, %vm2738_vm12 }
 0xe65   :  { %v5393_v22 = vadd.f32 1.0, %v3873_v46  ;;  %v2734_v23 = vsub.f32 1.0, %v2733_v56  ;;  %v3875_v42 = vpop.eup %3874 }
 0xe66   :  { %3876 = vrcp.f32 %v5391_v3  ;;  %v2688_v49 = vmul.f32 %v3875_v42, %v2683_v39  ;;  %vm2693_vm3 = vweird.f32 %v3875_v42  ;;  %vm2707_vm10 = vweird.f32 %v5391_v3 }
 0xe67   :  { %3878 = vrcp.f32 %v5393_v22  ;;  %v2735_v54 = vmul.f32 %v3869_v58, %v2734_v23  ;;  %vm2694_vm2 = vmor %vm2692_vm5, %vm2693_vm3  ;;  %v2728_v0 = vand.u32 2147483648, %v5393_v22  ;;  %v2711_v11 = vand.u32 2147483647, %v5391_v3 }
 0xe68   :  { %v2689_v38 = vsub.f32 1.0, %v2688_v49  ;;  %vm2722_vm12 = vweird.f32 %v5393_v22  ;;  %v2726_v14 = vand.u32 2147483647, %v5393_v22 }
 0xe69   :  { %v2736_v12 = vadd.f32 %v3869_v58, %v2735_v54  ;;  %v2729_v39 = vor.u32 1.1754944e-38, %v2728_v0 }
 0xe6a   :  { %v2690_v19 = vmul.f32 %v3875_v42, %v2689_v38 }
 0xe6b   :  { %v2740_v40 = vsel %vm2739_vm14, %v3869_v58, %v2736_v12  ;;  %vm2712_vm14 = vcmp.eq.f32.partialorder %v2711_v11, 8.507059e+37 }
 0xe6c   :  { %v3877_v9 = vpop.eup %3876  ;;  %v2745_v26 = vsel %vm2742_vm4, %v2744_v28, %v2740_v40  ;;  %v2691_v34 = vadd.f32 %v3875_v42, %v2690_v19  ;;  %vm2727_vm4 = vcmp.eq.f32.partialorder %v2726_v14, 8.507059e+37 }
 0xe6d   :  { %v3879_v8 = vpop.eup %3878  ;;  %v2703_v27 = vmul.f32 %v3877_v9, %v5391_v3  ;;  %vm2708_vm7 = vweird.f32 %v3877_v9 }
 0xe6e   :  { %v2718_v20 = vmul.f32 %v3879_v8, %v5393_v22  ;;  %v2695_v45 = vsel %vm2694_vm2, %v3875_v42, %v2691_v34  ;;  %vm2723_vm8 = vweird.f32 %v3879_v8  ;;  %vm2709_vm11 = vmor %vm2707_vm10, %vm2708_vm7  ;;  %v3158_v22 = vld [vmem:[%s5701_s11 + $0x8] sm:$0xff]  ;;  %v3157_v42 = vld [vmem:[%s5701_s11] sm:$0xff] }
 0xe6f   :  { %v2704_v33 = vsub.f32 1.0, %v2703_v27  ;;  %v2700_v53 = vsel %vm2697_vm1, %v2699_v51, %v2695_v45  ;;  %vm2724_vm13 = vmor %vm2722_vm12, %vm2723_vm8  ;;  %v3662_v34 = vld [vmem:[%s5659_s26] ss:$0 sm:$0xff] }
 0xe70   :  { %v2719_v36 = vsub.f32 1.0, %v2718_v20 }
 0xe71   :  { %v2705_v44 = vmul.f32 %v3877_v9, %v2704_v33  ;;  %v3661_v33 = vld [vmem:[%s5657_s24] ss:$0 sm:$0xff]  ;;  %s4000_s24 = smov 112  }
 0xe72   :  { %v2720_v47 = vmul.f32 %v3879_v8, %v2719_v36 }
 0xe73   :  { %v2706_v5 = vadd.f32 %v3877_v9, %v2705_v44 }
 0xe74   :  { %v2721_v7 = vadd.f32 %v3879_v8, %v2720_v47 }
 0xe75   :  { %v2710_v13 = vsel %vm2709_vm11, %v3877_v9, %v2706_v5 }
 0xe76   :  { %v2725_v15 = vsel %vm2724_vm13, %v3879_v8, %v2721_v7 }
 0xe77   :  { %v2730_v46 = vsel %vm2727_vm4, %v2729_v39, %v2725_v15 }
 0xeb2   :  { %v2762_v29 = vpop.permute.xlu2 %2761 }
 0xeb3   :  { %v5399_v32 = vmul.f32 %v2762_v29, %v2745_v26 }
 0xeb5   :  { %v5403_v52 = vadd.f32 %v5399_v32, %v5301_v37  ;;  %v2713_v37 = vand.u32 2147483648, %v5391_v3 }
 0xeb7   :  { %2791 = vmatpush.msra.mxu3 %v5403_v52  ;;  %2820 = vmatpush.msra.mxu2 %v5403_v52  ;;  %v2714_v18 = vor.u32 1.1754944e-38, %v2713_v37 }
 0xeb9   :  { %v2715_v58 = vsel %vm2712_vm14, %v2714_v18, %v2710_v13 }
 0xeba   :  { %v2756_v43 = vpop.permute.xlu2 %2755  ;;  %v2758_v17 = vpop.permute.xlu1 %2757 }
 0xebb   :  { %v2767_v6 = vmul.f32 %v2756_v43, %v2700_v53  ;;  %v2768_v56 = vmul.f32 %v2758_v17, %v2715_v58 }
 0xebd   :  { %v2771_v62 = vadd.f32 %v2767_v6, %v5313_v10  ;;  %v2772_v23 = vadd.f32 %v2768_v56, %v5329_v55 }
 0xebf   :  { %2857 = vrot.lane.b32.xlu1 %v2771_v62, %s3994_s2 }
 0xec2   :  { %v2760_v59 = vpop.permute.xlu0 %2759 }
 0xec3   :  { %v2769_v3 = vmul.f32 %v2760_v59, %v2730_v46 }
 0xec5   :  { %v2773_v10 = vadd.f32 %v2769_v3, %v5325_v30 }
 0xec7   :  { %2792 = vmatpush.msra.mxu3 %v2773_v10  ;;  %2821 = vmatpush.msra.mxu2 %v2773_v10 }
 0xec9   :  { %2793 = vmatpush.msra.mxu3 %v2772_v23  ;;  %2822 = vmatpush.msra.mxu2 %v2772_v23 }
 0xecb   :  { %2794 = vmatpush.msra.mxu3 %v2771_v62  ;;  %2823 = vmatpush.msra.mxu2 %v2771_v62 }
 0xecc   :  { %3581 = vmatmul.msk.f32.vlgmr.msra.gmra.mxu3 %vm105_vm0, %v5205_v50  ;;  %3585 = vmatmul.msk.f32.vlgmr.msra.gmra.mxu2 %vm105_vm0, %v5198_v16 }
 0xecd   :  { %3189 = vmatpush.msrb.mxu3 %v3158_v22  ;;  %3230 = vmatpush.msrb.mxu2 %v3157_v42 }
 0xed4   :  { %3582 = vmatmul.msk.f32.gmra.mxu3 %vm105_vm0, %v5219_v61  ;;  %3586 = vmatmul.msk.f32.gmra.mxu2 %vm105_vm0, %v5212_v60 }
 0xedc   :  { %3583 = vmatmul.msk.f32.gmra.mxu3 %vm105_vm0, %v5233_v63  ;;  %3587 = vmatmul.msk.f32.gmra.mxu2 %vm105_vm0, %v5226_v57  ;;  %v2777_v57 = vld [vmem:[%s5656_s23 + $0x10] sm:$0xff] }
 0xedd   :  { %v3023_v63 = vld [vmem:[%s5658_s25 + $0x10] sm:$0xff]  ;;  %2905 = vmatpush.msrb.mxu0 %v2777_v57 }
 0xede   :  { %3041 = vmatpush.msra.mxu1 %v3023_v63 }
 0xee4   :  { %3584 = vmatmul.msk.f32.gmra.mxu3 %vm105_vm0, %v5247_v2  ;;  %3588 = vmatmul.msk.f32.gmra.mxu2 %vm105_vm0, %v5240_v1  ;;  %v2776_v1 = vld [vmem:[%s5656_s23 + $0x8] sm:$0xff] }
 0xee5   :  { %v3022_v2 = vld [vmem:[%s5658_s25 + $0x8] sm:$0xff]  ;;  %2906 = vmatpush.msrb.mxu0 %v2776_v1 }
 0xee6   :  { %3042 = vmatpush.msra.mxu1 %v3022_v2 }
 0xeec   :  { %3605 = vmatmul.msk.f32.vlgmr.msrb.gmra.mxu3 %vm792_vm9, %v2767_v6  ;;  %3609 = vmatmul.msk.f32.vlgmr.msrb.gmra.mxu2 %vm792_vm9, %v5305_v4  ;;  %v3021_v4 = vld [vmem:[%s5658_s25] sm:$0xff] }
 0xeed   :  { %3043 = vmatpush.msra.mxu1 %v3021_v4 }
 0xef4   :  { %3606 = vmatmul.msk.f32.gmra.mxu3 %vm792_vm9, %v2768_v56  ;;  %3610 = vmatmul.msk.f32.gmra.mxu2 %vm792_vm9, %v5319_v35 }
 0xefc   :  { %3607 = vmatmul.msk.f32.gmra.mxu3 %vm792_vm9, %v2769_v3  ;;  %3611 = vmatmul.msk.f32.gmra.mxu2 %vm792_vm9, %v5321_v21  ;;  %v3159_v3 = vld [vmem:[%s5701_s11 + $0x10] sm:$0xff] }
 0xf04   :  { %3608 = vmatmul.msk.f32.gmra.mxu3 %vm792_vm9, %v5399_v32  ;;  %3612 = vmatmul.msk.f32.gmra.mxu2 %vm792_vm9, %v5297_v31  ;;  %v2775_v31 = vld [vmem:[%s5656_s23] sm:$0xff] }
 0xf05   :  { %2907 = vmatpush.msrb.mxu0 %v2775_v31  ;;  %v3160_v31 = vld [vmem:[%s5701_s11 + $0x18] sm:$0xff] }
 0xf07   :  { %3271 = vmatpush.msra.mxu0 %v3159_v3 }
 0xf31   :  { %v2858_v30 = vpop.permute.xlu1 %2857 }
 0xf4f   :  { %v2825_v16 = vpop.f32.mrf.mxu2  ;;  %v2796_v35 = vpop.f32.mrf.mxu3 }
 0xf50   :  { %2841 = vrot.lane.b32.xlu0 %v2825_v16, %s3992_s29 }
 0xf57   :  { %v2828_v50 = vpop.f32.mrf.mxu2  ;;  %v2799_v49 = vpop.f32.mrf.mxu3 }
 0xf58   :  { %2859 = vrot.lane.b32.xlu0 %v2772_v23, %s3994_s2  ;;  %2843 = vrot.lane.b32.xlu2 %v2828_v50, %s3992_s29  ;;  %v3161_v23 = vld [vmem:[%s5701_s11 + $0x20] sm:$0xff] }
 0xf59   :  { %3315 = vmatpush.msrb.mxu1 %v3161_v23 }
 0xf5b   :  { %3316 = vmatpush.msrb.mxu1 %v3160_v31 }
 0xf5f   :  { %v2831_v60 = vpop.f32.mrf.mxu2  ;;  %v2802_v24 = vpop.f32.mrf.mxu3 }
 0xf60   :  { %2861 = vrot.lane.b32.xlu2 %v2773_v10, %s3994_s2  ;;  %2845 = vrot.lane.b32.xlu1 %v2831_v60, %s3992_s29 }
 0xf67   :  { %v2834_v61 = vpop.f32.mrf.mxu2  ;;  %v2805_v20 = vpop.f32.mrf.mxu3 }
 0xf68   :  { %2863 = vrot.lane.b32.xlu1 %v5403_v52, %s3994_s2  ;;  %2847 = vrot.lane.b32.xlu0 %v2834_v61, %s3992_s29 }
 0xfb2   :  { %v2844_v9 = vpop.permute.xlu2 %2843 }
 0xfb3   :  { %v2870_v12 = vsel %vm792_vm9, %v2799_v49, %v2844_v9 }
 0xfba   :  { %v2862_v40 = vpop.permute.xlu2 %2861 }
 0xfc2   :  { %v2842_v21 = vpop.permute.xlu0 %2841 }
 0xfc3   :  { %v2869_v55 = vsel %vm792_vm9, %v2796_v35, %v2842_v21 }
 0xfc4   :  { %v2873_v54 = vsel %vm894_vm15, %v2869_v55, %v2858_v30 }
 0xfc5   :  { %3589 = vmatmul.msk.f32.vlgmr.msrb.gmra.mxu0 %vm1512_vm6, %v2873_v54  ;;  %3597 = vmatmul.msk.f32.vlgmr.msra.gmra.mxu1 %vm1512_vm6, %v2873_v54 }
 0xfca   :  { %v2860_v38 = vpop.permute.xlu0 %2859 }
 0xfcb   :  { %v2874_v8 = vsel %vm894_vm15, %v2870_v12, %v2860_v38 }
 0xfcd   :  { %3590 = vmatmul.msk.f32.gmra.mxu0 %vm1512_vm6, %v2874_v8  ;;  %3598 = vmatmul.msk.f32.gmra.mxu1 %vm1512_vm6, %v2874_v8 }
 0xfd2   :  { %v2846_v25 = vpop.permute.xlu1 %2845 }
 0xfd3   :  { %v2871_v27 = vsel %vm792_vm9, %v2802_v24, %v2846_v25 }
 0xfd4   :  { %v2875_v19 = vsel %vm894_vm15, %v2871_v27, %v2862_v40 }
 0xfd5   :  { %3591 = vmatmul.msk.f32.gmra.mxu0 %vm1512_vm6, %v2875_v19  ;;  %3599 = vmatmul.msk.f32.gmra.mxu1 %vm1512_vm6, %v2875_v19 }
 0xfda   :  { %v2864_v28 = vpop.permute.xlu1 %2863  ;;  %v2848_v29 = vpop.permute.xlu0 %2847 }
 0xfdb   :  { %v2872_v26 = vsel %vm792_vm9, %v2805_v20, %v2848_v29 }
 0xfdc   :  { %v2876_v32 = vsel %vm894_vm15, %v2872_v26, %v2864_v28 }
 0xfdd   :  { %3592 = vmatmul.msk.f32.gmra.mxu0 %vm1512_vm6, %v2876_v32  ;;  %3600 = vmatmul.msk.f32.gmra.mxu1 %vm1512_vm6, %v2876_v32 }
0x1042   :  { %v2909_v36 = vpop.f32.mrf.mxu0  ;;  %v3045_v48 = vpop.f32.mrf.mxu1 }
0x1043   :  { %v2910_v52 = vadd.f32 %v3661_v33, %v2909_v36  ;;  %v3046_v41 = vadd.f32 %v3662_v34, %v3045_v48 }
0x1045   :  { %3880 = vtanh.f32 %v2910_v52  ;;  %v3593_v59 = vmul.f32 -1.442695, %v2910_v52  ;;  %v3601_v22 = vmul.f32 -1.442695, %v3046_v41 }
0x1046   :  { %3882 = vtanh.f32 %v3046_v41 }
0x104a   :  { %v2912_v44 = vpop.f32.mrf.mxu0  ;;  %v3048_v45 = vpop.f32.mrf.mxu1 }
0x104b   :  { %v3881_v47 = vpop.eup %3880  ;;  %v2913_v51 = vadd.f32 %v3661_v33, %v2912_v44  ;;  %v3049_v53 = vadd.f32 %v3662_v34, %v3048_v45 }
0x104c   :  { %v3883_v43 = vpop.eup %3882  ;;  %3005 = vrot.lane.b32.xlu2 %v3881_v47, %s5700_s4 }
0x104d   :  { %3884 = vtanh.f32 %v2913_v51  ;;  %3141 = vrot.lane.b32.xlu0 %v3883_v43, %s4000_s24  ;;  %v3594_v50 = vmul.f32 -1.442695, %v2913_v51  ;;  %v3602_v60 = vmul.f32 -1.442695, %v3049_v53 }
0x104e   :  { %3886 = vtanh.f32 %v3049_v53 }
0x1052   :  { %v2915_v5 = vpop.f32.mrf.mxu0  ;;  %v3051_v6 = vpop.f32.mrf.mxu1 }
0x1053   :  { %v3885_v7 = vpop.eup %3884  ;;  %v2916_v37 = vadd.f32 %v3661_v33, %v2915_v5  ;;  %v3052_v0 = vadd.f32 %v3662_v34, %v3051_v6 }
0x1054   :  { %v3887_v11 = vpop.eup %3886  ;;  %3007 = vrot.lane.b32.xlu1 %v3885_v7, %s5700_s4 }
0x1055   :  { %3888 = vtanh.f32 %v2916_v37  ;;  %3143 = vrot.lane.b32.xlu2 %v3887_v11, %s4000_s24  ;;  %v3595_v4 = vmul.f32 -1.442695, %v2916_v37  ;;  %v3603_v21 = vmul.f32 -1.442695, %v3052_v0 }
0x1056   :  { %3890 = vtanh.f32 %v3052_v0 }
0x105a   :  { %v2918_v62 = vpop.f32.mrf.mxu0  ;;  %v3054_v14 = vpop.f32.mrf.mxu1 }
0x105b   :  { %v3889_v13 = vpop.eup %3888  ;;  %v2919_v15 = vadd.f32 %v3661_v33, %v2918_v62  ;;  %v3055_v17 = vadd.f32 %v3662_v34, %v3054_v14 }
0x105c   :  { %v3891_v18 = vpop.eup %3890  ;;  %3009 = vrot.lane.b32.xlu0 %v3889_v13, %s5700_s4 }
0x105d   :  { %3892 = vtanh.f32 %v2919_v15  ;;  %3145 = vrot.lane.b32.xlu1 %v3891_v18, %s4000_s24  ;;  %v3596_v40 = vmul.f32 -1.442695, %v2919_v15  ;;  %v3604_v27 = vmul.f32 -1.442695, %v3055_v17 }
0x105e   :  { %3894 = vtanh.f32 %v3055_v17 }
0x105f   :  { %3896 = vpow2.f32 %v3593_v59 }
0x1063   :  { %v3893_v39 = vpop.eup %3892 }
0x1064   :  { %v3895_v58 = vpop.eup %3894  ;;  %3011 = vrot.lane.b32.xlu2 %v3893_v39, %s5700_s4 }
0x1065   :  { %3147 = vrot.lane.b32.xlu0 %v3895_v58, %s4000_s24  ;;  %v3897_v46 = vpop.eup %3896 }
0x1066   :  { %v2933_v56 = vadd.f32 1.0, %v3897_v46 }
0x1068   :  { %3898 = vrcp.f32 %v2933_v56  ;;  %v2948_v2 = vand.u32 2147483648, %v2933_v56  ;;  %vm2942_vm3 = vweird.f32 %v2933_v56  ;;  %v2946_v35 = vand.u32 2147483647, %v2933_v56 }
0x1069   :  { %3900 = vpow2.f32 %v3601_v22 }
0x106a   :  { %3902 = vpow2.f32 %v3594_v50  ;;  %v2949_v49 = vor.u32 1.1754944e-38, %v2948_v2  ;;  %vm2947_vm2 = vcmp.eq.f32.partialorder %v2946_v35, 8.507059e+37 }
0x106b   :  { %3904 = vpow2.f32 %v3602_v60 }
0x106e   :  { %v3899_v10 = vpop.eup %3898 }
0x106f   :  { %v2938_v42 = vmul.f32 %v3899_v10, %v2933_v56  ;;  %v3901_v57 = vpop.eup %3900  ;;  %vm2943_vm6 = vweird.f32 %v3899_v10 }
0x1070   :  { %v5510_v63 = vadd.f32 1.0, %v3901_v57  ;;  %vm2944_vm5 = vmor %vm2942_vm3, %vm2943_vm6  ;;  %v3903_v30 = vpop.eup %3902 }
0x1071   :  { %v2939_v16 = vsub.f32 1.0, %v2938_v42  ;;  %v3905_v54 = vpop.eup %3904  ;;  %v5516_v9 = vadd.f32 1.0, %v3903_v30 }
0x1072   :  { %3906 = vrcp.f32 %v5510_v63  ;;  %v5518_v8 = vadd.f32 1.0, %v3905_v54  ;;  %v3084_v7 = vand.u32 2147483648, %v5510_v63  ;;  %vm3078_vm7 = vweird.f32 %v5510_v63 }
0x1073   :  { %v2940_v61 = vmul.f32 %v3899_v10, %v2939_v16  ;;  %3908 = vpow2.f32 %v3595_v4  ;;  %v3082_v37 = vand.u32 2147483647, %v5510_v63  ;;  %v2963_v17 = vand.u32 2147483648, %v5516_v9 }
0x1074   :  { %3910 = vpow2.f32 %v3603_v21  ;;  %v3085_v15 = vor.u32 1.1754944e-38, %v3084_v7  ;;  %v3099_v22 = vand.u32 2147483648, %v5518_v8  ;;  %vm2957_vm13 = vweird.f32 %v5516_v9 }
0x1075   :  { %v2941_v1 = vadd.f32 %v3899_v10, %v2940_v61  ;;  %3912 = vrcp.f32 %v5516_v9  ;;  %vm3083_vm10 = vcmp.eq.f32.partialorder %v3082_v37, 8.507059e+37  ;;  %v2961_v42 = vand.u32 2147483647, %v5516_v9 }
0x1076   :  { %3914 = vrcp.f32 %v5518_v8  ;;  %vm3093_vm14 = vweird.f32 %v5518_v8  ;;  %v3097_v16 = vand.u32 2147483647, %v5518_v8  ;;  %v3100_v35 = vor.u32 1.1754944e-38, %v3099_v22 }
0x1077   :  { %v2945_v55 = vsel %vm2944_vm5, %v3899_v10, %v2941_v1  ;;  %3916 = vpow2.f32 %v3596_v40  ;;  %v2964_v1 = vor.u32 1.1754944e-38, %v2963_v17  ;;  %vm2962_vm3 = vcmp.eq.f32.partialorder %v2961_v42, 8.507059e+37 }
0x1078   :  { %v2950_v38 = vsel %vm2947_vm2, %v2949_v49, %v2945_v55  ;;  %v3907_v25 = vpop.eup %3906  ;;  %3918 = vpow2.f32 %v3604_v27  ;;  %vm3098_vm5 = vcmp.eq.f32.partialorder %v3097_v16, 8.507059e+37 }
0x1079   :  { %v3909_v19 = vpop.eup %3908  ;;  %v3074_v28 = vmul.f32 %v3907_v25, %v5510_v63  ;;  %vm3079_vm1 = vweird.f32 %v3907_v25 }
0x107a   :  { %v3911_v20 = vpop.eup %3910  ;;  %v5524_v29 = vadd.f32 1.0, %v3909_v19  ;;  %vm3080_vm8 = vmor %vm3078_vm7, %vm3079_vm1 }
0x107b   :  { %v5526_v26 = vadd.f32 1.0, %v3911_v20  ;;  %v5528_v32 = vpop.eup %3912  ;;  %v3075_v33 = vsub.f32 1.0, %v3074_v28 }
0x107c   :  { %v5530_v34 = vpop.eup %3914  ;;  %3920 = vrcp.f32 %v5524_v29  ;;  %v2953_v48 = vmul.f32 %v5528_v32, %v5516_v9  ;;  %vm2958_vm11 = vweird.f32 %v5528_v32  ;;  %v2978_v55 = vand.u32 2147483648, %v5524_v29 }
0x107d   :  { %v3917_v36 = vpop.eup %3916  ;;  %3922 = vrcp.f32 %v5526_v26  ;;  %v3089_v41 = vmul.f32 %v5530_v34, %v5518_v8  ;;  %v3076_v44 = vmul.f32 %v3907_v25, %v3075_v33  ;;  %vm3094_vm12 = vweird.f32 %v5530_v34  ;;  %vm2959_vm4 = vmor %vm2957_vm13, %vm2958_vm11 }
0x107e   :  { %v3919_v52 = vpop.eup %3918  ;;  %v5538_v45 = vadd.f32 1.0, %v3917_v36  ;;  %v2954_v51 = vsub.f32 1.0, %v2953_v48  ;;  %vm5572_vm6 = vmor %vm3093_vm14, %vm3094_vm12  ;;  %vm2972_vm7 = vweird.f32 %v5524_v29  ;;  %v2976_v40 = vand.u32 2147483647, %v5524_v29 }
0x107f   :  { %v5540_v47 = vadd.f32 1.0, %v3919_v52  ;;  %v3090_v43 = vsub.f32 1.0, %v3089_v41  ;;  %v3077_v5 = vadd.f32 %v3907_v25, %v3076_v44  ;;  %v3112_v27 = vand.u32 2147483647, %v5526_v26 }
0x1080   :  { %3924 = vrcp.f32 %v5538_v45  ;;  %v2955_v0 = vmul.f32 %v5528_v32, %v2954_v51  ;;  %vm2977_vm12 = vcmp.eq.f32.partialorder %v2976_v40, 8.507059e+37  ;;  %v2993_v44 = vand.u32 2147483648, %v5538_v45 }
0x1081   :  { %3926 = vrcp.f32 %v5540_v47  ;;  %v3091_v62 = vmul.f32 %v5530_v34, %v3090_v43  ;;  %v3081_v14 = vsel %vm3080_vm8, %v3907_v25, %v3077_v5  ;;  %v3114_v25 = vand.u32 2147483648, %v5526_v26 }
0x1082   :  { %v5542_v53 = vpop.eup %3920  ;;  %v3086_v39 = vsel %vm3083_vm10, %v3085_v15, %v3081_v14  ;;  %v2956_v58 = vadd.f32 %v5528_v32, %v2955_v0  ;;  %vm3108_vm8 = vweird.f32 %v5526_v26  ;;  %vm3113_vm13 = vcmp.eq.f32.partialorder %v3112_v27, 8.507059e+37 }
0x1083   :  { %v5544_v6 = vpop.eup %3922  ;;  %v2968_v11 = vmul.f32 %v5542_v53, %v5524_v29  ;;  %v3092_v56 = vadd.f32 %v5530_v34, %v3091_v62  ;;  %vm2973_vm2 = vweird.f32 %v5542_v53  ;;  %v3115_v29 = vor.u32 1.1754944e-38, %v3114_v25 }
0x1084   :  { %v3104_v13 = vmul.f32 %v5544_v6, %v5526_v26  ;;  %v2960_v61 = vsel %vm2959_vm4, %v5528_v32, %v2956_v58  ;;  %vm3109_vm1 = vweird.f32 %v5544_v6  ;;  %vm2974_vm10 = vmor %vm2972_vm7, %vm2973_vm2  ;;  %v2979_v32 = vor.u32 1.1754944e-38, %v2978_v55 }
0x1085   :  { %v2969_v59 = vsub.f32 1.0, %v2968_v11  ;;  %v3096_v63 = vsel %vm5572_vm6, %v5530_v34, %v3092_v56  ;;  %v2965_v30 = vsel %vm2962_vm3, %v2964_v1, %v2960_v61  ;;  %vm3110_vm11 = vmor %vm3108_vm8, %vm3109_vm1  ;;  %vm2987_vm6 = vweird.f32 %v5538_v45 }
0x1086   :  { %v5560_v46 = vpop.eup %3924  ;;  %v3105_v10 = vsub.f32 1.0, %v3104_v13  ;;  %v3101_v54 = vsel %vm3098_vm5, %v3100_v35, %v3096_v63  ;;  %v2991_v43 = vand.u32 2147483647, %v5538_v45  ;;  %v3129_v5 = vand.u32 2147483648, %v5540_v47 }
0x1087   :  { %v5564_v23 = vpop.eup %3926  ;;  %v2983_v60 = vmul.f32 %v5560_v46, %v5538_v45  ;;  %v2970_v57 = vmul.f32 %v5542_v53, %v2969_v59  ;;  %vm2988_vm14 = vweird.f32 %v5560_v46  ;;  %vm3123_vm5 = vweird.f32 %v5540_v47 }
0x1088   :  { %v3106_v2 = vmul.f32 %v5544_v6, %v3105_v10  ;;  %v3119_v31 = vmul.f32 %v5564_v23, %v5540_v47  ;;  %vm3124_vm4 = vweird.f32 %v5564_v23  ;;  %vm2989_vm3 = vmor %vm2987_vm6, %vm2988_vm14  ;;  %v2994_v0 = vor.u32 1.1754944e-38, %v2993_v44 }
0x1089   :  { %v2984_v49 = vsub.f32 1.0, %v2983_v60  ;;  %vm3125_vm2 = vmor %vm3123_vm5, %vm3124_vm4  ;;  %vm2992_vm1 = vcmp.eq.f32.partialorder %v2991_v43, 8.507059e+37  ;;  %v3130_v45 = vor.u32 1.1754944e-38, %v3129_v5 }
0x108a   :  { %v3107_v8 = vadd.f32 %v5544_v6, %v3106_v2 }
0x108b   :  { %v2985_v19 = vmul.f32 %v5560_v46, %v2984_v49 }
0x108c   :  { %v3111_v28 = vsel %vm3110_vm11, %v5544_v6, %v3107_v8  ;;  %v3127_v6 = vand.u32 2147483647, %v5540_v47  ;;  %v3191_v47 = vpop.f32.mrf.mxu3 }
0x108d   :  { %v2986_v26 = vadd.f32 %v5560_v46, %v2985_v19  ;;  %v3116_v52 = vsel %vm3113_vm13, %v3115_v29, %v3111_v28 }
0x108e   :  { %vm3128_vm7 = vcmp.eq.f32.partialorder %v3127_v6, 8.507059e+37 }
0x108f   :  { %v2990_v7 = vsel %vm2989_vm3, %v5560_v46, %v2986_v26 }
0x1090   :  { %v2995_v62 = vsel %vm2992_vm1, %v2994_v0, %v2990_v7 }
0x10a6   :  { %v3006_v12 = vpop.permute.xlu2 %3005 }
0x10a7   :  { %v3017_v24 = vmul.f32 %v3006_v12, %v2950_v38  ;;  %v2971_v12 = vadd.f32 %v5542_v53, %v2970_v57 }
0x10a9   :  { %3613 = vmatmul.msk.f32.vlgmr.msra.gmra.mxu0 %vm792_vm9, %v3017_v24  ;;  %v3120_v24 = vsub.f32 1.0, %v3119_v31  ;;  %v2975_v20 = vsel %vm2974_vm10, %v5542_v53, %v2971_v12  ;;  %v3663_v12 = vld [vmem:[%s5705_s7] ss:$0 sm:$0xff] }
0x10aa   :  { %v2980_v36 = vsel %vm2977_vm12, %v2979_v32, %v2975_v20 }
0x10ab   :  { %v3121_v33 = vmul.f32 %v5564_v23, %v3120_v24 }
0x10ad   :  { %v3122_v53 = vadd.f32 %v5564_v23, %v3121_v33 }
0x10af   :  { %v3144_v4 = vpop.permute.xlu2 %3143  ;;  %v3126_v11 = vsel %vm3125_vm2, %v5564_v23, %v3122_v53 }
0x10b0   :  { %v3154_v38 = vmul.f32 %v3144_v4, %v3101_v54  ;;  %v3131_v15 = vsel %vm3128_vm7, %v3130_v45, %v3126_v11 }
0x10be   :  { %v3012_v37 = vpop.permute.xlu2 %3011 }
0x10bf   :  { %v3142_v18 = vpop.permute.xlu0 %3141  ;;  %v3020_v14 = vmul.f32 %v3012_v37, %v2995_v62 }
0x10c0   :  { %v3153_v3 = vmul.f32 %v3142_v18, %v3086_v39  ;;  %v3232_v18 = vpop.f32.mrf.mxu2  ;;  %v3194_v39 = vpop.f32.mrf.mxu3 }
0x10c2   :  { %3617 = vmatmul.msk.f32.vlgmr.msrb.gmra.mxu1 %vm894_vm15, %v3153_v3 }
0x10c6   :  { %v3008_v21 = vpop.permute.xlu1 %3007 }
0x10c7   :  { %v3018_v9 = vmul.f32 %v3008_v21, %v2965_v30  ;;  %v3233_v21 = vadd.f32 %v3232_v18, %v3191_v47 }
0x10c8   :  { %v3235_v58 = vpop.f32.mrf.mxu2  ;;  %v3197_v10 = vpop.f32.mrf.mxu3 }
0x10c9   :  { %3614 = vmatmul.msk.f32.gmra.mxu0 %vm792_vm9, %v3018_v9  ;;  %v3236_v63 = vadd.f32 %v3235_v58, %v3194_v39  ;;  %v3334_v9 = vld [vmem:[%s5704_s22] sm:$0x3] }
0x10ca   :  { %3618 = vmatmul.msk.f32.gmra.mxu1 %vm894_vm15, %v3154_v38 }
0x10ce   :  { %v3010_v34 = vpop.permute.xlu0 %3009 }
0x10cf   :  { %v3146_v48 = vpop.permute.xlu1 %3145  ;;  %v3019_v41 = vmul.f32 %v3010_v34, %v2980_v36 }
0x10d0   :  { %v3155_v51 = vmul.f32 %v3146_v48, %v3116_v52  ;;  %v3238_v23 = vpop.f32.mrf.mxu2  ;;  %v3200_v16 = vpop.f32.mrf.mxu3 }
0x10d1   :  { %3615 = vmatmul.msk.f32.gmra.mxu0 %vm792_vm9, %v3019_v41  ;;  %v3239_v60 = vadd.f32 %v3238_v23, %v3197_v10 }
0x10d2   :  { %3619 = vmatmul.msk.f32.gmra.mxu1 %vm894_vm15, %v3155_v51 }
0x10d7   :  { %v3148_v13 = vpop.permute.xlu0 %3147 }
0x10d8   :  { %v3156_v17 = vmul.f32 %v3148_v13, %v3131_v15  ;;  %v3241_v50 = vpop.f32.mrf.mxu2 }
0x10d9   :  { %3616 = vmatmul.msk.f32.gmra.mxu0 %vm792_vm9, %v3020_v14  ;;  %v3242_v61 = vadd.f32 %v3241_v50, %v3200_v16  ;;  %vm3362_vm9 = vcmask 9216  }
0x10da   :  { %3620 = vmatmul.msk.f32.gmra.mxu1 %vm894_vm15, %v3156_v17 }
0x1126   :  { %v3273_v59 = vpop.f32.mrf.mxu0 }
0x1127   :  { %v3285_v55 = vadd.f32 %v3273_v59, %v3233_v21 }
0x113f   :  { %v3318_v46 = vpop.f32.mrf.mxu1 }
0x1140   :  { %v3330_v49 = vadd.f32 %v3318_v46, %v3285_v55 }
0x1146   :  { %v3276_v56 = vpop.f32.mrf.mxu0 }
0x1147   :  { %v3321_v3 = vpop.f32.mrf.mxu1  ;;  %v3286_v4 = vadd.f32 %v3276_v56, %v3236_v63 }
0x1149   :  { %v3331_v54 = vadd.f32 %v3321_v3, %v3286_v4 }
0x114e   :  { %v3279_v22 = vpop.f32.mrf.mxu0 }
0x114f   :  { %v3324_v42 = vpop.f32.mrf.mxu1  ;;  %v3287_v1 = vadd.f32 %v3279_v22, %v3239_v60 }
0x1151   :  { %v3332_v30 = vadd.f32 %v3324_v42, %v3287_v1 }
0x1156   :  { %v3282_v57 = vpop.f32.mrf.mxu0 }
0x1157   :  { %v3288_v2 = vadd.f32 %v3282_v57, %v3242_v61  ;;  %v3327_v31 = vpop.f32.mrf.mxu1 }
0x1159   :  { %v3333_v35 = vadd.f32 %v3327_v31, %v3288_v2 }
0x115b   :  { %3354 = vmatpush.msra.mxu3 %v3333_v35 }
0x115d   :  { %3355 = vmatpush.msra.mxu3 %v3332_v30 }
0x115f   :  { %3356 = vmatpush.msra.mxu3 %v3331_v54 }
0x1161   :  { %3357 = vmatpush.msra.mxu3 %v3330_v49 }
0x1162   :  { %3621 = vmatmul.msk.f32.vlgmr.msra.gmra.mxu3 %vm105_vm0, %v3334_v9 }
0x11e5   :  { %v3359_v38 = vpop.f32.mrf.mxu3 }
0x11e6   :  { %v3360_v8 = vadd.f32 %v3663_v12, %v3359_v38 }
0x11e8   :  { %v3363_v24 = vsel %vm3362_vm9, %v3360_v8, -inf }
0x11e9   :  { %3364 = vmax.xlane.f32.xlu1 %v3363_v24 }
0x125c   :  { %v3365_v25 = vpop.xlane.xlu1 %3364 }
0x125d   :  { %v3366_v40 = vsub.f32 %v3360_v8, %v3365_v25 }
0x125f   :  { %v3367_v27 = vmul.f32 1.442695, %v3366_v40 }
0x1261   :  { %3928 = vpow2.f32 %v3367_v27 }
0x1267   :  { %v3929_v19 = vpop.eup %3928 }
0x1268   :  { %v3369_v20 = vsel %vm3362_vm9, %v3929_v19, 0.0 }
0x1269   :  { %3370 = vadd.xlane.f32.xlu2 %v3369_v20 }
0x12dc   :  { %v3371_v28 = vpop.xlane.xlu2 %3370 }
0x12dd   :  { %3930 = vrcp.f32 %v3371_v28  ;;  %v3383_v34 = vand.u32 2147483648, %v3371_v28  ;;  %v3381_v26 = vand.u32 2147483647, %v3371_v28  ;;  %vm3377_vm15 = vweird.f32 %v3371_v28 }
0x12df   :  { %v3384_v52 = vor.u32 1.1754944e-38, %v3383_v34  ;;  %vm3382_vm10 = vcmp.eq.f32.partialorder %v3381_v26, 8.507059e+37 }
0x12e3   :  { %v3931_v32 = vpop.eup %3930 }
0x12e4   :  { %v3373_v33 = vmul.f32 %v3931_v32, %v3371_v28  ;;  %vm3378_vm0 = vweird.f32 %v3931_v32 }
0x12e5   :  { %vm3379_vm8 = vmor %vm3377_vm15, %vm3378_vm0 }
0x12e6   :  { %v3374_v29 = vsub.f32 1.0, %v3373_v33 }
0x12e8   :  { %v3375_v36 = vmul.f32 %v3931_v32, %v3374_v29 }
0x12ea   :  { %v3376_v48 = vadd.f32 %v3931_v32, %v3375_v36 }
0x12ec   :  { %v3380_v41 = vsel %vm3379_vm8, %v3931_v32, %v3376_v48 }
0x12ed   :  { %v3385_v44 = vsel %vm3382_vm10, %v3384_v52, %v3380_v41 }
0x12ee   :  { %v3386_v51 = vmul.f32 %v3929_v19, %v3385_v44 }
0x12f0   :  { %3387 = vst.msk [vmem:[#allocation2] sm:$0x3] %vm3362_vm9, %v3386_v51 }
0x12f1   :  { %3398 = dma.vmem_to_hbm [thread:$0]  %s3394_s3, 32, %s3396_s17, [#allocation3]  }
0x12f2   :  { %3984 = dma.done.wait [#allocation3], 32  }
0x12f3   :  { %3985 = vsyncadd [#allocation3], 4294967264 }
0x12f4   :  { %3403 = vsyncpa [#allocation3], 1 }

</bundles_post_ra>
